<compile_context>
chip_gen: v7x
topology: tpu7x:2x2x1
jax: 0.10.0
libtpu: 0.0.40
codegen_flags: <defaults>
</compile_context>

<pallas_src>
import math

import jax
import jax.numpy as jnp
from jax import lax
from jax.experimental import pallas as pl
from jax.experimental.pallas import tpu as pltpu

F32 = jnp.float32
NEG_INF = -1e30
LN_EPS = 1e-5


# ---------------------------------------------------------------------------
# small helpers used inside kernels
# ---------------------------------------------------------------------------

def _mxdot(a, b):
    """MXU matmul: bf16 operands, f32 accumulate (bf16 needed for v6e/v7x MXU peak)."""
    return jnp.dot(a.astype(jnp.bfloat16), b.astype(jnp.bfloat16),
                   preferred_element_type=jnp.float32)


def _mxdot_nt(a, b):
    """a:(M,K) x b:(N,K) -> (M,N), contracting the last dim of both (q @ k^T form)."""
    return lax.dot_general(a.astype(jnp.bfloat16), b.astype(jnp.bfloat16),
                           (((1,), (1,)), ((), ())),
                           preferred_element_type=jnp.float32)


def _layernorm(x, g, b, eps=LN_EPS):
    mean = jnp.mean(x, axis=-1, keepdims=True)
    var = jnp.mean((x - mean) ** 2, axis=-1, keepdims=True)
    return (x - mean) * lax.rsqrt(var + eps) * g + b


def _log_softmax(x):
    x = x - jnp.max(x, axis=-1, keepdims=True)
    return x - jnp.log(jnp.sum(jnp.exp(x), axis=-1, keepdims=True))


def _silu(x):
    return x * jax.nn.sigmoid(x)


def _row_tile(m, cap=512):
    # Full array if small (block dim == full dim is always legal); otherwise a
    # 512-row tile: big enough for ~85% HBM roofline, small enough for v7x VMEM.
    return m if m <= cap else cap


def _parallel(n):
    return pltpu.CompilerParams(dimension_semantics=("parallel",) * n)


# ---------------------------------------------------------------------------
# Pallas kernels
# ---------------------------------------------------------------------------

def _linear_kernel(act):
    def kernel(x_ref, w_ref, b_ref, o_ref):
        y = _mxdot(x_ref[...], w_ref[...]) + b_ref[...]
        if act == "relu":
            y = jnp.maximum(y, 0.0)
        elif act == "silu":
            y = _silu(y)
        o_ref[...] = y
    return kernel


def pallas_linear(x, w, b, act=None):
    """Row-tiled x:(M,K) @ w:(K,N) + b, weights VMEM-resident, auto-pipelined."""
    M, K = x.shape
    N = w.shape[1]
    tm = _row_tile(M)
    cst = lambda i: (0, 0)
    return pl.pallas_call(
        _linear_kernel(act),
        grid=(pl.cdiv(M, tm),),
        out_shape=jax.ShapeDtypeStruct((M, N), F32),
        in_specs=[pl.BlockSpec((tm, K), lambda i: (i, 0)),
                  pl.BlockSpec((K, N), cst),
                  pl.BlockSpec((1, N), cst)],
        out_specs=pl.BlockSpec((tm, N), lambda i: (i, 0)),
        compiler_params=_parallel(1),
    )(x, w, b.reshape(1, N))


# --- fused feed-forward module: LN -> W1 -> SiLU -> W2 -> (+0.5*residual) [-> final LN]

def _ff_module_kernel(do_final_ln):
    def kernel(x_ref, g_ref, b_ref, w1_ref, b1_ref, w2_ref, b2_ref,
               fg_ref, fb_ref, o_ref):
        x = x_ref[...]
        y = _layernorm(x, g_ref[...], b_ref[...])
        y = _silu(_mxdot(y, w1_ref[...]) + b1_ref[...])
        y = _mxdot(y, w2_ref[...]) + b2_ref[...]
        out = x + 0.5 * y
        if do_final_ln:
            out = _layernorm(out, fg_ref[...], fb_ref[...])
        o_ref[...] = out
    return kernel


def pallas_ff_module(x, g, b, w1, b1, w2, b2, final_g, final_b, do_final_ln):
    M, D = x.shape
    ff = w1.shape[1]
    tm = _row_tile(M)
    cst = lambda i: (0, 0)
    return pl.pallas_call(
        _ff_module_kernel(do_final_ln),
        grid=(pl.cdiv(M, tm),),
        out_shape=jax.ShapeDtypeStruct((M, D), F32),
        in_specs=[pl.BlockSpec((tm, D), lambda i: (i, 0)),
                  pl.BlockSpec((1, D), cst), pl.BlockSpec((1, D), cst),
                  pl.BlockSpec((D, ff), cst), pl.BlockSpec((1, ff), cst),
                  pl.BlockSpec((ff, D), cst), pl.BlockSpec((1, D), cst),
                  pl.BlockSpec((1, D), cst), pl.BlockSpec((1, D), cst)],
        out_specs=pl.BlockSpec((tm, D), lambda i: (i, 0)),
        compiler_params=_parallel(1),
    )(x, g.reshape(1, D), b.reshape(1, D), w1, b1.reshape(1, ff),
      w2, b2.reshape(1, D), final_g.reshape(1, D), final_b.reshape(1, D))


# --- fused MHA module: LN -> fused QKV -> windowed causal attention -> out proj -> residual

def _mha_module_kernel(num_heads, num_prev):
    def kernel(x_ref, g_ref, b_ref, wqkv_ref, bqkv_ref, wo_ref, bo_ref, o_ref):
        x = x_ref[...]                                   # (T, D)
        T, D = x.shape
        dh = D // num_heads
        scale = 1.0 / math.sqrt(dh)

        y = _layernorm(x, g_ref[...], b_ref[...])
        qkv = _mxdot(y, wqkv_ref[...]) + bqkv_ref[...]   # (T, 3D)

        # banded causal additive mask built in-register (no TxT HBM mask array).
        # TODO(synk): for long T, switch to a flash-style K/V window via index_map
        #             so score work is O(T*window) instead of O(T^2).
        row = lax.broadcasted_iota(jnp.int32, (T, T), 0)
        col = lax.broadcasted_iota(jnp.int32, (T, T), 1)
        if isinstance(num_prev, str):                    # "all"
            allowed = col <= row
        else:
            allowed = (col <= row) & ((row - col) <= num_prev)
        bias = jnp.where(allowed, 0.0, NEG_INF).astype(F32)

        wo = wo_ref[...]
        acc = jnp.zeros((T, D), F32)
        for h in range(num_heads):
            qh = qkv[:, h * dh:(h + 1) * dh]
            kh = qkv[:, D + h * dh:D + (h + 1) * dh]
            vh = qkv[:, 2 * D + h * dh:2 * D + (h + 1) * dh]
            s = _mxdot_nt(qh, kh) * scale + bias                       # (T, T)
            s = s - jnp.max(s, axis=-1, keepdims=True)
            p = jnp.exp(s)
            inv = pl.reciprocal(jnp.sum(p, axis=-1, keepdims=True), approx=True)
            oh = _mxdot(p, vh) * inv                                   # (T, dh)
            acc = acc + _mxdot(oh, wo[h * dh:(h + 1) * dh, :])         # out-proj slice
        o_ref[...] = x + acc + bo_ref[...]
    return kernel


def pallas_mha_module(x, g, b, wqkv, bqkv, wo, bo, num_heads, num_prev):
    B, T, D = x.shape
    cst = lambda bb: (0, 0)
    return pl.pallas_call(
        _mha_module_kernel(num_heads, num_prev),
        grid=(B,),
        out_shape=jax.ShapeDtypeStruct((B, T, D), F32),
        in_specs=[pl.BlockSpec((None, T, D), lambda bb: (bb, 0, 0)),
                  pl.BlockSpec((1, D), cst), pl.BlockSpec((1, D), cst),
                  pl.BlockSpec((D, 3 * D), cst), pl.BlockSpec((1, 3 * D), cst),
                  pl.BlockSpec((D, D), cst), pl.BlockSpec((1, D), cst)],
        out_specs=pl.BlockSpec((None, T, D), lambda bb: (bb, 0, 0)),
        compiler_params=_parallel(1),
    )(x, g.reshape(1, D), b.reshape(1, D), wqkv, bqkv.reshape(1, 3 * D),
      wo, bo.reshape(1, D))


# --- fused convolution module: LN -> PW1 -> GLU -> causal depthwise -> LN -> SiLU -> PW2 -> residual

def _conv_module_kernel(K):
    def kernel(x_ref, g1_ref, b1_ref, pw1w_ref, pw1b_ref, dww_ref, dwb_ref,
               g2_ref, b2_ref, pw2w_ref, pw2b_ref, o_ref, buf_ref):
        x = x_ref[...]                                   # (T, D)
        T = x.shape[0]
        Cc = dww_ref.shape[1]

        y = _layernorm(x, g1_ref[...], b1_ref[...])
        y = _mxdot(y, pw1w_ref[...]) + pw1b_ref[...]     # (T, 2*Cc)
        y = y[:, :Cc] * jax.nn.sigmoid(y[:, Cc:])        # GLU

        # causal depthwise conv: left pad K-1 via a small VMEM staging buffer.
        buf_ref[0:K - 1, :] = jnp.zeros((K - 1, Cc), F32)
        buf_ref[K - 1:, :] = y
        acc = jnp.zeros((T, Cc), F32)
        for kk in range(K):
            acc = acc + buf_ref[kk:kk + T, :] * dww_ref[kk:kk + 1, :]
        y = acc + dwb_ref[...]

        # is_timewise_ln=True -> per-timestep LayerNorm.
        # TODO(synk): BatchNorm variant (is_timewise_ln=False) is not implemented.
        y = _layernorm(y, g2_ref[...], b2_ref[...])
        y = _silu(y)
        y = _mxdot(y, pw2w_ref[...]) + pw2b_ref[...]     # (T, D)
        o_ref[...] = x + y
    return kernel


def pallas_conv_module(x, g1, b1, pw1_w, pw1_b, dw_w, dw_b, g2, b2, pw2_w, pw2_b, K):
    B, T, D = x.shape
    Cc = dw_w.shape[1]
    cst = lambda bb: (0, 0)
    return pl.pallas_call(
        _conv_module_kernel(K),
        grid=(B,),
        out_shape=jax.ShapeDtypeStruct((B, T, D), F32),
        in_specs=[pl.BlockSpec((None, T, D), lambda bb: (bb, 0, 0)),
                  pl.BlockSpec((1, D), cst), pl.BlockSpec((1, D), cst),
                  pl.BlockSpec((D, 2 * Cc), cst), pl.BlockSpec((1, 2 * Cc), cst),
                  pl.BlockSpec((K, Cc), cst), pl.BlockSpec((1, Cc), cst),
                  pl.BlockSpec((1, Cc), cst), pl.BlockSpec((1, Cc), cst),
                  pl.BlockSpec((Cc, D), cst), pl.BlockSpec((1, D), cst)],
        out_specs=pl.BlockSpec((None, T, D), lambda bb: (bb, 0, 0)),
        scratch_shapes=[pltpu.VMEM((T + K - 1, Cc), F32)],
        compiler_params=_parallel(1),
    )(x, g1.reshape(1, D), b1.reshape(1, D), pw1_w, pw1_b.reshape(1, 2 * Cc),
      dw_w, dw_b.reshape(1, Cc), g2.reshape(1, Cc), b2.reshape(1, Cc),
      pw2_w, pw2_b.reshape(1, D))


# --- fused RNN-T joint + CTC head (per batch), vocab padded to a lane-dense width

def _heads_kernel(fused_softmax):
    def kernel(enc_ref, pred_ref, encw_ref, encb_ref, predw_ref, predb_ref,
               outw_ref, outb_ref, ctcw_ref, ctcb_ref,
               rnnt_ref, ctc_ref, ep_scratch):
        e = enc_ref[...]                                             # (T, D)
        T = e.shape[0]

        ep_scratch[...] = _mxdot(e, encw_ref[...]) + encb_ref[...]   # (T, J)
        pp = _mxdot(pred_ref[...], predw_ref[...]) + predb_ref[...]  # (U, J)

        ctc_logits = _mxdot(e, ctcw_ref[...]) + ctcb_ref[...]        # (T, Vp)
        if fused_softmax:
            ctc_logits = _log_softmax(ctc_logits)
        ctc_ref[...] = ctc_logits

        out_w = outw_ref[...]
        out_b = outb_ref[...]

        def step(t, carry):
            h = jnp.tanh(ep_scratch[pl.ds(t, 1), :] + pp)            # (U, J)
            logits = _mxdot(h, out_w) + out_b                        # (U, Vp)
            if fused_softmax:
                logits = _log_softmax(logits)
            rnnt_ref[t] = logits
            return carry

        lax.fori_loop(0, T, step, 0)
    return kernel


def pallas_joint_ctc(enc_out, pred_out, jp, cp, fused_softmax):
    B, T, D = enc_out.shape
    U, Hp = pred_out.shape[1], pred_out.shape[2]
    J = jp["enc_w"].shape[1]
    V = jp["out_w"].shape[1]
    Vp = ((V + 127) // 128) * 128                 # lane-dense output width
    out_w = jnp.pad(jp["out_w"], ((0, 0), (0, Vp - V)))
    out_b = jnp.pad(jp["out_b"], (0, Vp - V), constant_values=NEG_INF)
    ctc_w = jnp.pad(cp["w"], ((0, 0), (0, Vp - V)))
    ctc_b = jnp.pad(cp["b"], (0, Vp - V), constant_values=NEG_INF)
    cst = lambda bb: (0, 0)
    rnnt, ctc = pl.pallas_call(
        _heads_kernel(fused_softmax),
        grid=(B,),
        out_shape=(jax.ShapeDtypeStruct((B, T, U, Vp), F32),
                   jax.ShapeDtypeStruct((B, T, Vp), F32)),
        in_specs=[pl.BlockSpec((None, T, D), lambda bb: (bb, 0, 0)),
                  pl.BlockSpec((None, U, Hp), lambda bb: (bb, 0, 0)),
                  pl.BlockSpec((D, J), cst), pl.BlockSpec((1, J), cst),
                  pl.BlockSpec((Hp, J), cst), pl.BlockSpec((1, J), cst),
                  pl.BlockSpec((J, Vp), cst), pl.BlockSpec((1, Vp), cst),
                  pl.BlockSpec((D, Vp), cst), pl.BlockSpec((1, Vp), cst)],
        out_specs=(pl.BlockSpec((None, T, U, Vp), lambda bb: (bb, 0, 0, 0)),
                   pl.BlockSpec((None, T, Vp), lambda bb: (bb, 0, 0))),
        scratch_shapes=[pltpu.VMEM((T, J), F32)],
        compiler_params=_parallel(1),
    )(enc_out, pred_out,
      jp["enc_w"], jp["enc_b"].reshape(1, J),
      jp["pred_w"], jp["pred_b"].reshape(1, J),
      out_w, out_b.reshape(1, Vp),
      ctc_w, ctc_b.reshape(1, Vp))
    return rnnt[..., :V], ctc[..., :V]


# --- LSTM layer: full recurrence inside one kernel (weights + carry stay in VMEM)

def _lstm_kernel(H):
    def kernel(x_ref, wih_ref, whh_ref, b_ref, o_ref):
        Useq, B, _ = x_ref.shape
        wih = wih_ref[...]
        whh = whh_ref[...]
        bias = b_ref[...]

        def step(t, carry):
            h, c = carry
            xt = x_ref[t]                                            # (B, E)
            gates = _mxdot(xt, wih) + _mxdot(h, whh) + bias          # (B, 4H)
            i = jax.nn.sigmoid(gates[:, 0 * H:1 * H])
            f = jax.nn.sigmoid(gates[:, 1 * H:2 * H])
            g = jnp.tanh(gates[:, 2 * H:3 * H])
            o = jax.nn.sigmoid(gates[:, 3 * H:4 * H])
            c = f * c + i * g
            h = o * jnp.tanh(c)
            o_ref[t] = h
            return (h, c)

        h0 = jnp.zeros((B, H), F32)
        c0 = jnp.zeros((B, H), F32)
        lax.fori_loop(0, Useq, step, (h0, c0))
    return kernel


def pallas_lstm_layer(x_tbe, w_ih, w_hh, b):
    """x_tbe:(Useq, B, E) time-major -> (Useq, B, H)."""
    Useq, B, E = x_tbe.shape
    H = w_hh.shape[0]
    cst = lambda i: (0, 0)
    return pl.pallas_call(
        _lstm_kernel(H),
        grid=(1,),
        out_shape=jax.ShapeDtypeStruct((Useq, B, H), F32),
        in_specs=[pl.BlockSpec((Useq, B, E), lambda i: (0, 0, 0)),
                  pl.BlockSpec((E, 4 * H), cst),
                  pl.BlockSpec((H, 4 * H), cst),
                  pl.BlockSpec((1, 4 * H), cst)],
        out_specs=pl.BlockSpec((Useq, B, H), lambda i: (0, 0, 0)),
        compiler_params=pltpu.CompilerParams(dimension_semantics=("arbitrary",)),
    )(x_tbe, w_ih, w_hh, b.reshape(1, 4 * H))


# ---------------------------------------------------------------------------
# Model pieces (JAX glue around the Pallas kernels)
# ---------------------------------------------------------------------------

def im2col(x, k, s):
    """x:(B,H,W,C) -> patches (B,Ho,Wo,k*k*C) with (kt,kf,c) flatten order."""
    B, H, W, C = x.shape
    Ho = (H - k) // s + 1
    Wo = (W - k) // s + 1
    cols = []
    for kt in range(k):
        for kf in range(k):
            cols.append(x[:, kt:kt + s * Ho:s, kf:kf + s * Wo:s, :])
    patches = jnp.stack(cols, axis=3)                     # (B,Ho,Wo,k*k,C)
    return patches.reshape(B, Ho, Wo, k * k * C), Ho, Wo


def conformer_block(p, cfg, x):
    B, T, D = x.shape
    H = cfg["encoder_mha_num_heads"]
    num_prev = cfg["encoder_num_previous_frames"]
    K = cfg["encoder_conv_kernel_size"]

    # FF module 1 (half-step residual); final-LN refs are passed but unused here.
    xf = pallas_ff_module(x.reshape(B * T, D),
                          p["ff1_ln_g"], p["ff1_ln_b"],
                          p["ff1_w1"], p["ff1_b1"], p["ff1_w2"], p["ff1_b2"],
                          p["final_ln_g"], p["final_ln_b"], do_final_ln=False)
    x = xf.reshape(B, T, D)

    # causal multi-head self-attention module (fused QKV weight)
    wqkv = jnp.concatenate([p["wq"], p["wk"], p["wv"]], axis=1)
    bqkv = jnp.concatenate([p["bq"], p["bk"], p["bv"]], axis=0)
    x = pallas_mha_module(x, p["mha_ln_g"], p["mha_ln_b"], wqkv, bqkv,
                          p["wo"], p["bo"], H, num_prev)

    # convolution module (causal depthwise, timewise LayerNorm)
    x = pallas_conv_module(x, p["conv_ln_g"], p["conv_ln_b"],
                           p["pw1_w"], p["pw1_b"], p["dw_w"], p["dw_b"],
                           p["conv_ln2_g"], p["conv_ln2_b"],
                           p["pw2_w"], p["pw2_b"], K)

    # FF module 2 (half-step residual) fused with the final block LayerNorm
    xf = pallas_ff_module(x.reshape(B * T, D),
                          p["ff2_ln_g"], p["ff2_ln_b"],
                          p["ff2_w1"], p["ff2_b1"], p["ff2_w2"], p["ff2_b2"],
                          p["final_ln_g"], p["final_ln_b"], do_final_ln=True)
    return xf.reshape(B, T, D)


def encoder_forward(p, cfg, x, lengths):
    B, T, F = x.shape
    k1, s1 = cfg["encoder_subsampling_kernel_size1"], cfg["encoder_subsampling_stride1"]
    k2, s2 = cfg["encoder_subsampling_kernel_size2"], cfg["encoder_subsampling_stride2"]
    D = cfg["encoder_subsampled_input_size"]
    C = D  # subsampling conv channel count

    h = x[..., None]                                      # (B,T,F,1) channels-last
    patches, T1, F1 = im2col(h, k1, s1)
    h = pallas_linear(patches.reshape(B * T1 * F1, -1), p["conv1_w"], p["conv1_b"],
                      act="relu").reshape(B, T1, F1, C)
    patches, T2, F2 = im2col(h, k2, s2)
    h = pallas_linear(patches.reshape(B * T2 * F2, -1), p["conv2_w"], p["conv2_b"],
                      act="relu").reshape(B, T2, F2, C)

    # Fold the PyTorch (B,C,T,F)->(B,T,C*F) flatten permutation into lin_w's row
    # order instead of transposing the activation (saves an XLU transpose + HBM pass).
    idx = jnp.arange(F2 * C)
    perm = (idx % C) * F2 + idx // C                      # lin_w_perm[f*C+c] = lin_w[c*F2+f]
    lin_w = p["lin_w"][perm]
    h = pallas_linear(h.reshape(B * T2, F2 * C), lin_w, p["lin_b"]).reshape(B, T2, D)

    # TODO(synk): per-sample key-padding masking of subsampled padded frames is not applied.
    for blk in p["blocks"]:
        h = conformer_block(blk, cfg, h)

    l1 = (lengths - k1) // s1 + 1
    l2 = (l1 - k2) // s2 + 1
    return h, l2


def predictor_forward(p, cfg, tokens):
    B, U = tokens.shape
    bos = jnp.full((B, 1), cfg["bos_idx"], dtype=tokens.dtype)
    toks = jnp.concatenate([bos, tokens], axis=1)         # prepend BOS
    h = p["embedding"][toks].astype(F32)                  # (B, U+1, E)  (gather stays in XLA)
    h = jnp.transpose(h, (1, 0, 2))                       # time-major for the LSTM kernel
    for layer in p["lstm"]:
        h = pallas_lstm_layer(h, layer["w_ih"], layer["w_hh"], layer["b"])
    return jnp.transpose(h, (1, 0, 2))                    # (B, U+1, H)


def model_forward(params, cfg, padded_enc_input, padded_pred_input,
                  enc_input_lengths, pred_input_lengths):
    enc_out, sub_lens = encoder_forward(params["encoder"], cfg, padded_enc_input,
                                        enc_input_lengths)
    pred_out = predictor_forward(params["predictor"], cfg, padded_pred_input)
    # TODO(synk): pred_input_lengths only affects packed-sequence padding in PyTorch; unused here.
    rnnt, ctc = pallas_joint_ctc(enc_out, pred_out, params["joint"], params["ctc"],
                                 cfg["is_fused_softmax"])
    return rnnt, ctc, sub_lens


# ---------------------------------------------------------------------------
# Deterministic parameter init
# ---------------------------------------------------------------------------

class KeyGen:
    def __init__(self, key):
        self.key = key

    def __call__(self):
        self.key, sub = jax.random.split(self.key)
        return sub


def init_params(key, cfg):
    kg = KeyGen(key)
    F = cfg["encoder_input_size"]
    D = cfg["encoder_subsampled_input_size"]
    C = D
    k1, s1 = cfg["encoder_subsampling_kernel_size1"], cfg["encoder_subsampling_stride1"]
    k2, s2 = cfg["encoder_subsampling_kernel_size2"], cfg["encoder_subsampling_stride2"]
    F1 = (F - k1) // s1 + 1
    F2 = (F1 - k2) // s2 + 1
    ff = cfg["encoder_ff_hidden_size"]
    Cc = cfg["encoder_conv_hidden_size"]
    K = cfg["encoder_conv_kernel_size"]
    V = cfg["vocab_size"]
    E = cfg["embedding_size"]
    Hp = cfg["predictor_hidden_size"]
    J = cfg["jointnet_hidden_size"]

    def n(shape, scale=0.1):
        return scale * jax.random.normal(kg(), shape, F32)

    def z(shape):
        return jnp.zeros(shape, F32)

    def o(shape):
        return jnp.ones(shape, F32)

    enc = dict(conv1_w=n((k1 * k1 * 1, C)), conv1_b=z((C,)),
               conv2_w=n((k2 * k2 * C, C)), conv2_b=z((C,)),
               lin_w=n((C * F2, D)), lin_b=z((D,)), blocks=[])
    for _ in range(cfg["encoder_num_conformer_blocks"]):
        enc["blocks"].append(dict(
            ff1_ln_g=o((D,)), ff1_ln_b=z((D,)),
            ff1_w1=n((D, ff)), ff1_b1=z((ff,)), ff1_w2=n((ff, D)), ff1_b2=z((D,)),
            mha_ln_g=o((D,)), mha_ln_b=z((D,)),
            wq=n((D, D)), bq=z((D,)), wk=n((D, D)), bk=z((D,)),
            wv=n((D, D)), bv=z((D,)), wo=n((D, D)), bo=z((D,)),
            conv_ln_g=o((D,)), conv_ln_b=z((D,)),
            pw1_w=n((D, 2 * Cc)), pw1_b=z((2 * Cc,)),
            dw_w=n((K, Cc)), dw_b=z((Cc,)),
            conv_ln2_g=o((Cc,)), conv_ln2_b=z((Cc,)),
            pw2_w=n((Cc, D)), pw2_b=z((D,)),
            ff2_ln_g=o((D,)), ff2_ln_b=z((D,)),
            ff2_w1=n((D, ff)), ff2_b1=z((ff,)), ff2_w2=n((ff, D)), ff2_b2=z((D,)),
            final_ln_g=o((D,)), final_ln_b=z((D,)),
        ))

    lstm_layers = []
    in_sz = E
    for _ in range(cfg["predictor_num_layers"]):
        lstm_layers.append(dict(w_ih=n((in_sz, 4 * Hp)), w_hh=n((Hp, 4 * Hp)), b=z((4 * Hp,))))
        in_sz = Hp
    pred = dict(embedding=n((V, E)), lstm=lstm_layers)

    joint = dict(enc_w=n((D, J)), enc_b=z((J,)),
                 pred_w=n((Hp, J)), pred_b=z((J,)),
                 out_w=n((J, V)), out_b=z((V,)))
    ctc = dict(w=n((D, V)), b=z((V,)))
    return dict(encoder=enc, predictor=pred, joint=joint, ctc=ctc)


# ---------------------------------------------------------------------------
# Main
# ---------------------------------------------------------------------------

if __name__ == "__main__":
    cfg = dict(
        encoder_input_size=16,
        encoder_subsampled_input_size=32,
        encoder_num_conformer_blocks=2,
        encoder_ff_hidden_size=64,
        encoder_conv_hidden_size=32,
        encoder_conv_kernel_size=3,
        encoder_mha_num_heads=4,
        encoder_dropout=0.0,                 # eval: dropout is a no-op
        encoder_subsampling_kernel_size1=3,
        encoder_subsampling_stride1=2,
        encoder_subsampling_kernel_size2=3,
        encoder_subsampling_stride2=2,
        encoder_num_previous_frames=4,
        vocab_size=16,
        embedding_size=16,
        predictor_hidden_size=32,
        predictor_num_layers=1,
        jointnet_hidden_size=32,
        blank_idx=0, bos_idx=1, eos_idx=2,
        decoder_buffer_size=4,
        is_fused_softmax=True,
        is_timewise_ln=True,
    )

    root = jax.random.PRNGKey(0)
    kp, kx, kt = jax.random.split(root, 3)

    params = init_params(kp, cfg)

    B, T, U = 2, 16, 6
    padded_enc_input = jax.random.normal(kx, (B, T, cfg["encoder_input_size"]), F32)
    padded_pred_input = jax.random.randint(kt, (B, U), 3, cfg["vocab_size"], dtype=jnp.int32)
    enc_input_lengths = jnp.array([T, T - 4], jnp.int32)
    pred_input_lengths = jnp.array([U, U - 2], jnp.int32)

    fwd = jax.jit(lambda prm, a, b2, c, d: model_forward(prm, cfg, a, b2, c, d))
    rnnt_log_probs, ctc_log_probs, sub_lens = fwd(
        params, padded_enc_input, padded_pred_input,
        enc_input_lengths, pred_input_lengths)

    jax.block_until_ready((rnnt_log_probs, ctc_log_probs, sub_lens))
    assert rnnt_log_probs.shape == (B, 3, U + 1, cfg["vocab_size"])
    assert ctc_log_probs.shape == (B, 3, cfg["vocab_size"])
    assert sub_lens.shape == (B,)
    print("KERNEL_OK")
</pallas_src>

<mosaic_0001>
module attributes {stable_mosaic.version = 11 : i64} {
  func.func @kernel(%arg0: i32, %arg1: memref<98x9xf32, #tpu.memory_space<vmem>>, %arg2: memref<9x32xf32, #tpu.memory_space<vmem>>, %arg3: memref<1x32xf32, #tpu.memory_space<vmem>>, %arg4: memref<98x32xf32, #tpu.memory_space<vmem>>) attributes {dimension_semantics = [#tpu.dimension_semantics<parallel>], iteration_bounds = array<i64: 1>, scalar_prefetch = 0 : i64, scratch_operands = 0 : i64, tpu.core_type = #tpu.core_type<tc>, window_params = [{transform_indices = @transform_0, window_bounds = array<i64: 98, 9>}, {pipeline_mode = #tpu.pipeline_mode<synchronous>, transform_indices = @transform_1, window_bounds = array<i64: 9, 32>}, {pipeline_mode = #tpu.pipeline_mode<synchronous>, transform_indices = @transform_2, window_bounds = array<i64: 1, 32>}, {transform_indices = @transform_3, window_bounds = array<i64: 98, 32>}]} {
    %c0 = arith.constant 0 : index
    %c0_0 = arith.constant 0 : index
    %0 = vector.load %arg1[%c0, %c0_0] : memref<98x9xf32, #tpu.memory_space<vmem>>, vector<98x9xf32>
    %c0_1 = arith.constant 0 : index
    %c0_2 = arith.constant 0 : index
    %1 = vector.load %arg2[%c0_1, %c0_2] : memref<9x32xf32, #tpu.memory_space<vmem>>, vector<9x32xf32>
    %2 = arith.truncf %0 : vector<98x9xf32> to vector<98x9xbf16>
    %3 = arith.truncf %1 : vector<9x32xf32> to vector<9x32xbf16>
    %cst = arith.constant dense<0.000000e+00> : vector<98x32xf32>
    %4 = tpu.matmul %2, %3, %cst {dimension_numbers = #tpu.dot_dimension_numbers<[1], [0], [0], [1], [0, 0, 1, 1], [], []>} : vector<98x9xbf16>, vector<9x32xbf16>, vector<98x32xf32> -> vector<98x32xf32>
    %c0_3 = arith.constant 0 : index
    %c0_4 = arith.constant 0 : index
    %5 = vector.load %arg3[%c0_3, %c0_4] : memref<1x32xf32, #tpu.memory_space<vmem>>, vector<1x32xf32>
    %6 = vector.broadcast %5 : vector<1x32xf32> to vector<98x32xf32>
    %7 = arith.addf %4, %6 : vector<98x32xf32>
    %cst_5 = arith.constant 0.000000e+00 : f32
    %8 = vector.broadcast %cst_5 : f32 to vector<98x32xf32>
    %9 = arith.maximumf %7, %8 : vector<98x32xf32>
    %c0_6 = arith.constant 0 : index
    %c0_7 = arith.constant 0 : index
    %10 = vector.load %arg4[%c0_6, %c0_7] : memref<98x32xf32, #tpu.memory_space<vmem>>, vector<98x32xf32>
    tpu.vector_store %arg4[%c0_6, %c0_7], %9 {strides = array<i32>} : memref<98x32xf32, #tpu.memory_space<vmem>>, vector<98x32xf32>,
    return
  }
  func.func @transform_0(%arg0: i32) -> (i32, i32) {
    %c0_i32 = arith.constant 0 : i32
    %c0_i32_0 = arith.constant 0 : i32
    return %arg0, %c0_i32 : i32, i32
  }
  func.func @transform_1(%arg0: i32) -> (i32, i32) {
    %c0_i32 = arith.constant 0 : i32
    %c0_i32_0 = arith.constant 0 : i32
    %c0_i32_1 = arith.constant 0 : i32
    return %c0_i32, %c0_i32_0 : i32, i32
  }
  func.func @transform_2(%arg0: i32) -> (i32, i32) {
    %c0_i32 = arith.constant 0 : i32
    %c0_i32_0 = arith.constant 0 : i32
    %c0_i32_1 = arith.constant 0 : i32
    return %c0_i32, %c0_i32_0 : i32, i32
  }
  func.func @transform_3(%arg0: i32) -> (i32, i32) {
    %c0_i32 = arith.constant 0 : i32
    %c0_i32_0 = arith.constant 0 : i32
    return %arg0, %c0_i32 : i32, i32
  }
}

module attributes {stable_mosaic.version = 11 : i64} {
  func.func @kernel(%arg0: i32, %arg1: memref<18x288xf32, #tpu.memory_space<vmem>>, %arg2: memref<288x32xf32, #tpu.memory_space<vmem>>, %arg3: memref<1x32xf32, #tpu.memory_space<vmem>>, %arg4: memref<18x32xf32, #tpu.memory_space<vmem>>) attributes {dimension_semantics = [#tpu.dimension_semantics<parallel>], iteration_bounds = array<i64: 1>, scalar_prefetch = 0 : i64, scratch_operands = 0 : i64, tpu.core_type = #tpu.core_type<tc>, window_params = [{transform_indices = @transform_0, window_bounds = array<i64: 18, 288>}, {pipeline_mode = #tpu.pipeline_mode<synchronous>, transform_indices = @transform_1, window_bounds = array<i64: 288, 32>}, {pipeline_mode = #tpu.pipeline_mode<synchronous>, transform_indices = @transform_2, window_bounds = array<i64: 1, 32>}, {transform_indices = @transform_3, window_bounds = array<i64: 18, 32>}]} {
    %c0 = arith.constant 0 : index
    %c0_0 = arith.constant 0 : index
    %0 = vector.load %arg1[%c0, %c0_0] : memref<18x288xf32, #tpu.memory_space<vmem>>, vector<18x288xf32>
    %c0_1 = arith.constant 0 : index
    %c0_2 = arith.constant 0 : index
    %1 = vector.load %arg2[%c0_1, %c0_2] : memref<288x32xf32, #tpu.memory_space<vmem>>, vector<288x32xf32>
    %2 = arith.truncf %0 : vector<18x288xf32> to vector<18x288xbf16>
    %3 = arith.truncf %1 : vector<288x32xf32> to vector<288x32xbf16>
    %cst = arith.constant dense<0.000000e+00> : vector<18x32xf32>
    %4 = tpu.matmul %2, %3, %cst {dimension_numbers = #tpu.dot_dimension_numbers<[1], [0], [0], [1], [0, 0, 1, 1], [], []>} : vector<18x288xbf16>, vector<288x32xbf16>, vector<18x32xf32> -> vector<18x32xf32>
    %c0_3 = arith.constant 0 : index
    %c0_4 = arith.constant 0 : index
    %5 = vector.load %arg3[%c0_3, %c0_4] : memref<1x32xf32, #tpu.memory_space<vmem>>, vector<1x32xf32>
    %6 = vector.broadcast %5 : vector<1x32xf32> to vector<18x32xf32>
    %7 = arith.addf %4, %6 : vector<18x32xf32>
    %cst_5 = arith.constant 0.000000e+00 : f32
    %8 = vector.broadcast %cst_5 : f32 to vector<18x32xf32>
    %9 = arith.maximumf %7, %8 : vector<18x32xf32>
    %c0_6 = arith.constant 0 : index
    %c0_7 = arith.constant 0 : index
    %10 = vector.load %arg4[%c0_6, %c0_7] : memref<18x32xf32, #tpu.memory_space<vmem>>, vector<18x32xf32>
    tpu.vector_store %arg4[%c0_6, %c0_7], %9 {strides = array<i32>} : memref<18x32xf32, #tpu.memory_space<vmem>>, vector<18x32xf32>,
    return
  }
  func.func @transform_0(%arg0: i32) -> (i32, i32) {
    %c0_i32 = arith.constant 0 : i32
    %c0_i32_0 = arith.constant 0 : i32
    return %arg0, %c0_i32 : i32, i32
  }
  func.func @transform_1(%arg0: i32) -> (i32, i32) {
    %c0_i32 = arith.constant 0 : i32
    %c0_i32_0 = arith.constant 0 : i32
    %c0_i32_1 = arith.constant 0 : i32
    return %c0_i32, %c0_i32_0 : i32, i32
  }
  func.func @transform_2(%arg0: i32) -> (i32, i32) {
    %c0_i32 = arith.constant 0 : i32
    %c0_i32_0 = arith.constant 0 : i32
    %c0_i32_1 = arith.constant 0 : i32
    return %c0_i32, %c0_i32_0 : i32, i32
  }
  func.func @transform_3(%arg0: i32) -> (i32, i32) {
    %c0_i32 = arith.constant 0 : i32
    %c0_i32_0 = arith.constant 0 : i32
    return %arg0, %c0_i32 : i32, i32
  }
}

module attributes {stable_mosaic.version = 11 : i64} {
  func.func @kernel(%arg0: i32, %arg1: memref<6x32xf32, #tpu.memory_space<vmem>>, %arg2: memref<1x32xf32, #tpu.memory_space<vmem>>, %arg3: memref<1x32xf32, #tpu.memory_space<vmem>>, %arg4: memref<32x64xf32, #tpu.memory_space<vmem>>, %arg5: memref<1x64xf32, #tpu.memory_space<vmem>>, %arg6: memref<64x32xf32, #tpu.memory_space<vmem>>, %arg7: memref<1x32xf32, #tpu.memory_space<vmem>>, %arg8: memref<1x32xf32, #tpu.memory_space<vmem>>, %arg9: memref<1x32xf32, #tpu.memory_space<vmem>>, %arg10: memref<6x32xf32, #tpu.memory_space<vmem>>) attributes {dimension_semantics = [#tpu.dimension_semantics<parallel>], iteration_bounds = array<i64: 1>, scalar_prefetch = 0 : i64, scratch_operands = 0 : i64, tpu.core_type = #tpu.core_type<tc>, window_params = [{transform_indices = @transform_0, window_bounds = array<i64: 6, 32>}, {pipeline_mode = #tpu.pipeline_mode<synchronous>, transform_indices = @transform_1, window_bounds = array<i64: 1, 32>}, {pipeline_mode = #tpu.pipeline_mode<synchronous>, transform_indices = @transform_2, window_bounds = array<i64: 1, 32>}, {pipeline_mode = #tpu.pipeline_mode<synchronous>, transform_indices = @transform_3, window_bounds = array<i64: 32, 64>}, {pipeline_mode = #tpu.pipeline_mode<synchronous>, transform_indices = @transform_4, window_bounds = array<i64: 1, 64>}, {pipeline_mode = #tpu.pipeline_mode<synchronous>, transform_indices = @transform_5, window_bounds = array<i64: 64, 32>}, {pipeline_mode = #tpu.pipeline_mode<synchronous>, transform_indices = @transform_6, window_bounds = array<i64: 1, 32>}, {pipeline_mode = #tpu.pipeline_mode<synchronous>, transform_indices = @transform_7, window_bounds = array<i64: 1, 32>}, {pipeline_mode = #tpu.pipeline_mode<synchronous>, transform_indices = @transform_8, window_bounds = array<i64: 1, 32>}, {transform_indices = @transform_9, window_bounds = array<i64: 6, 32>}]} {
    %c0 = arith.constant 0 : index
    %c0_0 = arith.constant 0 : index
    %0 = vector.load %arg1[%c0, %c0_0] : memref<6x32xf32, #tpu.memory_space<vmem>>, vector<6x32xf32>
    %c0_1 = arith.constant 0 : index
    %c0_2 = arith.constant 0 : index
    %1 = vector.load %arg2[%c0_1, %c0_2] : memref<1x32xf32, #tpu.memory_space<vmem>>, vector<1x32xf32>
    %c0_3 = arith.constant 0 : index
    %c0_4 = arith.constant 0 : index
    %2 = vector.load %arg3[%c0_3, %c0_4] : memref<1x32xf32, #tpu.memory_space<vmem>>, vector<1x32xf32>
    %cst = arith.constant dense<0.000000e+00> : vector<6xf32>
    %3 = vector.multi_reduction <add>, %0, %cst [1] : vector<6x32xf32> to vector<6xf32>
    %4 = vector.shape_cast %3 : vector<6xf32> to vector<6x1xf32>
    %cst_5 = arith.constant 3.200000e+01 : f32
    %5 = vector.broadcast %cst_5 : f32 to vector<6x1xf32>
    %6 = arith.divf %4, %5 : vector<6x1xf32>
    %7 = vector.broadcast %6 : vector<6x1xf32> to vector<6x32xf32>
    %8 = arith.subf %0, %7 : vector<6x32xf32>
    %9 = arith.mulf %8, %8 : vector<6x32xf32>
    %cst_6 = arith.constant dense<0.000000e+00> : vector<6xf32>
    %10 = vector.multi_reduction <add>, %9, %cst_6 [1] : vector<6x32xf32> to vector<6xf32>
    %11 = vector.shape_cast %10 : vector<6xf32> to vector<6x1xf32>
    %cst_7 = arith.constant 3.200000e+01 : f32
    %12 = vector.broadcast %cst_7 : f32 to vector<6x1xf32>
    %13 = arith.divf %11, %12 : vector<6x1xf32>
    %14 = vector.broadcast %6 : vector<6x1xf32> to vector<6x32xf32>
    %15 = arith.subf %0, %14 : vector<6x32xf32>
    %cst_8 = arith.constant 9.99999974E-6 : f32
    %16 = vector.broadcast %cst_8 : f32 to vector<6x1xf32>
    %17 = arith.addf %13, %16 : vector<6x1xf32>
    %18 = math.rsqrt %17 : vector<6x1xf32>
    %19 = vector.broadcast %18 : vector<6x1xf32> to vector<6x32xf32>
    %20 = arith.mulf %15, %19 : vector<6x32xf32>
    %21 = vector.broadcast %1 : vector<1x32xf32> to vector<6x32xf32>
    %22 = arith.mulf %20, %21 : vector<6x32xf32>
    %23 = vector.broadcast %2 : vector<1x32xf32> to vector<6x32xf32>
    %24 = arith.addf %22, %23 : vector<6x32xf32>
    %c0_9 = arith.constant 0 : index
    %c0_10 = arith.constant 0 : index
    %25 = vector.load %arg4[%c0_9, %c0_10] : memref<32x64xf32, #tpu.memory_space<vmem>>, vector<32x64xf32>
    %26 = arith.truncf %24 : vector<6x32xf32> to vector<6x32xbf16>
    %27 = arith.truncf %25 : vector<32x64xf32> to vector<32x64xbf16>
    %cst_11 = arith.constant dense<0.000000e+00> : vector<6x64xf32>
    %28 = tpu.matmul %26, %27, %cst_11 {dimension_numbers = #tpu.dot_dimension_numbers<[1], [0], [0], [1], [0, 0, 1, 1], [], []>} : vector<6x32xbf16>, vector<32x64xbf16>, vector<6x64xf32> -> vector<6x64xf32>
    %c0_12 = arith.constant 0 : index
    %c0_13 = arith.constant 0 : index
    %29 = vector.load %arg5[%c0_12, %c0_13] : memref<1x64xf32, #tpu.memory_space<vmem>>, vector<1x64xf32>
    %30 = vector.broadcast %29 : vector<1x64xf32> to vector<6x64xf32>
    %31 = arith.addf %28, %30 : vector<6x64xf32>
    %32 = arith.negf %31 : vector<6x64xf32>
    %33 = math.exp %32 : vector<6x64xf32>
    %cst_14 = arith.constant 1.000000e+00 : f32
    %34 = vector.broadcast %cst_14 : f32 to vector<6x64xf32>
    %35 = arith.addf %34, %33 : vector<6x64xf32>
    %36 = arith.divf %34, %35 : vector<6x64xf32>
    %37 = arith.mulf %31, %36 : vector<6x64xf32>
    %c0_15 = arith.constant 0 : index
    %c0_16 = arith.constant 0 : index
    %38 = vector.load %arg6[%c0_15, %c0_16] : memref<64x32xf32, #tpu.memory_space<vmem>>, vector<64x32xf32>
    %39 = arith.truncf %37 : vector<6x64xf32> to vector<6x64xbf16>
    %40 = arith.truncf %38 : vector<64x32xf32> to vector<64x32xbf16>
    %cst_17 = arith.constant dense<0.000000e+00> : vector<6x32xf32>
    %41 = tpu.matmul %39, %40, %cst_17 {dimension_numbers = #tpu.dot_dimension_numbers<[1], [0], [0], [1], [0, 0, 1, 1], [], []>} : vector<6x64xbf16>, vector<64x32xbf16>, vector<6x32xf32> -> vector<6x32xf32>
    %c0_18 = arith.constant 0 : index
    %c0_19 = arith.constant 0 : index
    %42 = vector.load %arg7[%c0_18, %c0_19] : memref<1x32xf32, #tpu.memory_space<vmem>>, vector<1x32xf32>
    %43 = vector.broadcast %42 : vector<1x32xf32> to vector<6x32xf32>
    %44 = arith.addf %41, %43 : vector<6x32xf32>
    %cst_20 = arith.constant 5.000000e-01 : f32
    %45 = vector.broadcast %cst_20 : f32 to vector<6x32xf32>
    %46 = arith.mulf %45, %44 : vector<6x32xf32>
    %47 = arith.addf %0, %46 : vector<6x32xf32>
    %c0_21 = arith.constant 0 : index
    %c0_22 = arith.constant 0 : index
    %48 = vector.load %arg10[%c0_21, %c0_22] : memref<6x32xf32, #tpu.memory_space<vmem>>, vector<6x32xf32>
    tpu.vector_store %arg10[%c0_21, %c0_22], %47 {strides = array<i32>} : memref<6x32xf32, #tpu.memory_space<vmem>>, vector<6x32xf32>,
    return
  }
  func.func @transform_0(%arg0: i32) -> (i32, i32) {
    %c0_i32 = arith.constant 0 : i32
    %c0_i32_0 = arith.constant 0 : i32
    return %arg0, %c0_i32 : i32, i32
  }
  func.func @transform_1(%arg0: i32) -> (i32, i32) {
    %c0_i32 = arith.constant 0 : i32
    %c0_i32_0 = arith.constant 0 : i32
    %c0_i32_1 = arith.constant 0 : i32
    return %c0_i32, %c0_i32_0 : i32, i32
  }
  func.func @transform_2(%arg0: i32) -> (i32, i32) {
    %c0_i32 = arith.constant 0 : i32
    %c0_i32_0 = arith.constant 0 : i32
    %c0_i32_1 = arith.constant 0 : i32
    return %c0_i32, %c0_i32_0 : i32, i32
  }
  func.func @transform_3(%arg0: i32) -> (i32, i32) {
    %c0_i32 = arith.constant 0 : i32
    %c0_i32_0 = arith.constant 0 : i32
    %c0_i32_1 = arith.constant 0 : i32
    return %c0_i32, %c0_i32_0 : i32, i32
  }
  func.func @transform_4(%arg0: i32) -> (i32, i32) {
    %c0_i32 = arith.constant 0 : i32
    %c0_i32_0 = arith.constant 0 : i32
    %c0_i32_1 = arith.constant 0 : i32
    return %c0_i32, %c0_i32_0 : i32, i32
  }
  func.func @transform_5(%arg0: i32) -> (i32, i32) {
    %c0_i32 = arith.constant 0 : i32
    %c0_i32_0 = arith.constant 0 : i32
    %c0_i32_1 = arith.constant 0 : i32
    return %c0_i32, %c0_i32_0 : i32, i32
  }
  func.func @transform_6(%arg0: i32) -> (i32, i32) {
    %c0_i32 = arith.constant 0 : i32
    %c0_i32_0 = arith.constant 0 : i32
    %c0_i32_1 = arith.constant 0 : i32
    return %c0_i32, %c0_i32_0 : i32, i32
  }
  func.func @transform_7(%arg0: i32) -> (i32, i32) {
    %c0_i32 = arith.constant 0 : i32
    %c0_i32_0 = arith.constant 0 : i32
    %c0_i32_1 = arith.constant 0 : i32
    return %c0_i32, %c0_i32_0 : i32, i32
  }
  func.func @transform_8(%arg0: i32) -> (i32, i32) {
    %c0_i32 = arith.constant 0 : i32
    %c0_i32_0 = arith.constant 0 : i32
    %c0_i32_1 = arith.constant 0 : i32
    return %c0_i32, %c0_i32_0 : i32, i32
  }
  func.func @transform_9(%arg0: i32) -> (i32, i32) {
    %c0_i32 = arith.constant 0 : i32
    %c0_i32_0 = arith.constant 0 : i32
    return %arg0, %c0_i32 : i32, i32
  }
}

module attributes {stable_mosaic.version = 11 : i64} {
  func.func @kernel(%arg0: i32, %arg1: memref<6x96xf32, #tpu.memory_space<vmem>>, %arg2: memref<96x32xf32, #tpu.memory_space<vmem>>, %arg3: memref<1x32xf32, #tpu.memory_space<vmem>>, %arg4: memref<6x32xf32, #tpu.memory_space<vmem>>) attributes {dimension_semantics = [#tpu.dimension_semantics<parallel>], iteration_bounds = array<i64: 1>, scalar_prefetch = 0 : i64, scratch_operands = 0 : i64, tpu.core_type = #tpu.core_type<tc>, window_params = [{transform_indices = @transform_0, window_bounds = array<i64: 6, 96>}, {pipeline_mode = #tpu.pipeline_mode<synchronous>, transform_indices = @transform_1, window_bounds = array<i64: 96, 32>}, {pipeline_mode = #tpu.pipeline_mode<synchronous>, transform_indices = @transform_2, window_bounds = array<i64: 1, 32>}, {transform_indices = @transform_3, window_bounds = array<i64: 6, 32>}]} {
    %c0 = arith.constant 0 : index
    %c0_0 = arith.constant 0 : index
    %0 = vector.load %arg1[%c0, %c0_0] : memref<6x96xf32, #tpu.memory_space<vmem>>, vector<6x96xf32>
    %c0_1 = arith.constant 0 : index
    %c0_2 = arith.constant 0 : index
    %1 = vector.load %arg2[%c0_1, %c0_2] : memref<96x32xf32, #tpu.memory_space<vmem>>, vector<96x32xf32>
    %2 = arith.truncf %0 : vector<6x96xf32> to vector<6x96xbf16>
    %3 = arith.truncf %1 : vector<96x32xf32> to vector<96x32xbf16>
    %cst = arith.constant dense<0.000000e+00> : vector<6x32xf32>
    %4 = tpu.matmul %2, %3, %cst {dimension_numbers = #tpu.dot_dimension_numbers<[1], [0], [0], [1], [0, 0, 1, 1], [], []>} : vector<6x96xbf16>, vector<96x32xbf16>, vector<6x32xf32> -> vector<6x32xf32>
    %c0_3 = arith.constant 0 : index
    %c0_4 = arith.constant 0 : index
    %5 = vector.load %arg3[%c0_3, %c0_4] : memref<1x32xf32, #tpu.memory_space<vmem>>, vector<1x32xf32>
    %6 = vector.broadcast %5 : vector<1x32xf32> to vector<6x32xf32>
    %7 = arith.addf %4, %6 : vector<6x32xf32>
    %c0_5 = arith.constant 0 : index
    %c0_6 = arith.constant 0 : index
    %8 = vector.load %arg4[%c0_5, %c0_6] : memref<6x32xf32, #tpu.memory_space<vmem>>, vector<6x32xf32>
    tpu.vector_store %arg4[%c0_5, %c0_6], %7 {strides = array<i32>} : memref<6x32xf32, #tpu.memory_space<vmem>>, vector<6x32xf32>,
    return
  }
  func.func @transform_0(%arg0: i32) -> (i32, i32) {
    %c0_i32 = arith.constant 0 : i32
    %c0_i32_0 = arith.constant 0 : i32
    return %arg0, %c0_i32 : i32, i32
  }
  func.func @transform_1(%arg0: i32) -> (i32, i32) {
    %c0_i32 = arith.constant 0 : i32
    %c0_i32_0 = arith.constant 0 : i32
    %c0_i32_1 = arith.constant 0 : i32
    return %c0_i32, %c0_i32_0 : i32, i32
  }
  func.func @transform_2(%arg0: i32) -> (i32, i32) {
    %c0_i32 = arith.constant 0 : i32
    %c0_i32_0 = arith.constant 0 : i32
    %c0_i32_1 = arith.constant 0 : i32
    return %c0_i32, %c0_i32_0 : i32, i32
  }
  func.func @transform_3(%arg0: i32) -> (i32, i32) {
    %c0_i32 = arith.constant 0 : i32
    %c0_i32_0 = arith.constant 0 : i32
    return %arg0, %c0_i32 : i32, i32
  }
}

module attributes {stable_mosaic.version = 11 : i64} {
  func.func @kernel(%arg0: i32, %arg1: memref<1x3x32xf32, #tpu.memory_space<vmem>>, %arg2: memref<1x32xf32, #tpu.memory_space<vmem>>, %arg3: memref<1x32xf32, #tpu.memory_space<vmem>>, %arg4: memref<32x64xf32, #tpu.memory_space<vmem>>, %arg5: memref<1x64xf32, #tpu.memory_space<vmem>>, %arg6: memref<3x32xf32, #tpu.memory_space<vmem>>, %arg7: memref<1x32xf32, #tpu.memory_space<vmem>>, %arg8: memref<1x32xf32, #tpu.memory_space<vmem>>, %arg9: memref<1x32xf32, #tpu.memory_space<vmem>>, %arg10: memref<32x32xf32, #tpu.memory_space<vmem>>, %arg11: memref<1x32xf32, #tpu.memory_space<vmem>>, %arg12: memref<1x3x32xf32, #tpu.memory_space<vmem>>, %arg13: memref<5x32xf32, #tpu.memory_space<vmem>>) attributes {dimension_semantics = [#tpu.dimension_semantics<parallel>], iteration_bounds = array<i64: 2>, scalar_prefetch = 0 : i64, scratch_operands = 1 : i64, tpu.core_type = #tpu.core_type<tc>, window_params = [{transform_indices = @transform_0, window_bounds = array<i64: 1, 3, 32>}, {pipeline_mode = #tpu.pipeline_mode<synchronous>, transform_indices = @transform_1, window_bounds = array<i64: 1, 32>}, {pipeline_mode = #tpu.pipeline_mode<synchronous>, transform_indices = @transform_2, window_bounds = array<i64: 1, 32>}, {pipeline_mode = #tpu.pipeline_mode<synchronous>, transform_indices = @transform_3, window_bounds = array<i64: 32, 64>}, {pipeline_mode = #tpu.pipeline_mode<synchronous>, transform_indices = @transform_4, window_bounds = array<i64: 1, 64>}, {pipeline_mode = #tpu.pipeline_mode<synchronous>, transform_indices = @transform_5, window_bounds = array<i64: 3, 32>}, {pipeline_mode = #tpu.pipeline_mode<synchronous>, transform_indices = @transform_6, window_bounds = array<i64: 1, 32>}, {pipeline_mode = #tpu.pipeline_mode<synchronous>, transform_indices = @transform_7, window_bounds = array<i64: 1, 32>}, {pipeline_mode = #tpu.pipeline_mode<synchronous>, transform_indices = @transform_8, window_bounds = array<i64: 1, 32>}, {pipeline_mode = #tpu.pipeline_mode<synchronous>, transform_indices = @transform_9, window_bounds = array<i64: 32, 32>}, {pipeline_mode = #tpu.pipeline_mode<synchronous>, transform_indices = @transform_10, window_bounds = array<i64: 1, 32>}, {transform_indices = @transform_11, window_bounds = array<i64: 1, 3, 32>}]} {
    %c0 = arith.constant 0 : index
    %c0_0 = arith.constant 0 : index
    %c0_1 = arith.constant 0 : index
    %0 = vector.load %arg1[%c0, %c0_0, %c0_1] : memref<1x3x32xf32, #tpu.memory_space<vmem>>, vector<1x3x32xf32>
    %1 = vector.shape_cast %0 : vector<1x3x32xf32> to vector<3x32xf32>
    %c0_2 = arith.constant 0 : index
    %c0_3 = arith.constant 0 : index
    %2 = vector.load %arg2[%c0_2, %c0_3] : memref<1x32xf32, #tpu.memory_space<vmem>>, vector<1x32xf32>
    %c0_4 = arith.constant 0 : index
    %c0_5 = arith.constant 0 : index
    %3 = vector.load %arg3[%c0_4, %c0_5] : memref<1x32xf32, #tpu.memory_space<vmem>>, vector<1x32xf32>
    %cst = arith.constant dense<0.000000e+00> : vector<3xf32>
    %4 = vector.multi_reduction <add>, %1, %cst [1] : vector<3x32xf32> to vector<3xf32>
    %5 = vector.shape_cast %4 : vector<3xf32> to vector<3x1xf32>
    %cst_6 = arith.constant 3.200000e+01 : f32
    %6 = vector.broadcast %cst_6 : f32 to vector<3x1xf32>
    %7 = arith.divf %5, %6 : vector<3x1xf32>
    %8 = vector.broadcast %7 : vector<3x1xf32> to vector<3x32xf32>
    %9 = arith.subf %1, %8 : vector<3x32xf32>
    %10 = arith.mulf %9, %9 : vector<3x32xf32>
    %cst_7 = arith.constant dense<0.000000e+00> : vector<3xf32>
    %11 = vector.multi_reduction <add>, %10, %cst_7 [1] : vector<3x32xf32> to vector<3xf32>
    %12 = vector.shape_cast %11 : vector<3xf32> to vector<3x1xf32>
    %cst_8 = arith.constant 3.200000e+01 : f32
    %13 = vector.broadcast %cst_8 : f32 to vector<3x1xf32>
    %14 = arith.divf %12, %13 : vector<3x1xf32>
    %15 = vector.broadcast %7 : vector<3x1xf32> to vector<3x32xf32>
    %16 = arith.subf %1, %15 : vector<3x32xf32>
    %cst_9 = arith.constant 9.99999974E-6 : f32
    %17 = vector.broadcast %cst_9 : f32 to vector<3x1xf32>
    %18 = arith.addf %14, %17 : vector<3x1xf32>
    %19 = math.rsqrt %18 : vector<3x1xf32>
    %20 = vector.broadcast %19 : vector<3x1xf32> to vector<3x32xf32>
    %21 = arith.mulf %16, %20 : vector<3x32xf32>
    %22 = vector.broadcast %2 : vector<1x32xf32> to vector<3x32xf32>
    %23 = arith.mulf %21, %22 : vector<3x32xf32>
    %24 = vector.broadcast %3 : vector<1x32xf32> to vector<3x32xf32>
    %25 = arith.addf %23, %24 : vector<3x32xf32>
    %c0_10 = arith.constant 0 : index
    %c0_11 = arith.constant 0 : index
    %26 = vector.load %arg4[%c0_10, %c0_11] : memref<32x64xf32, #tpu.memory_space<vmem>>, vector<32x64xf32>
    %27 = arith.truncf %25 : vector<3x32xf32> to vector<3x32xbf16>
    %28 = arith.truncf %26 : vector<32x64xf32> to vector<32x64xbf16>
    %cst_12 = arith.constant dense<0.000000e+00> : vector<3x64xf32>
    %29 = tpu.matmul %27, %28, %cst_12 {dimension_numbers = #tpu.dot_dimension_numbers<[1], [0], [0], [1], [0, 0, 1, 1], [], []>} : vector<3x32xbf16>, vector<32x64xbf16>, vector<3x64xf32> -> vector<3x64xf32>
    %c0_13 = arith.constant 0 : index
    %c0_14 = arith.constant 0 : index
    %30 = vector.load %arg5[%c0_13, %c0_14] : memref<1x64xf32, #tpu.memory_space<vmem>>, vector<1x64xf32>
    %31 = vector.broadcast %30 : vector<1x64xf32> to vector<3x64xf32>
    %32 = arith.addf %29, %31 : vector<3x64xf32>
    %33 = vector.extract_strided_slice %32 {offsets = [0, 0], sizes = [3, 32], strides = [1, 1]} : vector<3x64xf32> to vector<3x32xf32>
    %34 = vector.extract_strided_slice %32 {offsets = [0, 32], sizes = [3, 32], strides = [1, 1]} : vector<3x64xf32> to vector<3x32xf32>
    %35 = arith.negf %34 : vector<3x32xf32>
    %36 = math.exp %35 : vector<3x32xf32>
    %cst_15 = arith.constant 1.000000e+00 : f32
    %37 = vector.broadcast %cst_15 : f32 to vector<3x32xf32>
    %38 = arith.addf %37, %36 : vector<3x32xf32>
    %39 = arith.divf %37, %38 : vector<3x32xf32>
    %40 = arith.mulf %33, %39 : vector<3x32xf32>
    %cst_16 = arith.constant 0.000000e+00 : f32
    %41 = vector.broadcast %cst_16 : f32 to vector<2x32xf32>
    %c0_17 = arith.constant 0 : index
    %c0_18 = arith.constant 0 : index
    %42 = vector.load %arg13[%c0_17, %c0_18] : memref<5x32xf32, #tpu.memory_space<vmem>>, vector<2x32xf32>
    tpu.vector_store %arg13[%c0_17, %c0_18], %41 {strides = array<i32>} : memref<5x32xf32, #tpu.memory_space<vmem>>, vector<2x32xf32>,
    %c2 = arith.constant 2 : index
    %c0_19 = arith.constant 0 : index
    %43 = vector.load %arg13[%c2, %c0_19] : memref<5x32xf32, #tpu.memory_space<vmem>>, vector<3x32xf32>
    tpu.vector_store %arg13[%c2, %c0_19], %40 {strides = array<i32>} : memref<5x32xf32, #tpu.memory_space<vmem>>, vector<3x32xf32>,
    %cst_20 = arith.constant 0.000000e+00 : f32
    %44 = vector.broadcast %cst_20 : f32 to vector<3x32xf32>
    %c0_21 = arith.constant 0 : index
    %c0_22 = arith.constant 0 : index
    %45 = vector.load %arg13[%c0_21, %c0_22] : memref<5x32xf32, #tpu.memory_space<vmem>>, vector<3x32xf32>
    %c0_23 = arith.constant 0 : index
    %c0_24 = arith.constant 0 : index
    %46 = vector.load %arg6[%c0_23, %c0_24] : memref<3x32xf32, #tpu.memory_space<vmem>>, vector<1x32xf32>
    %47 = vector.broadcast %46 : vector<1x32xf32> to vector<3x32xf32>
    %48 = arith.mulf %45, %47 : vector<3x32xf32>
    %49 = arith.addf %44, %48 : vector<3x32xf32>
    %c1 = arith.constant 1 : index
    %c0_25 = arith.constant 0 : index
    %50 = vector.load %arg13[%c1, %c0_25] : memref<5x32xf32, #tpu.memory_space<vmem>>, vector<3x32xf32>
    %c1_26 = arith.constant 1 : index
    %c0_27 = arith.constant 0 : index
    %51 = vector.load %arg6[%c1_26, %c0_27] : memref<3x32xf32, #tpu.memory_space<vmem>>, vector<1x32xf32>
    %52 = vector.broadcast %51 : vector<1x32xf32> to vector<3x32xf32>
    %53 = arith.mulf %50, %52 : vector<3x32xf32>
    %54 = arith.addf %49, %53 : vector<3x32xf32>
    %c2_28 = arith.constant 2 : index
    %c0_29 = arith.constant 0 : index
    %55 = vector.load %arg13[%c2_28, %c0_29] : memref<5x32xf32, #tpu.memory_space<vmem>>, vector<3x32xf32>
    %c2_30 = arith.constant 2 : index
    %c0_31 = arith.constant 0 : index
    %56 = vector.load %arg6[%c2_30, %c0_31] : memref<3x32xf32, #tpu.memory_space<vmem>>, vector<1x32xf32>
    %57 = vector.broadcast %56 : vector<1x32xf32> to vector<3x32xf32>
    %58 = arith.mulf %55, %57 : vector<3x32xf32>
    %59 = arith.addf %54, %58 : vector<3x32xf32>
    %c0_32 = arith.constant 0 : index
    %c0_33 = arith.constant 0 : index
    %60 = vector.load %arg7[%c0_32, %c0_33] : memref<1x32xf32, #tpu.memory_space<vmem>>, vector<1x32xf32>
    %61 = vector.broadcast %60 : vector<1x32xf32> to vector<3x32xf32>
    %62 = arith.addf %59, %61 : vector<3x32xf32>
    %c0_34 = arith.constant 0 : index
    %c0_35 = arith.constant 0 : index
    %63 = vector.load %arg8[%c0_34, %c0_35] : memref<1x32xf32, #tpu.memory_space<vmem>>, vector<1x32xf32>
    %c0_36 = arith.constant 0 : index
    %c0_37 = arith.constant 0 : index
    %64 = vector.load %arg9[%c0_36, %c0_37] : memref<1x32xf32, #tpu.memory_space<vmem>>, vector<1x32xf32>
    %cst_38 = arith.constant dense<0.000000e+00> : vector<3xf32>
    %65 = vector.multi_reduction <add>, %62, %cst_38 [1] : vector<3x32xf32> to vector<3xf32>
    %66 = vector.shape_cast %65 : vector<3xf32> to vector<3x1xf32>
    %cst_39 = arith.constant 3.200000e+01 : f32
    %67 = vector.broadcast %cst_39 : f32 to vector<3x1xf32>
    %68 = arith.divf %66, %67 : vector<3x1xf32>
    %69 = vector.broadcast %68 : vector<3x1xf32> to vector<3x32xf32>
    %70 = arith.subf %62, %69 : vector<3x32xf32>
    %71 = arith.mulf %70, %70 : vector<3x32xf32>
    %cst_40 = arith.constant dense<0.000000e+00> : vector<3xf32>
    %72 = vector.multi_reduction <add>, %71, %cst_40 [1] : vector<3x32xf32> to vector<3xf32>
    %73 = vector.shape_cast %72 : vector<3xf32> to vector<3x1xf32>
    %cst_41 = arith.constant 3.200000e+01 : f32
    %74 = vector.broadcast %cst_41 : f32 to vector<3x1xf32>
    %75 = arith.divf %73, %74 : vector<3x1xf32>
    %76 = vector.broadcast %68 : vector<3x1xf32> to vector<3x32xf32>
    %77 = arith.subf %62, %76 : vector<3x32xf32>
    %cst_42 = arith.constant 9.99999974E-6 : f32
    %78 = vector.broadcast %cst_42 : f32 to vector<3x1xf32>
    %79 = arith.addf %75, %78 : vector<3x1xf32>
    %80 = math.rsqrt %79 : vector<3x1xf32>
    %81 = vector.broadcast %80 : vector<3x1xf32> to vector<3x32xf32>
    %82 = arith.mulf %77, %81 : vector<3x32xf32>
    %83 = vector.broadcast %63 : vector<1x32xf32> to vector<3x32xf32>
    %84 = arith.mulf %82, %83 : vector<3x32xf32>
    %85 = vector.broadcast %64 : vector<1x32xf32> to vector<3x32xf32>
    %86 = arith.addf %84, %85 : vector<3x32xf32>
    %87 = arith.negf %86 : vector<3x32xf32>
    %88 = math.exp %87 : vector<3x32xf32>
    %cst_43 = arith.constant 1.000000e+00 : f32
    %89 = vector.broadcast %cst_43 : f32 to vector<3x32xf32>
    %90 = arith.addf %89, %88 : vector<3x32xf32>
    %91 = arith.divf %89, %90 : vector<3x32xf32>
    %92 = arith.mulf %86, %91 : vector<3x32xf32>
    %c0_44 = arith.constant 0 : index
    %c0_45 = arith.constant 0 : index
    %93 = vector.load %arg10[%c0_44, %c0_45] : memref<32x32xf32, #tpu.memory_space<vmem>>, vector<32x32xf32>
    %94 = arith.truncf %92 : vector<3x32xf32> to vector<3x32xbf16>
    %95 = arith.truncf %93 : vector<32x32xf32> to vector<32x32xbf16>
    %cst_46 = arith.constant dense<0.000000e+00> : vector<3x32xf32>
    %96 = tpu.matmul %94, %95, %cst_46 {dimension_numbers = #tpu.dot_dimension_numbers<[1], [0], [0], [1], [0, 0, 1, 1], [], []>} : vector<3x32xbf16>, vector<32x32xbf16>, vector<3x32xf32> -> vector<3x32xf32>
    %c0_47 = arith.constant 0 : index
    %c0_48 = arith.constant 0 : index
    %97 = vector.load %arg11[%c0_47, %c0_48] : memref<1x32xf32, #tpu.memory_space<vmem>>, vector<1x32xf32>
    %98 = vector.broadcast %97 : vector<1x32xf32> to vector<3x32xf32>
    %99 = arith.addf %96, %98 : vector<3x32xf32>
    %100 = arith.addf %1, %99 : vector<3x32xf32>
    %c0_49 = arith.constant 0 : index
    %c0_50 = arith.constant 0 : index
    %c0_51 = arith.constant 0 : index
    %101 = vector.load %arg12[%c0_49, %c0_50, %c0_51] : memref<1x3x32xf32, #tpu.memory_space<vmem>>, vector<1x3x32xf32>
    %102 = vector.shape_cast %101 : vector<1x3x32xf32> to vector<3x32xf32>
    %103 = vector.shape_cast %100 : vector<3x32xf32> to vector<1x3x32xf32>
    tpu.vector_store %arg12[%c0_49, %c0_50, %c0_51], %103 {strides = array<i32>} : memref<1x3x32xf32, #tpu.memory_space<vmem>>, vector<1x3x32xf32>,
    return
  }
  func.func @transform_0(%arg0: i32) -> (i32, i32, i32) {
    %c0_i32 = arith.constant 0 : i32
    %c0_i32_0 = arith.constant 0 : i32
    %c0_i32_1 = arith.constant 0 : i32
    return %arg0, %c0_i32, %c0_i32_0 : i32, i32, i32
  }
  func.func @transform_1(%arg0: i32) -> (i32, i32) {
    %c0_i32 = arith.constant 0 : i32
    %c0_i32_0 = arith.constant 0 : i32
    %c0_i32_1 = arith.constant 0 : i32
    return %c0_i32, %c0_i32_0 : i32, i32
  }
  func.func @transform_2(%arg0: i32) -> (i32, i32) {
    %c0_i32 = arith.constant 0 : i32
    %c0_i32_0 = arith.constant 0 : i32
    %c0_i32_1 = arith.constant 0 : i32
    return %c0_i32, %c0_i32_0 : i32, i32
  }
  func.func @transform_3(%arg0: i32) -> (i32, i32) {
    %c0_i32 = arith.constant 0 : i32
    %c0_i32_0 = arith.constant 0 : i32
    %c0_i32_1 = arith.constant 0 : i32
    return %c0_i32, %c0_i32_0 : i32, i32
  }
  func.func @transform_4(%arg0: i32) -> (i32, i32) {
    %c0_i32 = arith.constant 0 : i32
    %c0_i32_0 = arith.constant 0 : i32
    %c0_i32_1 = arith.constant 0 : i32
    return %c0_i32, %c0_i32_0 : i32, i32
  }
  func.func @transform_5(%arg0: i32) -> (i32, i32) {
    %c0_i32 = arith.constant 0 : i32
    %c0_i32_0 = arith.constant 0 : i32
    %c0_i32_1 = arith.constant 0 : i32
    return %c0_i32, %c0_i32_0 : i32, i32
  }
  func.func @transform_6(%arg0: i32) -> (i32, i32) {
    %c0_i32 = arith.constant 0 : i32
    %c0_i32_0 = arith.constant 0 : i32
    %c0_i32_1 = arith.constant 0 : i32
    return %c0_i32, %c0_i32_0 : i32, i32
  }
  func.func @transform_7(%arg0: i32) -> (i32, i32) {
    %c0_i32 = arith.constant 0 : i32
    %c0_i32_0 = arith.constant 0 : i32
    %c0_i32_1 = arith.constant 0 : i32
    return %c0_i32, %c0_i32_0 : i32, i32
  }
  func.func @transform_8(%arg0: i32) -> (i32, i32) {
    %c0_i32 = arith.constant 0 : i32
    %c0_i32_0 = arith.constant 0 : i32
    %c0_i32_1 = arith.constant 0 : i32
    return %c0_i32, %c0_i32_0 : i32, i32
  }
  func.func @transform_9(%arg0: i32) -> (i32, i32) {
    %c0_i32 = arith.constant 0 : i32
    %c0_i32_0 = arith.constant 0 : i32
    %c0_i32_1 = arith.constant 0 : i32
    return %c0_i32, %c0_i32_0 : i32, i32
  }
  func.func @transform_10(%arg0: i32) -> (i32, i32) {
    %c0_i32 = arith.constant 0 : i32
    %c0_i32_0 = arith.constant 0 : i32
    %c0_i32_1 = arith.constant 0 : i32
    return %c0_i32, %c0_i32_0 : i32, i32
  }
  func.func @transform_11(%arg0: i32) -> (i32, i32, i32) {
    %c0_i32 = arith.constant 0 : i32
    %c0_i32_0 = arith.constant 0 : i32
    %c0_i32_1 = arith.constant 0 : i32
    return %arg0, %c0_i32, %c0_i32_0 : i32, i32, i32
  }
}

module attributes {stable_mosaic.version = 11 : i64} {
  func.func @kernel(%arg0: i32, %arg1: memref<1x3x32xf32, #tpu.memory_space<vmem>>, %arg2: memref<1x32xf32, #tpu.memory_space<vmem>>, %arg3: memref<1x32xf32, #tpu.memory_space<vmem>>, %arg4: memref<32x96xf32, #tpu.memory_space<vmem>>, %arg5: memref<1x96xf32, #tpu.memory_space<vmem>>, %arg6: memref<32x32xf32, #tpu.memory_space<vmem>>, %arg7: memref<1x32xf32, #tpu.memory_space<vmem>>, %arg8: memref<1x3x32xf32, #tpu.memory_space<vmem>>) attributes {dimension_semantics = [#tpu.dimension_semantics<parallel>], iteration_bounds = array<i64: 2>, scalar_prefetch = 0 : i64, scratch_operands = 0 : i64, tpu.core_type = #tpu.core_type<tc>, window_params = [{transform_indices = @transform_0, window_bounds = array<i64: 1, 3, 32>}, {pipeline_mode = #tpu.pipeline_mode<synchronous>, transform_indices = @transform_1, window_bounds = array<i64: 1, 32>}, {pipeline_mode = #tpu.pipeline_mode<synchronous>, transform_indices = @transform_2, window_bounds = array<i64: 1, 32>}, {pipeline_mode = #tpu.pipeline_mode<synchronous>, transform_indices = @transform_3, window_bounds = array<i64: 32, 96>}, {pipeline_mode = #tpu.pipeline_mode<synchronous>, transform_indices = @transform_4, window_bounds = array<i64: 1, 96>}, {pipeline_mode = #tpu.pipeline_mode<synchronous>, transform_indices = @transform_5, window_bounds = array<i64: 32, 32>}, {pipeline_mode = #tpu.pipeline_mode<synchronous>, transform_indices = @transform_6, window_bounds = array<i64: 1, 32>}, {transform_indices = @transform_7, window_bounds = array<i64: 1, 3, 32>}]} {
    %c0 = arith.constant 0 : index
    %c0_0 = arith.constant 0 : index
    %c0_1 = arith.constant 0 : index
    %0 = vector.load %arg1[%c0, %c0_0, %c0_1] : memref<1x3x32xf32, #tpu.memory_space<vmem>>, vector<1x3x32xf32>
    %1 = vector.shape_cast %0 : vector<1x3x32xf32> to vector<3x32xf32>
    %c0_2 = arith.constant 0 : index
    %c0_3 = arith.constant 0 : index
    %2 = vector.load %arg2[%c0_2, %c0_3] : memref<1x32xf32, #tpu.memory_space<vmem>>, vector<1x32xf32>
    %c0_4 = arith.constant 0 : index
    %c0_5 = arith.constant 0 : index
    %3 = vector.load %arg3[%c0_4, %c0_5] : memref<1x32xf32, #tpu.memory_space<vmem>>, vector<1x32xf32>
    %cst = arith.constant dense<0.000000e+00> : vector<3xf32>
    %4 = vector.multi_reduction <add>, %1, %cst [1] : vector<3x32xf32> to vector<3xf32>
    %5 = vector.shape_cast %4 : vector<3xf32> to vector<3x1xf32>
    %cst_6 = arith.constant 3.200000e+01 : f32
    %6 = vector.broadcast %cst_6 : f32 to vector<3x1xf32>
    %7 = arith.divf %5, %6 : vector<3x1xf32>
    %8 = vector.broadcast %7 : vector<3x1xf32> to vector<3x32xf32>
    %9 = arith.subf %1, %8 : vector<3x32xf32>
    %10 = arith.mulf %9, %9 : vector<3x32xf32>
    %cst_7 = arith.constant dense<0.000000e+00> : vector<3xf32>
    %11 = vector.multi_reduction <add>, %10, %cst_7 [1] : vector<3x32xf32> to vector<3xf32>
    %12 = vector.shape_cast %11 : vector<3xf32> to vector<3x1xf32>
    %cst_8 = arith.constant 3.200000e+01 : f32
    %13 = vector.broadcast %cst_8 : f32 to vector<3x1xf32>
    %14 = arith.divf %12, %13 : vector<3x1xf32>
    %15 = vector.broadcast %7 : vector<3x1xf32> to vector<3x32xf32>
    %16 = arith.subf %1, %15 : vector<3x32xf32>
    %cst_9 = arith.constant 9.99999974E-6 : f32
    %17 = vector.broadcast %cst_9 : f32 to vector<3x1xf32>
    %18 = arith.addf %14, %17 : vector<3x1xf32>
    %19 = math.rsqrt %18 : vector<3x1xf32>
    %20 = vector.broadcast %19 : vector<3x1xf32> to vector<3x32xf32>
    %21 = arith.mulf %16, %20 : vector<3x32xf32>
    %22 = vector.broadcast %2 : vector<1x32xf32> to vector<3x32xf32>
    %23 = arith.mulf %21, %22 : vector<3x32xf32>
    %24 = vector.broadcast %3 : vector<1x32xf32> to vector<3x32xf32>
    %25 = arith.addf %23, %24 : vector<3x32xf32>
    %c0_10 = arith.constant 0 : index
    %c0_11 = arith.constant 0 : index
    %26 = vector.load %arg4[%c0_10, %c0_11] : memref<32x96xf32, #tpu.memory_space<vmem>>, vector<32x96xf32>
    %27 = arith.truncf %25 : vector<3x32xf32> to vector<3x32xbf16>
    %28 = arith.truncf %26 : vector<32x96xf32> to vector<32x96xbf16>
    %cst_12 = arith.constant dense<0.000000e+00> : vector<3x96xf32>
    %29 = tpu.matmul %27, %28, %cst_12 {dimension_numbers = #tpu.dot_dimension_numbers<[1], [0], [0], [1], [0, 0, 1, 1], [], []>} : vector<3x32xbf16>, vector<32x96xbf16>, vector<3x96xf32> -> vector<3x96xf32>
    %c0_13 = arith.constant 0 : index
    %c0_14 = arith.constant 0 : index
    %30 = vector.load %arg5[%c0_13, %c0_14] : memref<1x96xf32, #tpu.memory_space<vmem>>, vector<1x96xf32>
    %31 = vector.broadcast %30 : vector<1x96xf32> to vector<3x96xf32>
    %32 = arith.addf %29, %31 : vector<3x96xf32>
    %33 = tpu.iota {dimensions = array<i32: 0>} : vector<3x3xi32>
    %34 = tpu.iota {dimensions = array<i32: 1>} : vector<3x3xi32>
    %35 = arith.cmpi sle, %34, %33 : vector<3x3xi32>
    %36 = arith.subi %33, %34 : vector<3x3xi32>
    %c4_i32 = arith.constant 4 : i32
    %37 = vector.broadcast %c4_i32 : i32 to vector<3x3xi32>
    %38 = arith.cmpi sle, %36, %37 : vector<3x3xi32>
    %39 = arith.andi %35, %38 : vector<3x3xi1>
    %cst_15 = arith.constant 0.000000e+00 : f32
    %cst_16 = arith.constant -1.000000e+30 : f32
    %40 = vector.broadcast %cst_15 : f32 to vector<3x3xf32>
    %41 = vector.broadcast %cst_16 : f32 to vector<3x3xf32>
    %42 = arith.select %39, %40, %41 : vector<3x3xi1>, vector<3x3xf32>
    %c0_17 = arith.constant 0 : index
    %c0_18 = arith.constant 0 : index
    %43 = vector.load %arg6[%c0_17, %c0_18] : memref<32x32xf32, #tpu.memory_space<vmem>>, vector<32x32xf32>
    %cst_19 = arith.constant 0.000000e+00 : f32
    %44 = vector.broadcast %cst_19 : f32 to vector<3x32xf32>
    %45 = vector.extract_strided_slice %32 {offsets = [0, 0], sizes = [3, 8], strides = [1, 1]} : vector<3x96xf32> to vector<3x8xf32>
    %46 = vector.extract_strided_slice %32 {offsets = [0, 32], sizes = [3, 8], strides = [1, 1]} : vector<3x96xf32> to vector<3x8xf32>
    %47 = vector.extract_strided_slice %32 {offsets = [0, 64], sizes = [3, 8], strides = [1, 1]} : vector<3x96xf32> to vector<3x8xf32>
    %48 = arith.truncf %45 : vector<3x8xf32> to vector<3x8xbf16>
    %49 = arith.truncf %46 : vector<3x8xf32> to vector<3x8xbf16>
    %cst_20 = arith.constant dense<0.000000e+00> : vector<3x3xf32>
    %50 = tpu.matmul %48, %49, %cst_20 {dimension_numbers = #tpu.dot_dimension_numbers<[1], [1], [0], [0], [0, 0, 1, 0], [], []>} : vector<3x8xbf16>, vector<3x8xbf16>, vector<3x3xf32> -> vector<3x3xf32>
    %cst_21 = arith.constant 0.353553385 : f32
    %51 = vector.broadcast %cst_21 : f32 to vector<3x3xf32>
    %52 = arith.mulf %50, %51 : vector<3x3xf32>
    %53 = arith.addf %52, %42 : vector<3x3xf32>
    %cst_22 = arith.constant dense<0xFF800000> : vector<3xf32>
    %54 = vector.multi_reduction <maximumf>, %53, %cst_22 [1] : vector<3x3xf32> to vector<3xf32>
    %55 = vector.shape_cast %54 : vector<3xf32> to vector<3x1xf32>
    %56 = vector.broadcast %55 : vector<3x1xf32> to vector<3x3xf32>
    %57 = arith.subf %53, %56 : vector<3x3xf32>
    %58 = math.exp %57 : vector<3x3xf32>
    %cst_23 = arith.constant dense<0.000000e+00> : vector<3xf32>
    %59 = vector.multi_reduction <add>, %58, %cst_23 [1] : vector<3x3xf32> to vector<3xf32>
    %60 = vector.shape_cast %59 : vector<3xf32> to vector<3x1xf32>
    %61 = tpu.reciprocal %60 {approx = true} : vector<3x1xf32> -> vector<3x1xf32>
    %62 = arith.truncf %58 : vector<3x3xf32> to vector<3x3xbf16>
    %63 = arith.truncf %47 : vector<3x8xf32> to vector<3x8xbf16>
    %cst_24 = arith.constant dense<0.000000e+00> : vector<3x8xf32>
    %64 = tpu.matmul %62, %63, %cst_24 {dimension_numbers = #tpu.dot_dimension_numbers<[1], [0], [0], [1], [0, 0, 1, 1], [], []>} : vector<3x3xbf16>, vector<3x8xbf16>, vector<3x8xf32> -> vector<3x8xf32>
    %65 = vector.broadcast %61 : vector<3x1xf32> to vector<3x8xf32>
    %66 = arith.mulf %64, %65 : vector<3x8xf32>
    %67 = vector.extract_strided_slice %43 {offsets = [0, 0], sizes = [8, 32], strides = [1, 1]} : vector<32x32xf32> to vector<8x32xf32>
    %68 = arith.truncf %66 : vector<3x8xf32> to vector<3x8xbf16>
    %69 = arith.truncf %67 : vector<8x32xf32> to vector<8x32xbf16>
    %cst_25 = arith.constant dense<0.000000e+00> : vector<3x32xf32>
    %70 = tpu.matmul %68, %69, %cst_25 {dimension_numbers = #tpu.dot_dimension_numbers<[1], [0], [0], [1], [0, 0, 1, 1], [], []>} : vector<3x8xbf16>, vector<8x32xbf16>, vector<3x32xf32> -> vector<3x32xf32>
    %71 = arith.addf %44, %70 : vector<3x32xf32>
    %72 = vector.extract_strided_slice %32 {offsets = [0, 8], sizes = [3, 8], strides = [1, 1]} : vector<3x96xf32> to vector<3x8xf32>
    %73 = vector.extract_strided_slice %32 {offsets = [0, 40], sizes = [3, 8], strides = [1, 1]} : vector<3x96xf32> to vector<3x8xf32>
    %74 = vector.extract_strided_slice %32 {offsets = [0, 72], sizes = [3, 8], strides = [1, 1]} : vector<3x96xf32> to vector<3x8xf32>
    %75 = arith.truncf %72 : vector<3x8xf32> to vector<3x8xbf16>
    %76 = arith.truncf %73 : vector<3x8xf32> to vector<3x8xbf16>
    %cst_26 = arith.constant dense<0.000000e+00> : vector<3x3xf32>
    %77 = tpu.matmul %75, %76, %cst_26 {dimension_numbers = #tpu.dot_dimension_numbers<[1], [1], [0], [0], [0, 0, 1, 0], [], []>} : vector<3x8xbf16>, vector<3x8xbf16>, vector<3x3xf32> -> vector<3x3xf32>
    %cst_27 = arith.constant 0.353553385 : f32
    %78 = vector.broadcast %cst_27 : f32 to vector<3x3xf32>
    %79 = arith.mulf %77, %78 : vector<3x3xf32>
    %80 = arith.addf %79, %42 : vector<3x3xf32>
    %cst_28 = arith.constant dense<0xFF800000> : vector<3xf32>
    %81 = vector.multi_reduction <maximumf>, %80, %cst_28 [1] : vector<3x3xf32> to vector<3xf32>
    %82 = vector.shape_cast %81 : vector<3xf32> to vector<3x1xf32>
    %83 = vector.broadcast %82 : vector<3x1xf32> to vector<3x3xf32>
    %84 = arith.subf %80, %83 : vector<3x3xf32>
    %85 = math.exp %84 : vector<3x3xf32>
    %cst_29 = arith.constant dense<0.000000e+00> : vector<3xf32>
    %86 = vector.multi_reduction <add>, %85, %cst_29 [1] : vector<3x3xf32> to vector<3xf32>
    %87 = vector.shape_cast %86 : vector<3xf32> to vector<3x1xf32>
    %88 = tpu.reciprocal %87 {approx = true} : vector<3x1xf32> -> vector<3x1xf32>
    %89 = arith.truncf %85 : vector<3x3xf32> to vector<3x3xbf16>
    %90 = arith.truncf %74 : vector<3x8xf32> to vector<3x8xbf16>
    %cst_30 = arith.constant dense<0.000000e+00> : vector<3x8xf32>
    %91 = tpu.matmul %89, %90, %cst_30 {dimension_numbers = #tpu.dot_dimension_numbers<[1], [0], [0], [1], [0, 0, 1, 1], [], []>} : vector<3x3xbf16>, vector<3x8xbf16>, vector<3x8xf32> -> vector<3x8xf32>
    %92 = vector.broadcast %88 : vector<3x1xf32> to vector<3x8xf32>
    %93 = arith.mulf %91, %92 : vector<3x8xf32>
    %94 = vector.extract_strided_slice %43 {offsets = [8, 0], sizes = [8, 32], strides = [1, 1]} : vector<32x32xf32> to vector<8x32xf32>
    %95 = arith.truncf %93 : vector<3x8xf32> to vector<3x8xbf16>
    %96 = arith.truncf %94 : vector<8x32xf32> to vector<8x32xbf16>
    %cst_31 = arith.constant dense<0.000000e+00> : vector<3x32xf32>
    %97 = tpu.matmul %95, %96, %cst_31 {dimension_numbers = #tpu.dot_dimension_numbers<[1], [0], [0], [1], [0, 0, 1, 1], [], []>} : vector<3x8xbf16>, vector<8x32xbf16>, vector<3x32xf32> -> vector<3x32xf32>
    %98 = arith.addf %71, %97 : vector<3x32xf32>
    %99 = vector.extract_strided_slice %32 {offsets = [0, 16], sizes = [3, 8], strides = [1, 1]} : vector<3x96xf32> to vector<3x8xf32>
    %100 = vector.extract_strided_slice %32 {offsets = [0, 48], sizes = [3, 8], strides = [1, 1]} : vector<3x96xf32> to vector<3x8xf32>
    %101 = vector.extract_strided_slice %32 {offsets = [0, 80], sizes = [3, 8], strides = [1, 1]} : vector<3x96xf32> to vector<3x8xf32>
    %102 = arith.truncf %99 : vector<3x8xf32> to vector<3x8xbf16>
    %103 = arith.truncf %100 : vector<3x8xf32> to vector<3x8xbf16>
    %cst_32 = arith.constant dense<0.000000e+00> : vector<3x3xf32>
    %104 = tpu.matmul %102, %103, %cst_32 {dimension_numbers = #tpu.dot_dimension_numbers<[1], [1], [0], [0], [0, 0, 1, 0], [], []>} : vector<3x8xbf16>, vector<3x8xbf16>, vector<3x3xf32> -> vector<3x3xf32>
    %cst_33 = arith.constant 0.353553385 : f32
    %105 = vector.broadcast %cst_33 : f32 to vector<3x3xf32>
    %106 = arith.mulf %104, %105 : vector<3x3xf32>
    %107 = arith.addf %106, %42 : vector<3x3xf32>
    %cst_34 = arith.constant dense<0xFF800000> : vector<3xf32>
    %108 = vector.multi_reduction <maximumf>, %107, %cst_34 [1] : vector<3x3xf32> to vector<3xf32>
    %109 = vector.shape_cast %108 : vector<3xf32> to vector<3x1xf32>
    %110 = vector.broadcast %109 : vector<3x1xf32> to vector<3x3xf32>
    %111 = arith.subf %107, %110 : vector<3x3xf32>
    %112 = math.exp %111 : vector<3x3xf32>
    %cst_35 = arith.constant dense<0.000000e+00> : vector<3xf32>
    %113 = vector.multi_reduction <add>, %112, %cst_35 [1] : vector<3x3xf32> to vector<3xf32>
    %114 = vector.shape_cast %113 : vector<3xf32> to vector<3x1xf32>
    %115 = tpu.reciprocal %114 {approx = true} : vector<3x1xf32> -> vector<3x1xf32>
    %116 = arith.truncf %112 : vector<3x3xf32> to vector<3x3xbf16>
    %117 = arith.truncf %101 : vector<3x8xf32> to vector<3x8xbf16>
    %cst_36 = arith.constant dense<0.000000e+00> : vector<3x8xf32>
    %118 = tpu.matmul %116, %117, %cst_36 {dimension_numbers = #tpu.dot_dimension_numbers<[1], [0], [0], [1], [0, 0, 1, 1], [], []>} : vector<3x3xbf16>, vector<3x8xbf16>, vector<3x8xf32> -> vector<3x8xf32>
    %119 = vector.broadcast %115 : vector<3x1xf32> to vector<3x8xf32>
    %120 = arith.mulf %118, %119 : vector<3x8xf32>
    %121 = vector.extract_strided_slice %43 {offsets = [16, 0], sizes = [8, 32], strides = [1, 1]} : vector<32x32xf32> to vector<8x32xf32>
    %122 = arith.truncf %120 : vector<3x8xf32> to vector<3x8xbf16>
    %123 = arith.truncf %121 : vector<8x32xf32> to vector<8x32xbf16>
    %cst_37 = arith.constant dense<0.000000e+00> : vector<3x32xf32>
    %124 = tpu.matmul %122, %123, %cst_37 {dimension_numbers = #tpu.dot_dimension_numbers<[1], [0], [0], [1], [0, 0, 1, 1], [], []>} : vector<3x8xbf16>, vector<8x32xbf16>, vector<3x32xf32> -> vector<3x32xf32>
    %125 = arith.addf %98, %124 : vector<3x32xf32>
    %126 = vector.extract_strided_slice %32 {offsets = [0, 24], sizes = [3, 8], strides = [1, 1]} : vector<3x96xf32> to vector<3x8xf32>
    %127 = vector.extract_strided_slice %32 {offsets = [0, 56], sizes = [3, 8], strides = [1, 1]} : vector<3x96xf32> to vector<3x8xf32>
    %128 = vector.extract_strided_slice %32 {offsets = [0, 88], sizes = [3, 8], strides = [1, 1]} : vector<3x96xf32> to vector<3x8xf32>
    %129 = arith.truncf %126 : vector<3x8xf32> to vector<3x8xbf16>
    %130 = arith.truncf %127 : vector<3x8xf32> to vector<3x8xbf16>
    %cst_38 = arith.constant dense<0.000000e+00> : vector<3x3xf32>
    %131 = tpu.matmul %129, %130, %cst_38 {dimension_numbers = #tpu.dot_dimension_numbers<[1], [1], [0], [0], [0, 0, 1, 0], [], []>} : vector<3x8xbf16>, vector<3x8xbf16>, vector<3x3xf32> -> vector<3x3xf32>
    %cst_39 = arith.constant 0.353553385 : f32
    %132 = vector.broadcast %cst_39 : f32 to vector<3x3xf32>
    %133 = arith.mulf %131, %132 : vector<3x3xf32>
    %134 = arith.addf %133, %42 : vector<3x3xf32>
    %cst_40 = arith.constant dense<0xFF800000> : vector<3xf32>
    %135 = vector.multi_reduction <maximumf>, %134, %cst_40 [1] : vector<3x3xf32> to vector<3xf32>
    %136 = vector.shape_cast %135 : vector<3xf32> to vector<3x1xf32>
    %137 = vector.broadcast %136 : vector<3x1xf32> to vector<3x3xf32>
    %138 = arith.subf %134, %137 : vector<3x3xf32>
    %139 = math.exp %138 : vector<3x3xf32>
    %cst_41 = arith.constant dense<0.000000e+00> : vector<3xf32>
    %140 = vector.multi_reduction <add>, %139, %cst_41 [1] : vector<3x3xf32> to vector<3xf32>
    %141 = vector.shape_cast %140 : vector<3xf32> to vector<3x1xf32>
    %142 = tpu.reciprocal %141 {approx = true} : vector<3x1xf32> -> vector<3x1xf32>
    %143 = arith.truncf %139 : vector<3x3xf32> to vector<3x3xbf16>
    %144 = arith.truncf %128 : vector<3x8xf32> to vector<3x8xbf16>
    %cst_42 = arith.constant dense<0.000000e+00> : vector<3x8xf32>
    %145 = tpu.matmul %143, %144, %cst_42 {dimension_numbers = #tpu.dot_dimension_numbers<[1], [0], [0], [1], [0, 0, 1, 1], [], []>} : vector<3x3xbf16>, vector<3x8xbf16>, vector<3x8xf32> -> vector<3x8xf32>
    %146 = vector.broadcast %142 : vector<3x1xf32> to vector<3x8xf32>
    %147 = arith.mulf %145, %146 : vector<3x8xf32>
    %148 = vector.extract_strided_slice %43 {offsets = [24, 0], sizes = [8, 32], strides = [1, 1]} : vector<32x32xf32> to vector<8x32xf32>
    %149 = arith.truncf %147 : vector<3x8xf32> to vector<3x8xbf16>
    %150 = arith.truncf %148 : vector<8x32xf32> to vector<8x32xbf16>
    %cst_43 = arith.constant dense<0.000000e+00> : vector<3x32xf32>
    %151 = tpu.matmul %149, %150, %cst_43 {dimension_numbers = #tpu.dot_dimension_numbers<[1], [0], [0], [1], [0, 0, 1, 1], [], []>} : vector<3x8xbf16>, vector<8x32xbf16>, vector<3x32xf32> -> vector<3x32xf32>
    %152 = arith.addf %125, %151 : vector<3x32xf32>
    %153 = arith.addf %1, %152 : vector<3x32xf32>
    %c0_44 = arith.constant 0 : index
    %c0_45 = arith.constant 0 : index
    %154 = vector.load %arg7[%c0_44, %c0_45] : memref<1x32xf32, #tpu.memory_space<vmem>>, vector<1x32xf32>
    %155 = vector.broadcast %154 : vector<1x32xf32> to vector<3x32xf32>
    %156 = arith.addf %153, %155 : vector<3x32xf32>
    %c0_46 = arith.constant 0 : index
    %c0_47 = arith.constant 0 : index
    %c0_48 = arith.constant 0 : index
    %157 = vector.load %arg8[%c0_46, %c0_47, %c0_48] : memref<1x3x32xf32, #tpu.memory_space<vmem>>, vector<1x3x32xf32>
    %158 = vector.shape_cast %157 : vector<1x3x32xf32> to vector<3x32xf32>
    %159 = vector.shape_cast %156 : vector<3x32xf32> to vector<1x3x32xf32>
    tpu.vector_store %arg8[%c0_46, %c0_47, %c0_48], %159 {strides = array<i32>} : memref<1x3x32xf32, #tpu.memory_space<vmem>>, vector<1x3x32xf32>,
    return
  }
  func.func @transform_0(%arg0: i32) -> (i32, i32, i32) {
    %c0_i32 = arith.constant 0 : i32
    %c0_i32_0 = arith.constant 0 : i32
    %c0_i32_1 = arith.constant 0 : i32
    return %arg0, %c0_i32, %c0_i32_0 : i32, i32, i32
  }
  func.func @transform_1(%arg0: i32) -> (i32, i32) {
    %c0_i32 = arith.constant 0 : i32
    %c0_i32_0 = arith.constant 0 : i32
    %c0_i32_1 = arith.constant 0 : i32
    return %c0_i32, %c0_i32_0 : i32, i32
  }
  func.func @transform_2(%arg0: i32) -> (i32, i32) {
    %c0_i32 = arith.constant 0 : i32
    %c0_i32_0 = arith.constant 0 : i32
    %c0_i32_1 = arith.constant 0 : i32
    return %c0_i32, %c0_i32_0 : i32, i32
  }
  func.func @transform_3(%arg0: i32) -> (i32, i32) {
    %c0_i32 = arith.constant 0 : i32
    %c0_i32_0 = arith.constant 0 : i32
    %c0_i32_1 = arith.constant 0 : i32
    return %c0_i32, %c0_i32_0 : i32, i32
  }
  func.func @transform_4(%arg0: i32) -> (i32, i32) {
    %c0_i32 = arith.constant 0 : i32
    %c0_i32_0 = arith.constant 0 : i32
    %c0_i32_1 = arith.constant 0 : i32
    return %c0_i32, %c0_i32_0 : i32, i32
  }
  func.func @transform_5(%arg0: i32) -> (i32, i32) {
    %c0_i32 = arith.constant 0 : i32
    %c0_i32_0 = arith.constant 0 : i32
    %c0_i32_1 = arith.constant 0 : i32
    return %c0_i32, %c0_i32_0 : i32, i32
  }
  func.func @transform_6(%arg0: i32) -> (i32, i32) {
    %c0_i32 = arith.constant 0 : i32
    %c0_i32_0 = arith.constant 0 : i32
    %c0_i32_1 = arith.constant 0 : i32
    return %c0_i32, %c0_i32_0 : i32, i32
  }
  func.func @transform_7(%arg0: i32) -> (i32, i32, i32) {
    %c0_i32 = arith.constant 0 : i32
    %c0_i32_0 = arith.constant 0 : i32
    %c0_i32_1 = arith.constant 0 : i32
    return %arg0, %c0_i32, %c0_i32_0 : i32, i32, i32
  }
}

module attributes {stable_mosaic.version = 11 : i64} {
  func.func @kernel(%arg0: i32, %arg1: memref<6x32xf32, #tpu.memory_space<vmem>>, %arg2: memref<1x32xf32, #tpu.memory_space<vmem>>, %arg3: memref<1x32xf32, #tpu.memory_space<vmem>>, %arg4: memref<32x64xf32, #tpu.memory_space<vmem>>, %arg5: memref<1x64xf32, #tpu.memory_space<vmem>>, %arg6: memref<64x32xf32, #tpu.memory_space<vmem>>, %arg7: memref<1x32xf32, #tpu.memory_space<vmem>>, %arg8: memref<1x32xf32, #tpu.memory_space<vmem>>, %arg9: memref<1x32xf32, #tpu.memory_space<vmem>>, %arg10: memref<6x32xf32, #tpu.memory_space<vmem>>) attributes {dimension_semantics = [#tpu.dimension_semantics<parallel>], iteration_bounds = array<i64: 1>, scalar_prefetch = 0 : i64, scratch_operands = 0 : i64, tpu.core_type = #tpu.core_type<tc>, window_params = [{transform_indices = @transform_0, window_bounds = array<i64: 6, 32>}, {pipeline_mode = #tpu.pipeline_mode<synchronous>, transform_indices = @transform_1, window_bounds = array<i64: 1, 32>}, {pipeline_mode = #tpu.pipeline_mode<synchronous>, transform_indices = @transform_2, window_bounds = array<i64: 1, 32>}, {pipeline_mode = #tpu.pipeline_mode<synchronous>, transform_indices = @transform_3, window_bounds = array<i64: 32, 64>}, {pipeline_mode = #tpu.pipeline_mode<synchronous>, transform_indices = @transform_4, window_bounds = array<i64: 1, 64>}, {pipeline_mode = #tpu.pipeline_mode<synchronous>, transform_indices = @transform_5, window_bounds = array<i64: 64, 32>}, {pipeline_mode = #tpu.pipeline_mode<synchronous>, transform_indices = @transform_6, window_bounds = array<i64: 1, 32>}, {pipeline_mode = #tpu.pipeline_mode<synchronous>, transform_indices = @transform_7, window_bounds = array<i64: 1, 32>}, {pipeline_mode = #tpu.pipeline_mode<synchronous>, transform_indices = @transform_8, window_bounds = array<i64: 1, 32>}, {transform_indices = @transform_9, window_bounds = array<i64: 6, 32>}]} {
    %c0 = arith.constant 0 : index
    %c0_0 = arith.constant 0 : index
    %0 = vector.load %arg1[%c0, %c0_0] : memref<6x32xf32, #tpu.memory_space<vmem>>, vector<6x32xf32>
    %c0_1 = arith.constant 0 : index
    %c0_2 = arith.constant 0 : index
    %1 = vector.load %arg2[%c0_1, %c0_2] : memref<1x32xf32, #tpu.memory_space<vmem>>, vector<1x32xf32>
    %c0_3 = arith.constant 0 : index
    %c0_4 = arith.constant 0 : index
    %2 = vector.load %arg3[%c0_3, %c0_4] : memref<1x32xf32, #tpu.memory_space<vmem>>, vector<1x32xf32>
    %cst = arith.constant dense<0.000000e+00> : vector<6xf32>
    %3 = vector.multi_reduction <add>, %0, %cst [1] : vector<6x32xf32> to vector<6xf32>
    %4 = vector.shape_cast %3 : vector<6xf32> to vector<6x1xf32>
    %cst_5 = arith.constant 3.200000e+01 : f32
    %5 = vector.broadcast %cst_5 : f32 to vector<6x1xf32>
    %6 = arith.divf %4, %5 : vector<6x1xf32>
    %7 = vector.broadcast %6 : vector<6x1xf32> to vector<6x32xf32>
    %8 = arith.subf %0, %7 : vector<6x32xf32>
    %9 = arith.mulf %8, %8 : vector<6x32xf32>
    %cst_6 = arith.constant dense<0.000000e+00> : vector<6xf32>
    %10 = vector.multi_reduction <add>, %9, %cst_6 [1] : vector<6x32xf32> to vector<6xf32>
    %11 = vector.shape_cast %10 : vector<6xf32> to vector<6x1xf32>
    %cst_7 = arith.constant 3.200000e+01 : f32
    %12 = vector.broadcast %cst_7 : f32 to vector<6x1xf32>
    %13 = arith.divf %11, %12 : vector<6x1xf32>
    %14 = vector.broadcast %6 : vector<6x1xf32> to vector<6x32xf32>
    %15 = arith.subf %0, %14 : vector<6x32xf32>
    %cst_8 = arith.constant 9.99999974E-6 : f32
    %16 = vector.broadcast %cst_8 : f32 to vector<6x1xf32>
    %17 = arith.addf %13, %16 : vector<6x1xf32>
    %18 = math.rsqrt %17 : vector<6x1xf32>
    %19 = vector.broadcast %18 : vector<6x1xf32> to vector<6x32xf32>
    %20 = arith.mulf %15, %19 : vector<6x32xf32>
    %21 = vector.broadcast %1 : vector<1x32xf32> to vector<6x32xf32>
    %22 = arith.mulf %20, %21 : vector<6x32xf32>
    %23 = vector.broadcast %2 : vector<1x32xf32> to vector<6x32xf32>
    %24 = arith.addf %22, %23 : vector<6x32xf32>
    %c0_9 = arith.constant 0 : index
    %c0_10 = arith.constant 0 : index
    %25 = vector.load %arg4[%c0_9, %c0_10] : memref<32x64xf32, #tpu.memory_space<vmem>>, vector<32x64xf32>
    %26 = arith.truncf %24 : vector<6x32xf32> to vector<6x32xbf16>
    %27 = arith.truncf %25 : vector<32x64xf32> to vector<32x64xbf16>
    %cst_11 = arith.constant dense<0.000000e+00> : vector<6x64xf32>
    %28 = tpu.matmul %26, %27, %cst_11 {dimension_numbers = #tpu.dot_dimension_numbers<[1], [0], [0], [1], [0, 0, 1, 1], [], []>} : vector<6x32xbf16>, vector<32x64xbf16>, vector<6x64xf32> -> vector<6x64xf32>
    %c0_12 = arith.constant 0 : index
    %c0_13 = arith.constant 0 : index
    %29 = vector.load %arg5[%c0_12, %c0_13] : memref<1x64xf32, #tpu.memory_space<vmem>>, vector<1x64xf32>
    %30 = vector.broadcast %29 : vector<1x64xf32> to vector<6x64xf32>
    %31 = arith.addf %28, %30 : vector<6x64xf32>
    %32 = arith.negf %31 : vector<6x64xf32>
    %33 = math.exp %32 : vector<6x64xf32>
    %cst_14 = arith.constant 1.000000e+00 : f32
    %34 = vector.broadcast %cst_14 : f32 to vector<6x64xf32>
    %35 = arith.addf %34, %33 : vector<6x64xf32>
    %36 = arith.divf %34, %35 : vector<6x64xf32>
    %37 = arith.mulf %31, %36 : vector<6x64xf32>
    %c0_15 = arith.constant 0 : index
    %c0_16 = arith.constant 0 : index
    %38 = vector.load %arg6[%c0_15, %c0_16] : memref<64x32xf32, #tpu.memory_space<vmem>>, vector<64x32xf32>
    %39 = arith.truncf %37 : vector<6x64xf32> to vector<6x64xbf16>
    %40 = arith.truncf %38 : vector<64x32xf32> to vector<64x32xbf16>
    %cst_17 = arith.constant dense<0.000000e+00> : vector<6x32xf32>
    %41 = tpu.matmul %39, %40, %cst_17 {dimension_numbers = #tpu.dot_dimension_numbers<[1], [0], [0], [1], [0, 0, 1, 1], [], []>} : vector<6x64xbf16>, vector<64x32xbf16>, vector<6x32xf32> -> vector<6x32xf32>
    %c0_18 = arith.constant 0 : index
    %c0_19 = arith.constant 0 : index
    %42 = vector.load %arg7[%c0_18, %c0_19] : memref<1x32xf32, #tpu.memory_space<vmem>>, vector<1x32xf32>
    %43 = vector.broadcast %42 : vector<1x32xf32> to vector<6x32xf32>
    %44 = arith.addf %41, %43 : vector<6x32xf32>
    %cst_20 = arith.constant 5.000000e-01 : f32
    %45 = vector.broadcast %cst_20 : f32 to vector<6x32xf32>
    %46 = arith.mulf %45, %44 : vector<6x32xf32>
    %47 = arith.addf %0, %46 : vector<6x32xf32>
    %c0_21 = arith.constant 0 : index
    %c0_22 = arith.constant 0 : index
    %48 = vector.load %arg8[%c0_21, %c0_22] : memref<1x32xf32, #tpu.memory_space<vmem>>, vector<1x32xf32>
    %c0_23 = arith.constant 0 : index
    %c0_24 = arith.constant 0 : index
    %49 = vector.load %arg9[%c0_23, %c0_24] : memref<1x32xf32, #tpu.memory_space<vmem>>, vector<1x32xf32>
    %cst_25 = arith.constant dense<0.000000e+00> : vector<6xf32>
    %50 = vector.multi_reduction <add>, %47, %cst_25 [1] : vector<6x32xf32> to vector<6xf32>
    %51 = vector.shape_cast %50 : vector<6xf32> to vector<6x1xf32>
    %cst_26 = arith.constant 3.200000e+01 : f32
    %52 = vector.broadcast %cst_26 : f32 to vector<6x1xf32>
    %53 = arith.divf %51, %52 : vector<6x1xf32>
    %54 = vector.broadcast %53 : vector<6x1xf32> to vector<6x32xf32>
    %55 = arith.subf %47, %54 : vector<6x32xf32>
    %56 = arith.mulf %55, %55 : vector<6x32xf32>
    %cst_27 = arith.constant dense<0.000000e+00> : vector<6xf32>
    %57 = vector.multi_reduction <add>, %56, %cst_27 [1] : vector<6x32xf32> to vector<6xf32>
    %58 = vector.shape_cast %57 : vector<6xf32> to vector<6x1xf32>
    %cst_28 = arith.constant 3.200000e+01 : f32
    %59 = vector.broadcast %cst_28 : f32 to vector<6x1xf32>
    %60 = arith.divf %58, %59 : vector<6x1xf32>
    %61 = vector.broadcast %53 : vector<6x1xf32> to vector<6x32xf32>
    %62 = arith.subf %47, %61 : vector<6x32xf32>
    %cst_29 = arith.constant 9.99999974E-6 : f32
    %63 = vector.broadcast %cst_29 : f32 to vector<6x1xf32>
    %64 = arith.addf %60, %63 : vector<6x1xf32>
    %65 = math.rsqrt %64 : vector<6x1xf32>
    %66 = vector.broadcast %65 : vector<6x1xf32> to vector<6x32xf32>
    %67 = arith.mulf %62, %66 : vector<6x32xf32>
    %68 = vector.broadcast %48 : vector<1x32xf32> to vector<6x32xf32>
    %69 = arith.mulf %67, %68 : vector<6x32xf32>
    %70 = vector.broadcast %49 : vector<1x32xf32> to vector<6x32xf32>
    %71 = arith.addf %69, %70 : vector<6x32xf32>
    %c0_30 = arith.constant 0 : index
    %c0_31 = arith.constant 0 : index
    %72 = vector.load %arg10[%c0_30, %c0_31] : memref<6x32xf32, #tpu.memory_space<vmem>>, vector<6x32xf32>
    tpu.vector_store %arg10[%c0_30, %c0_31], %71 {strides = array<i32>} : memref<6x32xf32, #tpu.memory_space<vmem>>, vector<6x32xf32>,
    return
  }
  func.func @transform_0(%arg0: i32) -> (i32, i32) {
    %c0_i32 = arith.constant 0 : i32
    %c0_i32_0 = arith.constant 0 : i32
    return %arg0, %c0_i32 : i32, i32
  }
  func.func @transform_1(%arg0: i32) -> (i32, i32) {
    %c0_i32 = arith.constant 0 : i32
    %c0_i32_0 = arith.constant 0 : i32
    %c0_i32_1 = arith.constant 0 : i32
    return %c0_i32, %c0_i32_0 : i32, i32
  }
  func.func @transform_2(%arg0: i32) -> (i32, i32) {
    %c0_i32 = arith.constant 0 : i32
    %c0_i32_0 = arith.constant 0 : i32
    %c0_i32_1 = arith.constant 0 : i32
    return %c0_i32, %c0_i32_0 : i32, i32
  }
  func.func @transform_3(%arg0: i32) -> (i32, i32) {
    %c0_i32 = arith.constant 0 : i32
    %c0_i32_0 = arith.constant 0 : i32
    %c0_i32_1 = arith.constant 0 : i32
    return %c0_i32, %c0_i32_0 : i32, i32
  }
  func.func @transform_4(%arg0: i32) -> (i32, i32) {
    %c0_i32 = arith.constant 0 : i32
    %c0_i32_0 = arith.constant 0 : i32
    %c0_i32_1 = arith.constant 0 : i32
    return %c0_i32, %c0_i32_0 : i32, i32
  }
  func.func @transform_5(%arg0: i32) -> (i32, i32) {
    %c0_i32 = arith.constant 0 : i32
    %c0_i32_0 = arith.constant 0 : i32
    %c0_i32_1 = arith.constant 0 : i32
    return %c0_i32, %c0_i32_0 : i32, i32
  }
  func.func @transform_6(%arg0: i32) -> (i32, i32) {
    %c0_i32 = arith.constant 0 : i32
    %c0_i32_0 = arith.constant 0 : i32
    %c0_i32_1 = arith.constant 0 : i32
    return %c0_i32, %c0_i32_0 : i32, i32
  }
  func.func @transform_7(%arg0: i32) -> (i32, i32) {
    %c0_i32 = arith.constant 0 : i32
    %c0_i32_0 = arith.constant 0 : i32
    %c0_i32_1 = arith.constant 0 : i32
    return %c0_i32, %c0_i32_0 : i32, i32
  }
  func.func @transform_8(%arg0: i32) -> (i32, i32) {
    %c0_i32 = arith.constant 0 : i32
    %c0_i32_0 = arith.constant 0 : i32
    %c0_i32_1 = arith.constant 0 : i32
    return %c0_i32, %c0_i32_0 : i32, i32
  }
  func.func @transform_9(%arg0: i32) -> (i32, i32) {
    %c0_i32 = arith.constant 0 : i32
    %c0_i32_0 = arith.constant 0 : i32
    return %arg0, %c0_i32 : i32, i32
  }
}

module attributes {stable_mosaic.version = 11 : i64} {
  func.func @kernel(%arg0: i32, %arg1: memref<7x2x16xf32, #tpu.memory_space<vmem>>, %arg2: memref<16x128xf32, #tpu.memory_space<vmem>>, %arg3: memref<32x128xf32, #tpu.memory_space<vmem>>, %arg4: memref<1x128xf32, #tpu.memory_space<vmem>>, %arg5: memref<7x2x32xf32, #tpu.memory_space<vmem>>) attributes {dimension_semantics = [#tpu.dimension_semantics<arbitrary>], iteration_bounds = array<i64: 1>, scalar_prefetch = 0 : i64, scratch_operands = 0 : i64, tpu.core_type = #tpu.core_type<tc>, window_params = [{pipeline_mode = #tpu.pipeline_mode<synchronous>, transform_indices = @transform_0, window_bounds = array<i64: 7, 2, 16>}, {pipeline_mode = #tpu.pipeline_mode<synchronous>, transform_indices = @transform_1, window_bounds = array<i64: 16, 128>}, {pipeline_mode = #tpu.pipeline_mode<synchronous>, transform_indices = @transform_2, window_bounds = array<i64: 32, 128>}, {pipeline_mode = #tpu.pipeline_mode<synchronous>, transform_indices = @transform_3, window_bounds = array<i64: 1, 128>}, {pipeline_mode = #tpu.pipeline_mode<synchronous>, transform_indices = @transform_4, window_bounds = array<i64: 7, 2, 32>}]} {
    %c0 = arith.constant 0 : index
    %c0_0 = arith.constant 0 : index
    %0 = vector.load %arg2[%c0, %c0_0] : memref<16x128xf32, #tpu.memory_space<vmem>>, vector<16x128xf32>
    %c0_1 = arith.constant 0 : index
    %c0_2 = arith.constant 0 : index
    %1 = vector.load %arg3[%c0_1, %c0_2] : memref<32x128xf32, #tpu.memory_space<vmem>>, vector<32x128xf32>
    %c0_3 = arith.constant 0 : index
    %c0_4 = arith.constant 0 : index
    %2 = vector.load %arg4[%c0_3, %c0_4] : memref<1x128xf32, #tpu.memory_space<vmem>>, vector<1x128xf32>
    %cst = arith.constant 0.000000e+00 : f32
    %3 = vector.broadcast %cst : f32 to vector<2x32xf32>
    %cst_5 = arith.constant 0.000000e+00 : f32
    %4 = vector.broadcast %cst_5 : f32 to vector<2x32xf32>
    %c0_i32 = arith.constant 0 : i32
    %c7_i32 = arith.constant 7 : i32
    %5 = arith.addi %c0_i32, %c7_i32 : i32
    %c1_i32 = arith.constant 1 : i32
    %6:2 = scf.for %arg6 = %c0_i32 to %5 step %c1_i32 iter_args(%arg7 = %3, %arg8 = %4) -> (vector<2x32xf32>, vector<2x32xf32>)  : i32 {
      %7 = arith.index_cast %arg6 : i32 to index
      %c0_7 = arith.constant 0 : index
      %c0_8 = arith.constant 0 : index
      %8 = vector.load %arg1[%7, %c0_7, %c0_8] : memref<7x2x16xf32, #tpu.memory_space<vmem>>, vector<1x2x16xf32>
      %9 = vector.shape_cast %8 : vector<1x2x16xf32> to vector<2x16xf32>
      %10 = arith.truncf %9 : vector<2x16xf32> to vector<2x16xbf16>
      %11 = arith.truncf %0 : vector<16x128xf32> to vector<16x128xbf16>
      %cst_9 = arith.constant dense<0.000000e+00> : vector<2x128xf32>
      %12 = tpu.matmul %10, %11, %cst_9 {dimension_numbers = #tpu.dot_dimension_numbers<[1], [0], [0], [1], [0, 0, 1, 1], [], []>} : vector<2x16xbf16>, vector<16x128xbf16>, vector<2x128xf32> -> vector<2x128xf32>
      %13 = arith.truncf %arg7 : vector<2x32xf32> to vector<2x32xbf16>
      %14 = arith.truncf %1 : vector<32x128xf32> to vector<32x128xbf16>
      %cst_10 = arith.constant dense<0.000000e+00> : vector<2x128xf32>
      %15 = tpu.matmul %13, %14, %cst_10 {dimension_numbers = #tpu.dot_dimension_numbers<[1], [0], [0], [1], [0, 0, 1, 1], [], []>} : vector<2x32xbf16>, vector<32x128xbf16>, vector<2x128xf32> -> vector<2x128xf32>
      %16 = arith.addf %12, %15 : vector<2x128xf32>
      %17 = vector.broadcast %2 : vector<1x128xf32> to vector<2x128xf32>
      %18 = arith.addf %16, %17 : vector<2x128xf32>
      %19 = vector.extract_strided_slice %18 {offsets = [0, 0], sizes = [2, 32], strides = [1, 1]} : vector<2x128xf32> to vector<2x32xf32>
      %20 = arith.negf %19 : vector<2x32xf32>
      %21 = math.exp %20 : vector<2x32xf32>
      %cst_11 = arith.constant 1.000000e+00 : f32
      %22 = vector.broadcast %cst_11 : f32 to vector<2x32xf32>
      %23 = arith.addf %22, %21 : vector<2x32xf32>
      %24 = arith.divf %22, %23 : vector<2x32xf32>
      %25 = vector.extract_strided_slice %18 {offsets = [0, 32], sizes = [2, 32], strides = [1, 1]} : vector<2x128xf32> to vector<2x32xf32>
      %26 = arith.negf %25 : vector<2x32xf32>
      %27 = math.exp %26 : vector<2x32xf32>
      %cst_12 = arith.constant 1.000000e+00 : f32
      %28 = vector.broadcast %cst_12 : f32 to vector<2x32xf32>
      %29 = arith.addf %28, %27 : vector<2x32xf32>
      %30 = arith.divf %28, %29 : vector<2x32xf32>
      %31 = vector.extract_strided_slice %18 {offsets = [0, 64], sizes = [2, 32], strides = [1, 1]} : vector<2x128xf32> to vector<2x32xf32>
      %32 = math.tanh %31 : vector<2x32xf32>
      %33 = vector.extract_strided_slice %18 {offsets = [0, 96], sizes = [2, 32], strides = [1, 1]} : vector<2x128xf32> to vector<2x32xf32>
      %34 = arith.negf %33 : vector<2x32xf32>
      %35 = math.exp %34 : vector<2x32xf32>
      %cst_13 = arith.constant 1.000000e+00 : f32
      %36 = vector.broadcast %cst_13 : f32 to vector<2x32xf32>
      %37 = arith.addf %36, %35 : vector<2x32xf32>
      %38 = arith.divf %36, %37 : vector<2x32xf32>
      %39 = arith.mulf %30, %arg8 : vector<2x32xf32>
      %40 = arith.mulf %24, %32 : vector<2x32xf32>
      %41 = arith.addf %39, %40 : vector<2x32xf32>
      %42 = math.tanh %41 : vector<2x32xf32>
      %43 = arith.mulf %38, %42 : vector<2x32xf32>
      %44 = arith.index_cast %arg6 : i32 to index
      %c0_14 = arith.constant 0 : index
      %c0_15 = arith.constant 0 : index
      %45 = vector.load %arg5[%44, %c0_14, %c0_15] : memref<7x2x32xf32, #tpu.memory_space<vmem>>, vector<1x2x32xf32>
      %46 = vector.shape_cast %45 : vector<1x2x32xf32> to vector<2x32xf32>
      %47 = vector.shape_cast %43 : vector<2x32xf32> to vector<1x2x32xf32>
      tpu.vector_store %arg5[%44, %c0_14, %c0_15], %47 {strides = array<i32>} : memref<7x2x32xf32, #tpu.memory_space<vmem>>, vector<1x2x32xf32>,
      scf.yield %43, %41 : vector<2x32xf32>, vector<2x32xf32>
    }
    %c7_i32_6 = arith.constant 7 : i32
    return
  }
  func.func @transform_0(%arg0: i32) -> (i32, i32, i32) {
    %c0_i32 = arith.constant 0 : i32
    %c0_i32_0 = arith.constant 0 : i32
    %c0_i32_1 = arith.constant 0 : i32
    %c0_i32_2 = arith.constant 0 : i32
    return %c0_i32, %c0_i32_0, %c0_i32_1 : i32, i32, i32
  }
  func.func @transform_1(%arg0: i32) -> (i32, i32) {
    %c0_i32 = arith.constant 0 : i32
    %c0_i32_0 = arith.constant 0 : i32
    %c0_i32_1 = arith.constant 0 : i32
    return %c0_i32, %c0_i32_0 : i32, i32
  }
  func.func @transform_2(%arg0: i32) -> (i32, i32) {
    %c0_i32 = arith.constant 0 : i32
    %c0_i32_0 = arith.constant 0 : i32
    %c0_i32_1 = arith.constant 0 : i32
    return %c0_i32, %c0_i32_0 : i32, i32
  }
  func.func @transform_3(%arg0: i32) -> (i32, i32) {
    %c0_i32 = arith.constant 0 : i32
    %c0_i32_0 = arith.constant 0 : i32
    %c0_i32_1 = arith.constant 0 : i32
    return %c0_i32, %c0_i32_0 : i32, i32
  }
  func.func @transform_4(%arg0: i32) -> (i32, i32, i32) {
    %c0_i32 = arith.constant 0 : i32
    %c0_i32_0 = arith.constant 0 : i32
    %c0_i32_1 = arith.constant 0 : i32
    %c0_i32_2 = arith.constant 0 : i32
    return %c0_i32, %c0_i32_0, %c0_i32_1 : i32, i32, i32
  }
}

module attributes {stable_mosaic.version = 11 : i64} {
  func.func @kernel(%arg0: i32, %arg1: memref<1x3x32xf32, #tpu.memory_space<vmem>>, %arg2: memref<1x7x32xf32, #tpu.memory_space<vmem>>, %arg3: memref<32x32xf32, #tpu.memory_space<vmem>>, %arg4: memref<1x32xf32, #tpu.memory_space<vmem>>, %arg5: memref<32x32xf32, #tpu.memory_space<vmem>>, %arg6: memref<1x32xf32, #tpu.memory_space<vmem>>, %arg7: memref<32x128xf32, #tpu.memory_space<vmem>>, %arg8: memref<1x128xf32, #tpu.memory_space<vmem>>, %arg9: memref<32x128xf32, #tpu.memory_space<vmem>>, %arg10: memref<1x128xf32, #tpu.memory_space<vmem>>, %arg11: memref<1x3x7x128xf32, #tpu.memory_space<vmem>>, %arg12: memref<1x3x128xf32, #tpu.memory_space<vmem>>, %arg13: memref<3x32xf32, #tpu.memory_space<vmem>>) attributes {dimension_semantics = [#tpu.dimension_semantics<parallel>], iteration_bounds = array<i64: 2>, scalar_prefetch = 0 : i64, scratch_operands = 1 : i64, tpu.core_type = #tpu.core_type<tc>, window_params = [{transform_indices = @transform_0, window_bounds = array<i64: 1, 3, 32>}, {transform_indices = @transform_1, window_bounds = array<i64: 1, 7, 32>}, {pipeline_mode = #tpu.pipeline_mode<synchronous>, transform_indices = @transform_2, window_bounds = array<i64: 32, 32>}, {pipeline_mode = #tpu.pipeline_mode<synchronous>, transform_indices = @transform_3, window_bounds = array<i64: 1, 32>}, {pipeline_mode = #tpu.pipeline_mode<synchronous>, transform_indices = @transform_4, window_bounds = array<i64: 32, 32>}, {pipeline_mode = #tpu.pipeline_mode<synchronous>, transform_indices = @transform_5, window_bounds = array<i64: 1, 32>}, {pipeline_mode = #tpu.pipeline_mode<synchronous>, transform_indices = @transform_6, window_bounds = array<i64: 32, 128>}, {pipeline_mode = #tpu.pipeline_mode<synchronous>, transform_indices = @transform_7, window_bounds = array<i64: 1, 128>}, {pipeline_mode = #tpu.pipeline_mode<synchronous>, transform_indices = @transform_8, window_bounds = array<i64: 32, 128>}, {pipeline_mode = #tpu.pipeline_mode<synchronous>, transform_indices = @transform_9, window_bounds = array<i64: 1, 128>}, {transform_indices = @transform_10, window_bounds = array<i64: 1, 3, 7, 128>}, {transform_indices = @transform_11, window_bounds = array<i64: 1, 3, 128>}]} {
    %c0 = arith.constant 0 : index
    %c0_0 = arith.constant 0 : index
    %c0_1 = arith.constant 0 : index
    %0 = vector.load %arg1[%c0, %c0_0, %c0_1] : memref<1x3x32xf32, #tpu.memory_space<vmem>>, vector<1x3x32xf32>
    %1 = vector.shape_cast %0 : vector<1x3x32xf32> to vector<3x32xf32>
    %c0_2 = arith.constant 0 : index
    %c0_3 = arith.constant 0 : index
    %2 = vector.load %arg3[%c0_2, %c0_3] : memref<32x32xf32, #tpu.memory_space<vmem>>, vector<32x32xf32>
    %3 = arith.truncf %1 : vector<3x32xf32> to vector<3x32xbf16>
    %4 = arith.truncf %2 : vector<32x32xf32> to vector<32x32xbf16>
    %cst = arith.constant dense<0.000000e+00> : vector<3x32xf32>
    %5 = tpu.matmul %3, %4, %cst {dimension_numbers = #tpu.dot_dimension_numbers<[1], [0], [0], [1], [0, 0, 1, 1], [], []>} : vector<3x32xbf16>, vector<32x32xbf16>, vector<3x32xf32> -> vector<3x32xf32>
    %c0_4 = arith.constant 0 : index
    %c0_5 = arith.constant 0 : index
    %6 = vector.load %arg4[%c0_4, %c0_5] : memref<1x32xf32, #tpu.memory_space<vmem>>, vector<1x32xf32>
    %7 = vector.broadcast %6 : vector<1x32xf32> to vector<3x32xf32>
    %8 = arith.addf %5, %7 : vector<3x32xf32>
    %c0_6 = arith.constant 0 : index
    %c0_7 = arith.constant 0 : index
    %9 = vector.load %arg13[%c0_6, %c0_7] : memref<3x32xf32, #tpu.memory_space<vmem>>, vector<3x32xf32>
    tpu.vector_store %arg13[%c0_6, %c0_7], %8 {strides = array<i32>} : memref<3x32xf32, #tpu.memory_space<vmem>>, vector<3x32xf32>,
    %c0_8 = arith.constant 0 : index
    %c0_9 = arith.constant 0 : index
    %c0_10 = arith.constant 0 : index
    %10 = vector.load %arg2[%c0_8, %c0_9, %c0_10] : memref<1x7x32xf32, #tpu.memory_space<vmem>>, vector<1x7x32xf32>
    %11 = vector.shape_cast %10 : vector<1x7x32xf32> to vector<7x32xf32>
    %c0_11 = arith.constant 0 : index
    %c0_12 = arith.constant 0 : index
    %12 = vector.load %arg5[%c0_11, %c0_12] : memref<32x32xf32, #tpu.memory_space<vmem>>, vector<32x32xf32>
    %13 = arith.truncf %11 : vector<7x32xf32> to vector<7x32xbf16>
    %14 = arith.truncf %12 : vector<32x32xf32> to vector<32x32xbf16>
    %cst_13 = arith.constant dense<0.000000e+00> : vector<7x32xf32>
    %15 = tpu.matmul %13, %14, %cst_13 {dimension_numbers = #tpu.dot_dimension_numbers<[1], [0], [0], [1], [0, 0, 1, 1], [], []>} : vector<7x32xbf16>, vector<32x32xbf16>, vector<7x32xf32> -> vector<7x32xf32>
    %c0_14 = arith.constant 0 : index
    %c0_15 = arith.constant 0 : index
    %16 = vector.load %arg6[%c0_14, %c0_15] : memref<1x32xf32, #tpu.memory_space<vmem>>, vector<1x32xf32>
    %17 = vector.broadcast %16 : vector<1x32xf32> to vector<7x32xf32>
    %18 = arith.addf %15, %17 : vector<7x32xf32>
    %c0_16 = arith.constant 0 : index
    %c0_17 = arith.constant 0 : index
    %19 = vector.load %arg9[%c0_16, %c0_17] : memref<32x128xf32, #tpu.memory_space<vmem>>, vector<32x128xf32>
    %20 = arith.truncf %1 : vector<3x32xf32> to vector<3x32xbf16>
    %21 = arith.truncf %19 : vector<32x128xf32> to vector<32x128xbf16>
    %cst_18 = arith.constant dense<0.000000e+00> : vector<3x128xf32>
    %22 = tpu.matmul %20, %21, %cst_18 {dimension_numbers = #tpu.dot_dimension_numbers<[1], [0], [0], [1], [0, 0, 1, 1], [], []>} : vector<3x32xbf16>, vector<32x128xbf16>, vector<3x128xf32> -> vector<3x128xf32>
    %c0_19 = arith.constant 0 : index
    %c0_20 = arith.constant 0 : index
    %23 = vector.load %arg10[%c0_19, %c0_20] : memref<1x128xf32, #tpu.memory_space<vmem>>, vector<1x128xf32>
    %24 = vector.broadcast %23 : vector<1x128xf32> to vector<3x128xf32>
    %25 = arith.addf %22, %24 : vector<3x128xf32>
    %cst_21 = arith.constant dense<0xFF800000> : vector<3xf32>
    %26 = vector.multi_reduction <maximumf>, %25, %cst_21 [1] : vector<3x128xf32> to vector<3xf32>
    %27 = vector.shape_cast %26 : vector<3xf32> to vector<3x1xf32>
    %28 = vector.broadcast %27 : vector<3x1xf32> to vector<3x128xf32>
    %29 = arith.subf %25, %28 : vector<3x128xf32>
    %30 = math.exp %29 : vector<3x128xf32>
    %cst_22 = arith.constant dense<0.000000e+00> : vector<3xf32>
    %31 = vector.multi_reduction <add>, %30, %cst_22 [1] : vector<3x128xf32> to vector<3xf32>
    %32 = vector.shape_cast %31 : vector<3xf32> to vector<3x1xf32>
    %33 = math.log %32 : vector<3x1xf32>
    %34 = vector.broadcast %33 : vector<3x1xf32> to vector<3x128xf32>
    %35 = arith.subf %29, %34 : vector<3x128xf32>
    %c0_23 = arith.constant 0 : index
    %c0_24 = arith.constant 0 : index
    %c0_25 = arith.constant 0 : index
    %36 = vector.load %arg12[%c0_23, %c0_24, %c0_25] : memref<1x3x128xf32, #tpu.memory_space<vmem>>, vector<1x3x128xf32>
    %37 = vector.shape_cast %36 : vector<1x3x128xf32> to vector<3x128xf32>
    %38 = vector.shape_cast %35 : vector<3x128xf32> to vector<1x3x128xf32>
    tpu.vector_store %arg12[%c0_23, %c0_24, %c0_25], %38 {strides = array<i32>} : memref<1x3x128xf32, #tpu.memory_space<vmem>>, vector<1x3x128xf32>,
    %c0_26 = arith.constant 0 : index
    %c0_27 = arith.constant 0 : index
    %39 = vector.load %arg7[%c0_26, %c0_27] : memref<32x128xf32, #tpu.memory_space<vmem>>, vector<32x128xf32>
    %c0_28 = arith.constant 0 : index
    %c0_29 = arith.constant 0 : index
    %40 = vector.load %arg8[%c0_28, %c0_29] : memref<1x128xf32, #tpu.memory_space<vmem>>, vector<1x128xf32>
    %c0_i32 = arith.constant 0 : i32
    %c3_i32 = arith.constant 3 : i32
    %41 = arith.addi %c0_i32, %c3_i32 : i32
    %c1_i32 = arith.constant 1 : i32
    scf.for %arg14 = %c0_i32 to %41 step %c1_i32  : i32 {
      %42 = arith.index_cast %arg14 : i32 to index
      %c0_31 = arith.constant 0 : index
      %43 = vector.load %arg13[%42, %c0_31] : memref<3x32xf32, #tpu.memory_space<vmem>>, vector<1x32xf32>
      %44 = vector.broadcast %43 : vector<1x32xf32> to vector<7x32xf32>
      %45 = arith.addf %44, %18 : vector<7x32xf32>
      %46 = math.tanh %45 : vector<7x32xf32>
      %47 = arith.truncf %46 : vector<7x32xf32> to vector<7x32xbf16>
      %48 = arith.truncf %39 : vector<32x128xf32> to vector<32x128xbf16>
      %cst_32 = arith.constant dense<0.000000e+00> : vector<7x128xf32>
      %49 = tpu.matmul %47, %48, %cst_32 {dimension_numbers = #tpu.dot_dimension_numbers<[1], [0], [0], [1], [0, 0, 1, 1], [], []>} : vector<7x32xbf16>, vector<32x128xbf16>, vector<7x128xf32> -> vector<7x128xf32>
      %50 = vector.broadcast %40 : vector<1x128xf32> to vector<7x128xf32>
      %51 = arith.addf %49, %50 : vector<7x128xf32>
      %cst_33 = arith.constant dense<0xFF800000> : vector<7xf32>
      %52 = vector.multi_reduction <maximumf>, %51, %cst_33 [1] : vector<7x128xf32> to vector<7xf32>
      %53 = vector.shape_cast %52 : vector<7xf32> to vector<7x1xf32>
      %54 = vector.broadcast %53 : vector<7x1xf32> to vector<7x128xf32>
      %55 = arith.subf %51, %54 : vector<7x128xf32>
      %56 = math.exp %55 : vector<7x128xf32>
      %cst_34 = arith.constant dense<0.000000e+00> : vector<7xf32>
      %57 = vector.multi_reduction <add>, %56, %cst_34 [1] : vector<7x128xf32> to vector<7xf32>
      %58 = vector.shape_cast %57 : vector<7xf32> to vector<7x1xf32>
      %59 = math.log %58 : vector<7x1xf32>
      %60 = vector.broadcast %59 : vector<7x1xf32> to vector<7x128xf32>
      %61 = arith.subf %55, %60 : vector<7x128xf32>
      %c0_35 = arith.constant 0 : index
      %62 = arith.index_cast %arg14 : i32 to index
      %c0_36 = arith.constant 0 : index
      %c0_37 = arith.constant 0 : index
      %63 = vector.load %arg11[%c0_35, %62, %c0_36, %c0_37] : memref<1x3x7x128xf32, #tpu.memory_space<vmem>>, vector<1x1x7x128xf32>
      %64 = vector.shape_cast %63 : vector<1x1x7x128xf32> to vector<7x128xf32>
      %65 = vector.shape_cast %61 : vector<7x128xf32> to vector<1x1x7x128xf32>
      tpu.vector_store %arg11[%c0_35, %62, %c0_36, %c0_37], %65 {strides = array<i32>} : memref<1x3x7x128xf32, #tpu.memory_space<vmem>>, vector<1x1x7x128xf32>,
    }
    %c3_i32_30 = arith.constant 3 : i32
    return
  }
  func.func @transform_0(%arg0: i32) -> (i32, i32, i32) {
    %c0_i32 = arith.constant 0 : i32
    %c0_i32_0 = arith.constant 0 : i32
    %c0_i32_1 = arith.constant 0 : i32
    return %arg0, %c0_i32, %c0_i32_0 : i32, i32, i32
  }
  func.func @transform_1(%arg0: i32) -> (i32, i32, i32) {
    %c0_i32 = arith.constant 0 : i32
    %c0_i32_0 = arith.constant 0 : i32
    %c0_i32_1 = arith.constant 0 : i32
    return %arg0, %c0_i32, %c0_i32_0 : i32, i32, i32
  }
  func.func @transform_2(%arg0: i32) -> (i32, i32) {
    %c0_i32 = arith.constant 0 : i32
    %c0_i32_0 = arith.constant 0 : i32
    %c0_i32_1 = arith.constant 0 : i32
    return %c0_i32, %c0_i32_0 : i32, i32
  }
  func.func @transform_3(%arg0: i32) -> (i32, i32) {
    %c0_i32 = arith.constant 0 : i32
    %c0_i32_0 = arith.constant 0 : i32
    %c0_i32_1 = arith.constant 0 : i32
    return %c0_i32, %c0_i32_0 : i32, i32
  }
  func.func @transform_4(%arg0: i32) -> (i32, i32) {
    %c0_i32 = arith.constant 0 : i32
    %c0_i32_0 = arith.constant 0 : i32
    %c0_i32_1 = arith.constant 0 : i32
    return %c0_i32, %c0_i32_0 : i32, i32
  }
  func.func @transform_5(%arg0: i32) -> (i32, i32) {
    %c0_i32 = arith.constant 0 : i32
    %c0_i32_0 = arith.constant 0 : i32
    %c0_i32_1 = arith.constant 0 : i32
    return %c0_i32, %c0_i32_0 : i32, i32
  }
  func.func @transform_6(%arg0: i32) -> (i32, i32) {
    %c0_i32 = arith.constant 0 : i32
    %c0_i32_0 = arith.constant 0 : i32
    %c0_i32_1 = arith.constant 0 : i32
    return %c0_i32, %c0_i32_0 : i32, i32
  }
  func.func @transform_7(%arg0: i32) -> (i32, i32) {
    %c0_i32 = arith.constant 0 : i32
    %c0_i32_0 = arith.constant 0 : i32
    %c0_i32_1 = arith.constant 0 : i32
    return %c0_i32, %c0_i32_0 : i32, i32
  }
  func.func @transform_8(%arg0: i32) -> (i32, i32) {
    %c0_i32 = arith.constant 0 : i32
    %c0_i32_0 = arith.constant 0 : i32
    %c0_i32_1 = arith.constant 0 : i32
    return %c0_i32, %c0_i32_0 : i32, i32
  }
  func.func @transform_9(%arg0: i32) -> (i32, i32) {
    %c0_i32 = arith.constant 0 : i32
    %c0_i32_0 = arith.constant 0 : i32
    %c0_i32_1 = arith.constant 0 : i32
    return %c0_i32, %c0_i32_0 : i32, i32
  }
  func.func @transform_10(%arg0: i32) -> (i32, i32, i32, i32) {
    %c0_i32 = arith.constant 0 : i32
    %c0_i32_0 = arith.constant 0 : i32
    %c0_i32_1 = arith.constant 0 : i32
    %c0_i32_2 = arith.constant 0 : i32
    return %arg0, %c0_i32, %c0_i32_0, %c0_i32_1 : i32, i32, i32, i32
  }
  func.func @transform_11(%arg0: i32) -> (i32, i32, i32) {
    %c0_i32 = arith.constant 0 : i32
    %c0_i32_0 = arith.constant 0 : i32
    %c0_i32_1 = arith.constant 0 : i32
    return %arg0, %c0_i32, %c0_i32_0 : i32, i32, i32
  }
}

</mosaic_0001>

<bundles_post_ra>
// kernel: _lambda_.13
= control target key start
LH: loop header
LB: loop body
LE: loop exit
PB: predicated region body
PF: predicated region fallthrough
CT: control target
= control target key end

     0   :  { %vm67_vm0 = vcmask 1043456   ;;  %vm68_vm1 = vcmask 1044480   ;;  %v245_v0 = vmov 0.0   ;;  %v246_v3 = vmov 65535   ;;  %s396_s1 = inlined_call_operand.vmem [shape: f32[9,32], index: 1, kind: input, shape index: {}]   ;;  %s397_s0 = inlined_call_operand.vmem [shape: f32[98,9], index: 0, kind: input, shape index: {}]   ;;  %s398_s2 = inlined_call_operand.vmem [shape: f32[1,32], index: 2, kind: input, shape index: {}]   ;;  %s399_s3 = inlined_call_operand.vmem [shape: f32[98,32], index: 3, kind: output, shape index: {}]  }
   0x1   :  { %210 = vmatprep.subr.bf16.mxu0 %v245_v0  ;;  %v28_v1 = vld [vmem:[%s396_s1] sm:$0xff]  ;;  %v29_v2 = vld [vmem:[%s396_s1 + $0x8] sm:$0x1]  ;;  %v69_v4 = vsel %vm67_vm0, 4294967295, %v246_v3  ;;  %240 = vmatprep.subr.bf16.mxu1 %v245_v0  ;;  %vm247_vm2 = vmmov 0   ;;  %vm45_vm3 = vcmask 72704  }
   0x2   :  { %v15_v5 = vld [vmem:[%s397_s0] sm:$0xff]  ;;  %v37_v6 = vpack.c.bf16 %v29_v2, %v28_v1  ;;  %v70_v7 = vsel %vm68_vm1, %v69_v4, 0  ;;  %212 = vmatprep.mubr.msk.bf16.mxu0 %vm247_vm2, %v245_v0  ;;  %v16_v8 = vld [vmem:[%s397_s0 + $0x8] sm:$0xff]  ;;  %228 = vmatprep.mubr.msk.bf16.mxu1 %vm247_vm2, %v245_v0  ;;  %v17_v14 = vld [vmem:[%s397_s0 + $0x10] sm:$0xff]  ;;  %vm175_vm4 = vcmask 261120   ;;  %vm188_vm5 = vcmask 254976  }
   0x3   :  { %v23_v9 = vld [vmem:[%s397_s0 + $0x40] sm:$0xff]  ;;  %v24_v10 = vld [vmem:[%s397_s0 + $0x48] sm:$0xff]  ;;  %v30_v12 = vpack.c.bf16 %v16_v8, %v15_v5  ;;  %v18_v15 = vld [vmem:[%s397_s0 + $0x18] sm:$0xff] }
   0x4   :  { %v72_v11 = vand.u32 %v70_v7, %v37_v6  ;;  %v34_v13 = vpack.c.bf16 %v24_v10, %v23_v9  ;;  %v25_v16 = vld [vmem:[%s397_s0 + $0x50] sm:$0xff]  ;;  %v26_v17 = vld [vmem:[%s397_s0 + $0x58] sm:$0xff]  ;;  %v31_v18 = vpack.c.bf16 %v18_v15, %v17_v14  ;;  %v19_v20 = vld [vmem:[%s397_s0 + $0x20] sm:$0xff] }
   0x5   :  { %v35_v19 = vpack.c.bf16 %v26_v17, %v25_v16  ;;  %v20_v21 = vld [vmem:[%s397_s0 + $0x28] sm:$0xff]  ;;  %v27_v22 = vld [vmem:[%s397_s0 + $0x60] sm:$0x3]  ;;  %v21_v25 = vld [vmem:[%s397_s0 + $0x30] sm:$0xff] }
   0x6   :  { %211 = vmatpush3.bf16.msra.mxu0 %v72_v11  ;;  %241 = vmatpush3.bf16.msra.mxu1 %v72_v11  ;;  %v32_v23 = vpack.c.bf16 %v20_v21, %v19_v20  ;;  %v36_v24 = vpack.c.bf16 %v27_v22, %v27_v22  ;;  %v22_v26 = vld [vmem:[%s397_s0 + $0x38] sm:$0xff]  ;;  %v330_v28 = vld [vmem:[%s398_s2] ss:$0 sm:$0xff] }
   0x7   :  { %v33_v27 = vpack.c.bf16 %v22_v26, %v21_v25 }
   0x9   :  { %213 = vmatmul.mubr.msk.bf16.vlgmr.msra.gmra.mrb[0].mxu0 %vm45_vm3, %v30_v12  ;;  %229 = vmatmul.mubr.msk.bf16.vlgmr.msra.gmra.mrb[0].mxu1 %vm45_vm3, %v34_v13 }
   0xa   :  { %216 = vmatprep.mubr.msk.bf16.mxu0 %vm247_vm2, %v245_v0  ;;  %232 = vmatprep.mubr.msk.bf16.mxu1 %vm247_vm2, %v245_v0 }
  0x11   :  { %217 = vmatmul.mubr.msk.bf16.gmra.mrb[4].mxu0 %vm45_vm3, %v31_v18  ;;  %233 = vmatmul.mubr.msk.bf16.gmra.mrb[4].mxu1 %vm45_vm3, %v35_v19 }
  0x12   :  { %220 = vmatprep.mubr.msk.bf16.mxu0 %vm247_vm2, %v245_v0  ;;  %236 = vmatprep.mubr.msk.bf16.mxu1 %vm247_vm2, %v245_v0 }
  0x19   :  { %221 = vmatmul.mubr.msk.bf16.gmra.mrb[8].mxu0 %vm45_vm3, %v32_v23  ;;  %237 = vmatmul.mubr.msk.bf16.gmra.mrb[8].mxu1 %vm45_vm3, %v36_v24 }
  0x1a   :  { %224 = vmatprep.mubr.msk.bf16.mxu0 %vm247_vm2, %v245_v0 }
  0x21   :  { %225 = vmatmul.mubr.msk.bf16.gmra.mrb[12].mxu0 %vm45_vm3, %v33_v27 }
  0xdc   :  { %v108_v29 = vpop.f32.mrb[0].mxu0  ;;  %v140_v30 = vpop.f32.mrb[0].mxu1 }
  0xdd   :  { %v109_v31 = vadd.f32 %v330_v28, %v108_v29  ;;  %v214_v32 = vpop.f32.mrb[1].mxu0  ;;  %v141_v33 = vadd.f32 %v330_v28, %v140_v30  ;;  %v230_v34 = vpop.f32.mrb[1].mxu1 }
  0xde   :  { %v111_v35 = vpop.f32.mrb[2].mxu0  ;;  %v143_v36 = vpop.f32.mrb[2].mxu1 }
  0xdf   :  { %v162_v37 = vmax.f32 %v109_v31, 0.0  ;;  %v112_v38 = vadd.f32 %v330_v28, %v111_v35  ;;  %v215_v39 = vpop.f32.mrb[3].mxu0  ;;  %v170_v40 = vmax.f32 %v141_v33, 0.0  ;;  %v144_v41 = vadd.f32 %v330_v28, %v143_v36  ;;  %v231_v42 = vpop.f32.mrb[3].mxu1 }
  0xe1   :  { %176 = vst.msk [vmem:[%s399_s3] sm:$0xff] %vm175_vm4, %v162_v37  ;;  %v163_v43 = vmax.f32 %v112_v38, 0.0  ;;  %184 = vst.msk [vmem:[%s399_s3 + $0x40] sm:$0xff] %vm175_vm4, %v170_v40  ;;  %v171_v44 = vmax.f32 %v144_v41, 0.0 }
  0xe3   :  { %177 = vst.msk [vmem:[%s399_s3 + $0x8] sm:$0xff] %vm175_vm4, %v163_v43  ;;  %185 = vst.msk [vmem:[%s399_s3 + $0x48] sm:$0xff] %vm175_vm4, %v171_v44 }
  0xe4   :  { %v116_v45 = vpop.f32.mrb[4].mxu0  ;;  %v148_v46 = vpop.f32.mrb[4].mxu1 }
  0xe5   :  { %v117_v47 = vadd.f32 %v330_v28, %v116_v45  ;;  %v218_v48 = vpop.f32.mrb[5].mxu0  ;;  %v149_v49 = vadd.f32 %v330_v28, %v148_v46  ;;  %v234_v50 = vpop.f32.mrb[5].mxu1 }
  0xe6   :  { %v119_v51 = vpop.f32.mrb[6].mxu0  ;;  %v151_v52 = vpop.f32.mrb[6].mxu1 }
  0xe7   :  { %v164_v53 = vmax.f32 %v117_v47, 0.0  ;;  %v120_v54 = vadd.f32 %v330_v28, %v119_v51  ;;  %v219_v55 = vpop.f32.mrb[7].mxu0  ;;  %v172_v56 = vmax.f32 %v149_v49, 0.0  ;;  %v152_v57 = vadd.f32 %v330_v28, %v151_v52  ;;  %v235_v58 = vpop.f32.mrb[7].mxu1 }
  0xe9   :  { %178 = vst.msk [vmem:[%s399_s3 + $0x10] sm:$0xff] %vm175_vm4, %v164_v53  ;;  %v165_v59 = vmax.f32 %v120_v54, 0.0  ;;  %186 = vst.msk [vmem:[%s399_s3 + $0x50] sm:$0xff] %vm175_vm4, %v172_v56  ;;  %v173_v60 = vmax.f32 %v152_v57, 0.0 }
  0xeb   :  { %179 = vst.msk [vmem:[%s399_s3 + $0x18] sm:$0xff] %vm175_vm4, %v165_v59  ;;  %187 = vst.msk [vmem:[%s399_s3 + $0x58] sm:$0xff] %vm175_vm4, %v173_v60 }
  0xec   :  { %v124_v61 = vpop.f32.mrb[8].mxu0  ;;  %v156_v62 = vpop.f32.mrb[8].mxu1 }
  0xed   :  { %v125_v63 = vadd.f32 %v330_v28, %v124_v61  ;;  %v222_v0 = vpop.f32.mrb[9].mxu0  ;;  %v157_v1 = vadd.f32 %v330_v28, %v156_v62  ;;  %v238_v2 = vpop.f32.mrb[9].mxu1 }
  0xee   :  { %v127_v3 = vpop.f32.mrb[10].mxu0  ;;  %v159_v4 = vpop.f32.mrb[10].mxu1 }
  0xef   :  { %v166_v5 = vmax.f32 %v125_v63, 0.0  ;;  %v128_v6 = vadd.f32 %v330_v28, %v127_v3  ;;  %v223_v7 = vpop.f32.mrb[11].mxu0  ;;  %v174_v8 = vmax.f32 %v157_v1, 0.0  ;;  %v239_v9 = vpop.f32.mrb[11].mxu1 }
  0xf1   :  { %180 = vst.msk [vmem:[%s399_s3 + $0x20] sm:$0xff] %vm175_vm4, %v166_v5  ;;  %v167_v10 = vmax.f32 %v128_v6, 0.0 }
  0xf2   :  { %189 = vst.msk [vmem:[%s399_s3 + $0x60] sm:$0x3] %vm188_vm5, %v174_v8 }
  0xf3   :  { %181 = vst.msk [vmem:[%s399_s3 + $0x28] sm:$0xff] %vm175_vm4, %v167_v10 }
  0xf4   :  { %v132_v11 = vpop.f32.mrb[12].mxu0 }
  0xf5   :  { %v133_v12 = vadd.f32 %v330_v28, %v132_v11  ;;  %v226_v13 = vpop.f32.mrb[13].mxu0 }
  0xf6   :  { %v135_v14 = vpop.f32.mrb[14].mxu0 }
  0xf7   :  { %v168_v15 = vmax.f32 %v133_v12, 0.0  ;;  %v136_v16 = vadd.f32 %v330_v28, %v135_v14  ;;  %v227_v17 = vpop.f32.mrb[15].mxu0 }
  0xf9   :  { %182 = vst.msk [vmem:[%s399_s3 + $0x30] sm:$0xff] %vm175_vm4, %v168_v15  ;;  %v169_v18 = vmax.f32 %v136_v16, 0.0 }
  0xfb   :  { %183 = vst.msk [vmem:[%s399_s3 + $0x38] sm:$0xff] %vm175_vm4, %v169_v18 }

// kernel: _lambda_.14
= control target key start
LH: loop header
LB: loop body
LE: loop exit
PB: predicated region body
PF: predicated region fallthrough
CT: control target
= control target key end

     0   :  { %vm91_vm0 = vcmask 261120   ;;  %vm199_vm1 = vcmask 254976   ;;  %s419_s1 = inlined_call_operand.vmem [shape: f32[288,32], index: 1, kind: input, shape index: {}]   ;;  %s420_s0 = inlined_call_operand.vmem [shape: f32[18,288], index: 0, kind: input, shape index: {}]   ;;  %s421_s2 = inlined_call_operand.vmem [shape: f32[1,32], index: 2, kind: input, shape index: {}]   ;;  %s422_s3 = inlined_call_operand.vmem [shape: f32[18,32], index: 3, kind: output, shape index: {}]  }
   0x1   :  { %v40_v0 = vld [vmem:[%s419_s1 + $0x80] sm:$0xff]  ;;  %v41_v1 = vld [vmem:[%s419_s1 + $0x88] sm:$0xff]  ;;  %v42_v5 = vld [vmem:[%s419_s1 + $0x90] sm:$0xff] }
   0x2   :  { %v24_v2 = vld [vmem:[%s419_s1] sm:$0xff]  ;;  %v74_v3 = vpack.c.bf16 %v41_v1, %v40_v0  ;;  %v25_v4 = vld [vmem:[%s419_s1 + $0x8] sm:$0xff]  ;;  %v43_v6 = vld [vmem:[%s419_s1 + $0x98] sm:$0xff] }
   0x3   :  { %v66_v7 = vpack.c.bf16 %v25_v4, %v24_v2  ;;  %v75_v8 = vpack.c.bf16 %v43_v6, %v42_v5  ;;  %v26_v9 = vld [vmem:[%s419_s1 + $0x10] sm:$0xff]  ;;  %v27_v10 = vld [vmem:[%s419_s1 + $0x18] sm:$0xff]  ;;  %v44_v11 = vld [vmem:[%s419_s1 + $0xa0] sm:$0xff] }
   0x4   :  { %208 = vmatprep.subr.bf16.mxu0 %v74_v3  ;;  %v45_v12 = vld [vmem:[%s419_s1 + $0xa8] sm:$0xff]  ;;  %v67_v13 = vpack.c.bf16 %v27_v10, %v26_v9  ;;  %v28_v15 = vld [vmem:[%s419_s1 + $0x20] sm:$0xff]  ;;  %v46_v17 = vld [vmem:[%s419_s1 + $0xb0] sm:$0xff] }
   0x5   :  { %209 = vmatpush3.bf16.msra.mxu0 %v66_v7  ;;  %v76_v14 = vpack.c.bf16 %v45_v12, %v44_v11  ;;  %v29_v16 = vld [vmem:[%s419_s1 + $0x28] sm:$0xff]  ;;  %v47_v18 = vld [vmem:[%s419_s1 + $0xb8] sm:$0xff]  ;;  %v30_v21 = vld [vmem:[%s419_s1 + $0x30] sm:$0xff] }
   0x6   :  { %210 = vmatprep.subr.bf16.mxu0 %v75_v8  ;;  %v68_v19 = vpack.c.bf16 %v29_v16, %v28_v15  ;;  %v77_v20 = vpack.c.bf16 %v47_v18, %v46_v17  ;;  %v31_v22 = vld [vmem:[%s419_s1 + $0x38] sm:$0xff]  ;;  %v48_v23 = vld [vmem:[%s419_s1 + $0xc0] sm:$0xff]  ;;  %v49_v24 = vld [vmem:[%s419_s1 + $0xc8] sm:$0xff] }
   0x7   :  { %v56_v25 = vld [vmem:[%s419_s1 + $0x100] sm:$0xff]  ;;  %v57_v26 = vld [vmem:[%s419_s1 + $0x108] sm:$0xff]  ;;  %v69_v30 = vpack.c.bf16 %v31_v22, %v30_v21  ;;  %v58_v34 = vld [vmem:[%s419_s1 + $0x110] sm:$0xff]  ;;  %v78_v35 = vpack.c.bf16 %v49_v24, %v48_v23 }
   0x8   :  { %v82_v27 = vpack.c.bf16 %v57_v26, %v56_v25  ;;  %v16_v28 = vld [vmem:[%s420_s0 + $0x8] sm:$0xff]  ;;  %v19_v29 = vld [vmem:[%s420_s0 + $0x20] sm:$0xff]  ;;  %v59_v36 = vld [vmem:[%s419_s1 + $0x118] sm:$0xff] }
   0x9   :  { %211 = vmatpush3.bf16.msra.mxu0 %v67_v13  ;;  %v32_v31 = vld [vmem:[%s419_s1 + $0x40] sm:$0xff]  ;;  %v33_v32 = vld [vmem:[%s419_s1 + $0x48] sm:$0xff]  ;;  %v61_v33 = vpack.c.bf16 %v19_v29, %v16_v28  ;;  %v17_v37 = vld [vmem:[%s420_s0 + $0x10] sm:$0xff]  ;;  %v83_v41 = vpack.c.bf16 %v59_v36, %v58_v34 }
   0xa   :  { %212 = vmatprep.subr.bf16.mxu0 %v76_v14  ;;  %240 = vmatprep.subr.bf16.mxu1 %v82_v27  ;;  %v20_v38 = vld [vmem:[%s420_s0 + $0x28] sm:$0xff]  ;;  %v50_v39 = vld [vmem:[%s419_s1 + $0xd0] sm:$0xff]  ;;  %v51_v40 = vld [vmem:[%s419_s1 + $0xd8] sm:$0xff]  ;;  %v70_v44 = vpack.c.bf16 %v33_v32, %v32_v31 }
   0xb   :  { %241 = vmatpush3.bf16.msra.mxu1 %v82_v27  ;;  %130 = vmatprep.mubr.bf16.mxu0 %v61_v33  ;;  %v62_v42 = vpack.c.bf16 %v20_v38, %v17_v37  ;;  %v23_v43 = vld [vmem:[%s420_s0 + $0x40] sm:$0x3]  ;;  %v79_v45 = vpack.c.bf16 %v51_v40, %v50_v39  ;;  %v34_v46 = vld [vmem:[%s419_s1 + $0x50] sm:$0xff]  ;;  %v35_v47 = vld [vmem:[%s419_s1 + $0x58] sm:$0xff] }
   0xc   :  { %242 = vmatprep.subr.bf16.mxu1 %v83_v41  ;;  %v65_v48 = vpack.c.bf16 %v23_v43, %v23_v43  ;;  %v52_v49 = vld [vmem:[%s419_s1 + $0xe0] sm:$0xff]  ;;  %v53_v50 = vld [vmem:[%s419_s1 + $0xe8] sm:$0xff]  ;;  %v71_v51 = vpack.c.bf16 %v35_v47, %v34_v46  ;;  %v54_v55 = vld [vmem:[%s419_s1 + $0xf0] sm:$0xff] }
   0xd   :  { %213 = vmatpush3.bf16.msra.mxu0 %v68_v19  ;;  %244 = vmatprep.mubr.msk.bf16.mxu1 %vm91_vm0, %v62_v42  ;;  %v80_v52 = vpack.c.bf16 %v53_v50, %v52_v49  ;;  %v36_v53 = vld [vmem:[%s419_s1 + $0x60] sm:$0xff]  ;;  %v37_v54 = vld [vmem:[%s419_s1 + $0x68] sm:$0xff]  ;;  %v55_v56 = vld [vmem:[%s419_s1 + $0xf8] sm:$0xff] }
   0xe   :  { %214 = vmatprep.subr.bf16.mxu0 %v77_v20  ;;  %v72_v57 = vpack.c.bf16 %v37_v54, %v36_v53  ;;  %v81_v58 = vpack.c.bf16 %v55_v56, %v54_v55  ;;  %v38_v59 = vld [vmem:[%s419_s1 + $0x70] sm:$0xff]  ;;  %v39_v60 = vld [vmem:[%s419_s1 + $0x78] sm:$0xff]  ;;  %v15_v62 = vld [vmem:[%s420_s0] sm:$0xff] }
   0xf   :  { %243 = vmatpush3.bf16.msra.mxu1 %v83_v41  ;;  %v73_v61 = vpack.c.bf16 %v39_v60, %v38_v59  ;;  %v18_v63 = vld [vmem:[%s420_s0 + $0x18] sm:$0xff]  ;;  %v21_v3 = vld [vmem:[%s420_s0 + $0x30] sm:$0x3]  ;;  %v205_v11 = vld [vmem:[%s421_s2] ss:$0 sm:$0xff] }
  0x10   :  { %v22_v0 = vld [vmem:[%s420_s0 + $0x38] sm:$0x3]  ;;  %v60_v1 = vpack.c.bf16 %v18_v63, %v15_v62  ;;  %v63_v4 = vpack.c.bf16 %v21_v3, %v21_v3 }
  0x11   :  { %215 = vmatpush3.bf16.msra.mxu0 %v69_v30  ;;  %v64_v2 = vpack.c.bf16 %v22_v0, %v22_v0 }
  0x12   :  { %216 = vmatprep.subr.bf16.mxu0 %v78_v35  ;;  %245 = vmatmul.mubr.msk.bf16.vlgmr.msra.gmra.mrb[0].mxu1 %vm91_vm0, %v65_v48 }
  0x15   :  { %217 = vmatpush3.bf16.msra.mxu0 %v70_v44 }
  0x16   :  { %218 = vmatprep.subr.bf16.mxu0 %v79_v45 }
  0x19   :  { %219 = vmatpush3.bf16.msra.mxu0 %v71_v51 }
  0x1a   :  { %220 = vmatprep.subr.bf16.mxu0 %v80_v52 }
  0x1d   :  { %221 = vmatpush3.bf16.msra.mxu0 %v72_v57 }
  0x1e   :  { %222 = vmatprep.subr.bf16.mxu0 %v81_v58 }
  0x21   :  { %223 = vmatpush3.bf16.msra.mxu0 %v73_v61 }
  0x24   :  { %131 = vmatmul.mubr.bf16.vlgmr.msra.gmra.mrb[0].mxu0 %v60_v1 }
  0x25   :  { %138 = vmatprep.mubr.bf16.mxu0 %v64_v2 }
  0x2c   :  { %139 = vmatmul.mubr.bf16.gmra.mrb[4].mxu0 %v63_v4 }
  0xe5   :  { %v246_v5 = vpop.f32.mrb[0].mxu1 }
  0xe6   :  { %v180_v6 = vpop.f32.mrb[1].mxu1 }
  0xe7   :  { %v247_v7 = vpop.f32.mrb[2].mxu1 }
  0xe8   :  { %v183_v8 = vpop.f32.mrb[3].mxu1 }
  0xf7   :  { %v224_v9 = vpop.f32.mrb[0].mxu0 }
  0xf8   :  { %v225_v10 = vpop.f32.mrb[1].mxu0 }
  0xf9   :  { %v226_v12 = vadd.f32 %v225_v10, %v224_v9  ;;  %v227_v13 = vpop.f32.mrb[2].mxu0 }
  0xfa   :  { %v228_v14 = vpop.f32.mrb[3].mxu0 }
  0xfb   :  { %v229_v15 = vadd.f32 %v228_v14, %v227_v13  ;;  %v133_v16 = vadd.f32 %v226_v12, %v205_v11 }
  0xfd   :  { %v181_v17 = vadd.f32 %v180_v6, %v133_v16  ;;  %v136_v18 = vadd.f32 %v229_v15, %v205_v11 }
  0xff   :  { %v194_v19 = vmax.f32 %v181_v17, 0.0  ;;  %v184_v20 = vadd.f32 %v183_v8, %v136_v18  ;;  %v230_v21 = vpop.f32.mrb[4].mxu0 }
 0x100   :  { %v231_v22 = vpop.f32.mrb[5].mxu0 }
 0x101   :  { %197 = vst.msk [vmem:[%s422_s3] sm:$0xff] %vm91_vm0, %v194_v19  ;;  %v195_v23 = vmax.f32 %v184_v20, 0.0  ;;  %v232_v24 = vadd.f32 %v231_v22, %v230_v21  ;;  %v233_v25 = vpop.f32.mrb[6].mxu0 }
 0x102   :  { %v234_v26 = vpop.f32.mrb[7].mxu0 }
 0x103   :  { %198 = vst.msk [vmem:[%s422_s3 + $0x8] sm:$0xff] %vm91_vm0, %v195_v23  ;;  %v141_v27 = vadd.f32 %v232_v24, %v205_v11 }
 0x105   :  { %v189_v28 = vadd.f32 %v246_v5, %v141_v27 }
 0x107   :  { %v196_v29 = vmax.f32 %v189_v28, 0.0 }
 0x109   :  { %200 = vst.msk [vmem:[%s422_s3 + $0x10] sm:$0x3] %vm199_vm1, %v196_v29 }

// kernel: _lambda_.15
= control target key start
LH: loop header
LB: loop body
LE: loop exit
PB: predicated region body
PF: predicated region fallthrough
CT: control target
= control target key end

     0   :  { %v119_v0 = vmov 0.0   ;;  %vm120_vm0 = vmmov 0   ;;  %vm42_vm1 = vcmask 785408   ;;  %vm86_vm2 = vcmask 259072   ;;  %s186_s1 = inlined_call_operand.vmem [shape: f32[96,32], index: 1, kind: input, shape index: {}]   ;;  %s187_s0 = inlined_call_operand.vmem [shape: f32[6,96], index: 0, kind: input, shape index: {}]   ;;  %s188_s2 = inlined_call_operand.vmem [shape: f32[1,32], index: 2, kind: input, shape index: {}]   ;;  %s189_s3 = inlined_call_operand.vmem [shape: f32[6,32], index: 3, kind: output, shape index: {}]  }
   0x1   :  { %101 = vmatprep.subr.bf16.mxu0 %v119_v0  ;;  %v16_v1 = vld [vmem:[%s186_s1] sm:$0xff]  ;;  %v17_v2 = vld [vmem:[%s186_s1 + $0x8] sm:$0xff]  ;;  %v18_v3 = vld [vmem:[%s186_s1 + $0x10] sm:$0xff]  ;;  %113 = vmatprep.mubr.msk.bf16.mxu0 %vm120_vm0, %v119_v0 }
   0x2   :  { %v29_v4 = vpack.c.bf16 %v17_v2, %v16_v1  ;;  %v19_v5 = vld [vmem:[%s186_s1 + $0x18] sm:$0xff]  ;;  %v20_v7 = vld [vmem:[%s186_s1 + $0x20] sm:$0xff]  ;;  %v21_v8 = vld [vmem:[%s186_s1 + $0x28] sm:$0xff] }
   0x3   :  { %v30_v6 = vpack.c.bf16 %v19_v5, %v18_v3  ;;  %v31_v9 = vpack.c.bf16 %v21_v8, %v20_v7  ;;  %v22_v10 = vld [vmem:[%s186_s1 + $0x30] sm:$0xff]  ;;  %v23_v11 = vld [vmem:[%s186_s1 + $0x38] sm:$0xff]  ;;  %v24_v13 = vld [vmem:[%s186_s1 + $0x40] sm:$0xff] }
   0x4   :  { %102 = vmatpush3.bf16.msra.mxu0 %v29_v4  ;;  %v32_v12 = vpack.c.bf16 %v23_v11, %v22_v10  ;;  %v25_v14 = vld [vmem:[%s186_s1 + $0x48] sm:$0xff]  ;;  %v26_v16 = vld [vmem:[%s186_s1 + $0x50] sm:$0xff]  ;;  %v27_v17 = vld [vmem:[%s186_s1 + $0x58] sm:$0xff] }
   0x5   :  { %103 = vmatprep.subr.bf16.mxu0 %v119_v0  ;;  %v33_v15 = vpack.c.bf16 %v25_v14, %v24_v13  ;;  %v34_v18 = vpack.c.bf16 %v27_v17, %v26_v16  ;;  %v15_v19 = vld [vmem:[%s187_s0] sm:$0x3f] }
   0x6   :  { %v28_v20 = vpack.c.bf16 %v15_v19, %v15_v19  ;;  %v92_v21 = vld [vmem:[%s188_s2] ss:$0 sm:$0xff] }
   0x8   :  { %104 = vmatpush3.bf16.msra.mxu0 %v30_v6 }
   0x9   :  { %105 = vmatprep.subr.bf16.mxu0 %v119_v0 }
   0xc   :  { %106 = vmatpush3.bf16.msra.mxu0 %v31_v9 }
   0xd   :  { %107 = vmatprep.subr.bf16.mxu0 %v119_v0 }
  0x10   :  { %108 = vmatpush3.bf16.msra.mxu0 %v32_v12 }
  0x11   :  { %109 = vmatprep.subr.bf16.mxu0 %v119_v0 }
  0x14   :  { %110 = vmatpush3.bf16.msra.mxu0 %v33_v15 }
  0x15   :  { %111 = vmatprep.subr.bf16.mxu0 %v119_v0 }
  0x18   :  { %112 = vmatpush3.bf16.msra.mxu0 %v34_v18 }
  0x1b   :  { %114 = vmatmul.mubr.msk.bf16.vlgmr.msra.gmra.mrb[0].mxu0 %vm42_vm1, %v28_v20 }
  0xee   :  { %v80_v22 = vpop.f32.mrb[0].mxu0 }
  0xef   :  { %v81_v23 = vadd.f32 %v92_v21, %v80_v22  ;;  %v115_v24 = vpop.f32.mrb[1].mxu0 }
  0xf0   :  { %v83_v25 = vpop.f32.mrb[2].mxu0 }
  0xf1   :  { %87 = vst.msk [vmem:[%s189_s3] sm:$0x3f] %vm86_vm2, %v81_v23  ;;  %v116_v26 = vpop.f32.mrb[3].mxu0 }

// kernel: _lambda_.16
= control target key start
LH: loop header
LB: loop body
LE: loop exit
PB: predicated region body
PF: predicated region fallthrough
CT: control target
= control target key end

     0   :  { %vm36_vm0 = vcmask 259072   ;;  %v244_v10 = vmov 0.0   ;;  %vm245_vm1 = vmmov 0   ;;  %vm79_vm2 = vcmask 261120   ;;  %s358_s0 = inlined_call_operand.vmem [shape: f32[6,32], index: 0, kind: input, shape index: {}]   ;;  %s359_s7 = inlined_call_operand.vmem [shape: f32[1,32], index: 7, kind: input, shape index: {}]   ;;  %s360_s8 = inlined_call_operand.vmem [shape: f32[1,32], index: 8, kind: input, shape index: {}]   ;;  %s361_s3 = inlined_call_operand.vmem [shape: f32[32,64], index: 3, kind: input, shape index: {}]   ;;  %s362_s1 = inlined_call_operand.vmem [shape: f32[1,32], index: 1, kind: input, shape index: {}]   ;;  %s363_s2 = inlined_call_operand.vmem [shape: f32[1,32], index: 2, kind: input, shape index: {}]   ;;  %s364_s5 = inlined_call_operand.vmem [shape: f32[64,32], index: 5, kind: input, shape index: {}]   ;;  %s365_s4 = inlined_call_operand.vmem [shape: f32[1,64], index: 4, kind: input, shape index: {}]   ;;  %s366_s6 = inlined_call_operand.vmem [shape: f32[1,32], index: 6, kind: input, shape index: {}]   ;;  %s367_s9 = inlined_call_operand.vmem [shape: f32[6,32], index: 9, kind: output, shape index: {}]  }
   0x1   :  { %v299_v0 = vld [vmem:[%s358_s0] sm:$0x3f]  ;;  %v66_v8 = vld [vmem:[%s361_s3 + $0x8] sm:$0xff]  ;;  %216 = vmatprep.subr.bf16.mxu0 %v244_v10  ;;  %v67_v11 = vld [vmem:[%s361_s3 + $0x10] sm:$0xff]  ;;  %224 = vmatprep.subr.bf16.mxu1 %v244_v10  ;;  %vm150_vm3 = vcmask 523264  }
   0x2   :  { %v37_v1 = vsel %vm36_vm0, %v299_v0, 0.0  ;;  %v65_v7 = vld [vmem:[%s361_s3] sm:$0xff]  ;;  %v68_v12 = vld [vmem:[%s361_s3 + $0x18] sm:$0xff]  ;;  %220 = vmatprep.mubr.msk.bf16.mxu0 %vm245_vm1, %v244_v10  ;;  %232 = vmatprep.mubr.msk.bf16.mxu1 %vm245_vm1, %v244_v10  ;;  %v131_v25 = vld [vmem:[%s364_s5 + $0x8] sm:$0xff] }
   0x3   :  { %38 = vadd.xlane.f32.xlu0 %v37_v1  ;;  %v70_v9 = vpack.c.bf16 %v66_v8, %v65_v7  ;;  %v71_v13 = vpack.c.bf16 %v68_v12, %v67_v11  ;;  %v201_v18 = vld [vmem:[%s362_s1] ss:$0 sm:$0xff]  ;;  %v132_v27 = vld [vmem:[%s364_s5 + $0x10] sm:$0xff]  ;;  %v133_v28 = vld [vmem:[%s364_s5 + $0x18] sm:$0xff] }
   0x4   :  { %v202_v20 = vld [vmem:[%s363_s2] ss:$0 sm:$0xff]  ;;  %v140_v29 = vpack.c.bf16 %v133_v28, %v132_v27  ;;  %v135_v31 = vld [vmem:[%s364_s5 + $0x28] sm:$0xff]  ;;  %v136_v33 = vld [vmem:[%s364_s5 + $0x30] sm:$0xff] }
   0x5   :  { %217 = vmatpush3.bf16.msra.mxu0 %v70_v9  ;;  %v130_v24 = vld [vmem:[%s364_s5] sm:$0xff]  ;;  %v137_v34 = vld [vmem:[%s364_s5 + $0x38] sm:$0xff] }
   0x6   :  { %218 = vmatprep.subr.bf16.mxu0 %v244_v10  ;;  %v139_v26 = vpack.c.bf16 %v131_v25, %v130_v24  ;;  %v134_v30 = vld [vmem:[%s364_s5 + $0x20] sm:$0xff]  ;;  %v142_v35 = vpack.c.bf16 %v137_v34, %v136_v33 }
   0x7   :  { %v141_v32 = vpack.c.bf16 %v135_v31, %v134_v30  ;;  %v203_v36 = vld [vmem:[%s365_s4] ss:$0 sm:$0xff] }
   0x8   :  { %225 = vmatpush3.bf16.msra.mxu1 %v139_v26  ;;  %v206_v48 = vld [vmem:[%s366_s6] ss:$0 sm:$0xff] }
   0x9   :  { %219 = vmatpush3.bf16.msra.mxu0 %v71_v13  ;;  %226 = vmatprep.subr.bf16.mxu1 %v244_v10 }
   0xc   :  { %227 = vmatpush3.bf16.msra.mxu1 %v140_v29 }
   0xd   :  { %228 = vmatprep.subr.bf16.mxu1 %v244_v10 }
  0x10   :  { %229 = vmatpush3.bf16.msra.mxu1 %v141_v32 }
  0x11   :  { %230 = vmatprep.subr.bf16.mxu1 %v244_v10 }
  0x14   :  { %231 = vmatpush3.bf16.msra.mxu1 %v142_v35 }
  0x90   :  { %v39_v2 = vpop.xlane.xlu0 %38 }
  0x91   :  { %v41_v3 = vmul.f32 0.03125, %v39_v2 }
  0x93   :  { %v42_v4 = vsub.f32 %v299_v0, %v41_v3 }
  0x95   :  { %v43_v5 = vmul.f32 %v42_v4, %v42_v4 }
  0x97   :  { %v44_v6 = vsel %vm36_vm0, %v43_v5, 0.0 }
  0x98   :  { %45 = vadd.xlane.f32.xlu0 %v44_v6 }
 0x125   :  { %v46_v14 = vpop.xlane.xlu0 %45 }
 0x126   :  { %v47_v15 = vmul.f32 0.03125, %v46_v14 }
 0x128   :  { %v48_v16 = vadd.f32 1e-05, %v47_v15 }
 0x12a   :  { %238 = vrsqrt.f32 %v48_v16 }
 0x134   :  { %v239_v17 = vpop.eup %238 }
 0x135   :  { %v50_v19 = vmul.f32 %v239_v17, %v42_v4 }
 0x137   :  { %v57_v21 = vmul.f32 %v201_v18, %v50_v19 }
 0x139   :  { %v64_v22 = vadd.f32 %v202_v20, %v57_v21 }
 0x13b   :  { %v69_v23 = vpack.c.bf16 %v64_v22, %v64_v22 }
 0x13d   :  { %221 = vmatmul.mubr.msk.bf16.vlgmr.msra.gmra.mrb[0].mxu0 %vm79_vm2, %v69_v23 }
 0x210   :  { %v117_v37 = vpop.f32.mrb[0].mxu0 }
 0x211   :  { %v118_v38 = vadd.f32 %v203_v36, %v117_v37  ;;  %v222_v39 = vpop.f32.mrb[1].mxu0 }
 0x212   :  { %v120_v40 = vpop.f32.mrb[2].mxu0 }
 0x213   :  { %v205_v41 = vmul.f32 -1.442695, %v118_v38  ;;  %v223_v42 = vpop.f32.mrb[3].mxu0 }
 0x215   :  { %240 = vpow2.f32 %v205_v41 }
 0x21f   :  { %v241_v43 = vpop.eup %240 }
 0x220   :  { %v126_v44 = vadd.f32 1.0, %v241_v43 }
 0x222   :  { %242 = vrcp.f32 %v126_v44 }
 0x22c   :  { %v243_v45 = vpop.eup %242 }
 0x22d   :  { %v129_v46 = vmul.f32 %v243_v45, %v118_v38 }
 0x22f   :  { %v138_v47 = vpack.c.bf16 %v129_v46, %v129_v46 }
 0x231   :  { %233 = vmatmul.mubr.msk.bf16.vlgmr.msra.gmra.mrb[0].mxu1 %vm150_vm3, %v138_v47 }
 0x304   :  { %v188_v49 = vpop.f32.mrb[0].mxu1 }
 0x305   :  { %v189_v50 = vadd.f32 %v206_v48, %v188_v49  ;;  %v234_v51 = vpop.f32.mrb[1].mxu1 }
 0x306   :  { %v191_v52 = vpop.f32.mrb[2].mxu1 }
 0x307   :  { %v194_v53 = vmul.f32 0.5, %v189_v50  ;;  %v235_v54 = vpop.f32.mrb[3].mxu1 }
 0x309   :  { %v195_v55 = vadd.f32 %v194_v53, %v299_v0 }
 0x30b   :  { %196 = vst.msk [vmem:[%s367_s9] sm:$0x3f] %vm36_vm0, %v195_v55 }

// kernel: _lambda_.18
= control target key start
LH: loop header
LB: loop body
LE: loop exit
PB: predicated region body
PF: predicated region fallthrough
CT: control target
= control target key end

     0   :  { %s806_s17 = smov 0   ;;  %s904_s0 = inlined_call_operand.vmem [shape: f32[2,3,32], index: 0, kind: input, shape index: {}]   ;;  %s905_s1 = inlined_call_operand.vmem [shape: f32[1,32], index: 1, kind: input, shape index: {}]   ;;  %s906_s2 = inlined_call_operand.vmem [shape: f32[1,32], index: 2, kind: input, shape index: {}]   ;;  %s907_s3 = inlined_call_operand.vmem [shape: f32[32,64], index: 3, kind: input, shape index: {}]   ;;  %s908_s4 = inlined_call_operand.vmem [shape: f32[1,64], index: 4, kind: input, shape index: {}]   ;;  %s909_s5 = inlined_call_operand.vmem [shape: f32[3,32], index: 5, kind: input, shape index: {}]   ;;  %s910_s6 = inlined_call_operand.vmem [shape: f32[1,32], index: 6, kind: input, shape index: {}]   ;;  %s911_s7 = inlined_call_operand.vmem [shape: f32[1,32], index: 7, kind: input, shape index: {}]   ;;  %s912_s8 = inlined_call_operand.vmem [shape: f32[1,32], index: 8, kind: input, shape index: {}]   ;;  %s913_s9 = inlined_call_operand.vmem [shape: f32[32,32], index: 9, kind: input, shape index: {}]   ;;  %s914_s10 = inlined_call_operand.vmem [shape: f32[1,32], index: 10, kind: input, shape index: {}]   ;;  %s915_s11 = inlined_call_operand.vmem [shape: f32[2,3,32], index: 11, kind: output, shape index: {}]  }
   0x1 LB: > { %s667_s18 = sadd.s32 4294967295, %s741_s17   ;;  %p671_p0 = scmp.ge.s32.totalorder %s741_s17, 1  ;;  %s741_s17 = sphi %s806_s17, %s21_s17  }
   0x2   : > { %p336_p1 = scmp.lt.s32.totalorder %s741_s17, 3 }
   0x4   : > { %p337_p2 = pnand %p671_p0, %p336_p1 }
   0x5   : > { %p374_p3 = scmp.lt.s32.totalorder (!%p337_p2), %s667_s18, 1  ;;  %vm386_vm0 = vcmask (!%p337_p2), 256000   ;;  %vm484_vm1 = vcmask (!%p337_p2), 254976   ;;  %v415_v7 = vld [vmem:[%s907_s3] sm:$0xff] (!%p337_p2)  ;;  %v416_v8 = vld [vmem:[%s907_s3 + $0x8] sm:$0xff] (!%p337_p2)  ;;  %v417_v9 = vld [vmem:[%s907_s3 + $0x10] sm:$0xff] (!%p337_p2) }
   0x6   : > { %340 = sbr.rel (%p337_p2) target bundleno = 1266 (0x4f2), region = 64  ;;  %v743_v10 = vmov (!%p337_p2), 0.0   ;;  %v420_v11 = vpack.c.bf16 (!%p337_p2), %v416_v8, %v415_v7  ;;  %v418_v12 = vld [vmem:[%s907_s3 + $0x18] sm:$0xff] (!%p337_p2)  ;;  %vm744_vm2 = vmmov (!%p337_p2), 0   ;;  %v674_v18 = vld [vmem:[%s905_s1] ss:$0 sm:$0xff] (!%p337_p2) }
   0x7   : > { %696 = vmatprep.subr.bf16.mxu0 (!%p337_p2), %v743_v10  ;;  %485 = vst.msk [vmem:[#allocation2] sm:$0x3] (!%p337_p2), %vm484_vm1, %v743_v10  ;;  %700 = vmatprep.mubr.msk.bf16.mxu0 (!%p337_p2), %vm744_vm2, %v743_v10  ;;  %v421_v13 = vpack.c.bf16 (!%p337_p2), %v418_v12, %v417_v9  ;;  %v675_v20 = vld [vmem:[%s906_s2] ss:$0 sm:$0xff] (!%p337_p2)  ;;  %vm429_vm3 = vcmask (!%p337_p2), 261120   ;;  %s745_s21 = smov (!%p337_p2), 96  }
   0x8   : > { %704 = vmatprep.subr.bf16.mxu1 (!%p337_p2), %v743_v10  ;;  %708 = vmatprep.mubr.msk.bf16.mxu1 (!%p337_p2), %vm744_vm2, %v743_v10  ;;  %v676_v24 = vld [vmem:[%s908_s4] ss:$0 sm:$0xff] (!%p337_p2)  ;;  %v680_v37 = vld [vmem:[%s909_s5 + $0x1] ss:$0 sm:$0xff] (!%p337_p2)  ;;  %v681_v38 = vld [vmem:[%s909_s5 + $0x2] ss:$0 sm:$0xff] (!%p337_p2) }
   0x9   : > { %697 = vmatpush3.bf16.msra.mxu0 (!%p337_p2), %v420_v11  ;;  %v679_v36 = vld [vmem:[%s909_s5] ss:$0 sm:$0xff] (!%p337_p2)  ;;  %v556_v56 = vld [vmem:[%s913_s9 + $0x8] sm:$0xff] (!%p337_p2)  ;;  %v557_v57 = vld [vmem:[%s913_s9 + $0x10] sm:$0xff] (!%p337_p2) }
   0xa   : > { %698 = vmatprep.subr.bf16.mxu0 (!%p337_p2), %v743_v10  ;;  %v682_v46 = vld [vmem:[%s910_s6] ss:$0 sm:$0xff] (!%p337_p2)  ;;  %v558_v59 = vld [vmem:[%s913_s9 + $0x18] sm:$0xff] (!%p337_p2) }
   0xb   : > { %v555_v55 = vld [vmem:[%s913_s9] sm:$0xff] (!%p337_p2)  ;;  %v561_v60 = vpack.c.bf16 (!%p337_p2), %v558_v59, %v557_v57 }
   0xc   : > { %v560_v58 = vpack.c.bf16 (!%p337_p2), %v556_v56, %v555_v55 }
   0xd   : > { %s917_s18 = smov (!%p374_p3, %s667_s18), 1  ;;  %699 = vmatpush3.bf16.msra.mxu0 %v421_v13  ;;  %v686_v13 = vld [vmem:[%s914_s10] ss:$0 sm:$0xff] }
   0xe   : > { %s672_s19 = sshll.u32 %s917_s18, 2  ;;  %705 = vmatpush3.bf16.msra.mxu1 %v560_v58 }
   0xf   : > { %s377_s22 = scalar_lea.vmem %s904_s0, %s672_s19  ;;  %706 = vmatprep.subr.bf16.mxu1 %v743_v10  ;;  %s381_s30 = scalar_lea.vmem %s915_s11, %s672_s19 }
  0x10   : > { %v822_v0 = vld [vmem:[%s377_s22] sm:$0x7] }
  0x11   : > { %v387_v1 = vsel %vm386_vm0, %v822_v0, 0.0 }
  0x12   : > { %388 = vadd.xlane.f32.xlu0 %v387_v1  ;;  %707 = vmatpush3.bf16.msra.mxu1 %v561_v60 }
  0x9f   : > { %v389_v2 = vpop.xlane.xlu0 %388 }
  0xa0   : > { %v391_v3 = vmul.f32 0.03125, %v389_v2  ;;  %v683_v2 = vld [vmem:[%s911_s7] ss:$0 sm:$0xff] }
  0xa2   : > { %v392_v4 = vsub.f32 %v822_v0, %v391_v3 }
  0xa4   : > { %v393_v5 = vmul.f32 %v392_v4, %v392_v4 }
  0xa6   : > { %v394_v6 = vsel %vm386_vm0, %v393_v5, 0.0 }
  0xa7   : > { %395 = vadd.xlane.f32.xlu0 %v394_v6 }
 0x134   : > { %v396_v14 = vpop.xlane.xlu0 %395 }
 0x135   : > { %v397_v15 = vmul.f32 0.03125, %v396_v14 }
 0x137   : > { %v398_v16 = vadd.f32 1e-05, %v397_v15 }
 0x139   : > { %723 = vrsqrt.f32 %v398_v16 }
 0x143   : > { %v724_v17 = vpop.eup %723 }
 0x144   : > { %v400_v19 = vmul.f32 %v724_v17, %v392_v4  ;;  %v684_v4 = vld [vmem:[%s912_s8] ss:$0 sm:$0xff] }
 0x146   : > { %v407_v21 = vmul.f32 %v674_v18, %v400_v19 }
 0x148   : > { %v414_v22 = vadd.f32 %v675_v20, %v407_v21 }
 0x14a   : > { %v419_v23 = vpack.c.bf16 %v414_v22, %v414_v22 }
 0x14c   : > { %701 = vmatmul.mubr.msk.bf16.vlgmr.msra.gmra.mrb[0].mxu0 %vm429_vm3, %v419_v23 }
 0x21f   : > { %v467_v25 = vpop.f32.mrb[0].mxu0 }
 0x220   : > { %v468_v26 = vadd.f32 %v676_v24, %v467_v25  ;;  %v702_v27 = vpop.f32.mrb[1].mxu0 }
 0x221   : > { %v470_v28 = vpop.f32.mrb[2].mxu0 }
 0x222   : > { %v678_v29 = vmul.f32 -1.442695, %v468_v26  ;;  %v703_v30 = vpop.f32.mrb[3].mxu0 }
 0x224   : > { %725 = vpow2.f32 %v678_v29 }
 0x22e   : > { %v726_v31 = vpop.eup %725 }
 0x22f   : > { %v476_v32 = vadd.f32 1.0, %v726_v31 }
 0x231   : > { %727 = vrcp.f32 %v476_v32 }
 0x23b   : > { %v728_v33 = vpop.eup %727 }
 0x23c   : > { %480 = vrot.lane.b32.xlu1 %v728_v33, %s745_s21 }
 0x2ae   : > { %v481_v34 = vpop.permute.xlu1 %480 }
 0x2af   : > { %v483_v35 = vmul.f32 %v481_v34, %v468_v26 }
 0x2b1   : > { %486 = vst.msk [vmem:[#allocation2 + $0x2] sm:$0x7] %vm386_vm0, %v483_v35 }
 0x2b8   : > { %v487_v39 = vld [vmem:[#allocation2] sm:$0x7] }
 0x2b9   : > { %v495_v40 = vld [vmem:[#allocation2 + $0x1] sm:$0x7]  ;;  %v493_v42 = vmul.f32 %v679_v36, %v487_v39 }
 0x2ba   : > { %v503_v41 = vld [vmem:[#allocation2 + $0x2] sm:$0x7]  ;;  %v501_v43 = vmul.f32 %v680_v37, %v495_v40 }
 0x2bb   : > { %v509_v45 = vmul.f32 %v681_v38, %v503_v41 }
 0x2bc   : > { %v502_v44 = vadd.f32 %v501_v43, %v493_v42 }
 0x2be   : > { %v510_v47 = vadd.f32 %v509_v45, %v502_v44 }
 0x2c0   : > { %v518_v48 = vadd.f32 %v682_v46, %v510_v47 }
 0x2c2   : > { %v521_v49 = vsel %vm386_vm0, %v518_v48, 0.0 }
 0x2c3   : > { %522 = vadd.xlane.f32.xlu1 %v521_v49 }
 0x350   : > { %v523_v50 = vpop.xlane.xlu1 %522 }
 0x351   : > { %v524_v51 = vmul.f32 0.03125, %v523_v50 }
 0x353   : > { %v525_v52 = vsub.f32 %v518_v48, %v524_v51 }
 0x355   : > { %v526_v53 = vmul.f32 %v525_v52, %v525_v52 }
 0x357   : > { %v527_v54 = vsel %vm386_vm0, %v526_v53, 0.0 }
 0x358   : > { %528 = vadd.xlane.f32.xlu0 %v527_v54 }
 0x3e5   : > { %v529_v61 = vpop.xlane.xlu0 %528 }
 0x3e6   : > { %v530_v62 = vmul.f32 0.03125, %v529_v61 }
 0x3e8   : > { %v531_v63 = vadd.f32 1e-05, %v530_v62 }
 0x3ea   : > { %729 = vrsqrt.f32 %v531_v63 }
 0x3f4   : > { %v730_v1 = vpop.eup %729 }
 0x3f5   : > { %v533_v3 = vmul.f32 %v730_v1, %v525_v52 }
 0x3f7   : > { %v540_v5 = vmul.f32 %v683_v2, %v533_v3 }
 0x3f9   : > { %v547_v6 = vadd.f32 %v684_v4, %v540_v5 }
 0x3fb   : > { %v685_v7 = vmul.f32 -1.442695, %v547_v6 }
 0x3fd   : > { %731 = vpow2.f32 %v685_v7 }
 0x407   : > { %v732_v8 = vpop.eup %731 }
 0x408   : > { %v551_v9 = vadd.f32 1.0, %v732_v8 }
 0x40a   : > { %733 = vrcp.f32 %v551_v9 }
 0x414   : > { %v734_v10 = vpop.eup %733 }
 0x415   : > { %v554_v11 = vmul.f32 %v734_v10, %v547_v6 }
 0x417   : > { %v559_v12 = vpack.c.bf16 %v554_v11, %v554_v11 }
 0x419   : > { %709 = vmatmul.mubr.msk.bf16.vlgmr.msra.gmra.mrb[0].mxu1 %vm429_vm3, %v559_v12 }
 0x4ec   : > { %v606_v14 = vpop.f32.mrb[0].mxu1 }
 0x4ed   : > { %v607_v15 = vadd.f32 %v686_v13, %v606_v14  ;;  %v710_v16 = vpop.f32.mrb[1].mxu1 }
 0x4ee   : > { %v609_v17 = vpop.f32.mrb[2].mxu1 }
 0x4ef   : > { %v612_v18 = vadd.f32 %v607_v15, %v822_v0  ;;  %v711_v19 = vpop.f32.mrb[3].mxu1 }
 0x4f1   : > { %613 = vst.msk [vmem:[%s381_s30] sm:$0x7] %vm386_vm0, %v612_v18 }
 0x4f2 PF: > { %s21_s17 = sadd.s32 1, %s741_s17  }
 0x4f3   : > { %p18_p4 = scmp.ge.s32.totalorder %s21_s17, 4  }
 0x4f5   :  { %20 = sbr.rel (!%p18_p4) target bundleno = 1 (0x1), region = 94 }

// kernel: _lambda_.19
= control target key start
LH: loop header
LB: loop body
LE: loop exit
PB: predicated region body
PF: predicated region fallthrough
CT: control target
= control target key end

     0   :  { %vm36_vm0 = vcmask 259072   ;;  %v277_v10 = vmov 0.0   ;;  %vm278_vm1 = vmmov 0   ;;  %vm79_vm2 = vcmask 261120   ;;  %s399_s0 = inlined_call_operand.vmem [shape: f32[6,32], index: 0, kind: input, shape index: {}]   ;;  %s400_s3 = inlined_call_operand.vmem [shape: f32[32,64], index: 3, kind: input, shape index: {}]   ;;  %s401_s1 = inlined_call_operand.vmem [shape: f32[1,32], index: 1, kind: input, shape index: {}]   ;;  %s402_s2 = inlined_call_operand.vmem [shape: f32[1,32], index: 2, kind: input, shape index: {}]   ;;  %s403_s5 = inlined_call_operand.vmem [shape: f32[64,32], index: 5, kind: input, shape index: {}]   ;;  %s404_s4 = inlined_call_operand.vmem [shape: f32[1,64], index: 4, kind: input, shape index: {}]   ;;  %s405_s6 = inlined_call_operand.vmem [shape: f32[1,32], index: 6, kind: input, shape index: {}]   ;;  %s406_s7 = inlined_call_operand.vmem [shape: f32[1,32], index: 7, kind: input, shape index: {}]   ;;  %s407_s8 = inlined_call_operand.vmem [shape: f32[1,32], index: 8, kind: input, shape index: {}]   ;;  %s408_s9 = inlined_call_operand.vmem [shape: f32[6,32], index: 9, kind: output, shape index: {}]  }
   0x1   :  { %v332_v0 = vld [vmem:[%s399_s0] sm:$0x3f]  ;;  %v66_v8 = vld [vmem:[%s400_s3 + $0x8] sm:$0xff]  ;;  %247 = vmatprep.subr.bf16.mxu0 %v277_v10  ;;  %v67_v11 = vld [vmem:[%s400_s3 + $0x10] sm:$0xff]  ;;  %255 = vmatprep.subr.bf16.mxu1 %v277_v10  ;;  %vm150_vm3 = vcmask 523264  }
   0x2   :  { %v37_v1 = vsel %vm36_vm0, %v332_v0, 0.0  ;;  %v65_v7 = vld [vmem:[%s400_s3] sm:$0xff]  ;;  %v68_v12 = vld [vmem:[%s400_s3 + $0x18] sm:$0xff]  ;;  %251 = vmatprep.mubr.msk.bf16.mxu0 %vm278_vm1, %v277_v10  ;;  %263 = vmatprep.mubr.msk.bf16.mxu1 %vm278_vm1, %v277_v10  ;;  %v131_v25 = vld [vmem:[%s403_s5 + $0x8] sm:$0xff] }
   0x3   :  { %38 = vadd.xlane.f32.xlu0 %v37_v1  ;;  %v70_v9 = vpack.c.bf16 %v66_v8, %v65_v7  ;;  %v71_v13 = vpack.c.bf16 %v68_v12, %v67_v11  ;;  %v230_v18 = vld [vmem:[%s401_s1] ss:$0 sm:$0xff]  ;;  %v132_v27 = vld [vmem:[%s403_s5 + $0x10] sm:$0xff]  ;;  %v133_v28 = vld [vmem:[%s403_s5 + $0x18] sm:$0xff] }
   0x4   :  { %v231_v20 = vld [vmem:[%s402_s2] ss:$0 sm:$0xff]  ;;  %v140_v29 = vpack.c.bf16 %v133_v28, %v132_v27  ;;  %v135_v31 = vld [vmem:[%s403_s5 + $0x28] sm:$0xff]  ;;  %v136_v33 = vld [vmem:[%s403_s5 + $0x30] sm:$0xff] }
   0x5   :  { %248 = vmatpush3.bf16.msra.mxu0 %v70_v9  ;;  %v130_v24 = vld [vmem:[%s403_s5] sm:$0xff]  ;;  %v137_v34 = vld [vmem:[%s403_s5 + $0x38] sm:$0xff] }
   0x6   :  { %249 = vmatprep.subr.bf16.mxu0 %v277_v10  ;;  %v139_v26 = vpack.c.bf16 %v131_v25, %v130_v24  ;;  %v134_v30 = vld [vmem:[%s403_s5 + $0x20] sm:$0xff]  ;;  %v142_v35 = vpack.c.bf16 %v137_v34, %v136_v33 }
   0x7   :  { %v141_v32 = vpack.c.bf16 %v135_v31, %v134_v30  ;;  %v232_v36 = vld [vmem:[%s404_s4] ss:$0 sm:$0xff] }
   0x8   :  { %256 = vmatpush3.bf16.msra.mxu1 %v139_v26  ;;  %v235_v48 = vld [vmem:[%s405_s6] ss:$0 sm:$0xff] }
   0x9   :  { %250 = vmatpush3.bf16.msra.mxu0 %v71_v13  ;;  %257 = vmatprep.subr.bf16.mxu1 %v277_v10 }
   0xc   :  { %258 = vmatpush3.bf16.msra.mxu1 %v140_v29 }
   0xd   :  { %259 = vmatprep.subr.bf16.mxu1 %v277_v10 }
  0x10   :  { %260 = vmatpush3.bf16.msra.mxu1 %v141_v32 }
  0x11   :  { %261 = vmatprep.subr.bf16.mxu1 %v277_v10 }
  0x14   :  { %262 = vmatpush3.bf16.msra.mxu1 %v142_v35 }
  0x90   :  { %v39_v2 = vpop.xlane.xlu0 %38 }
  0x91   :  { %v41_v3 = vmul.f32 0.03125, %v39_v2 }
  0x93   :  { %v42_v4 = vsub.f32 %v332_v0, %v41_v3  ;;  %v237_v3 = vld [vmem:[%s406_s7] ss:$0 sm:$0xff] }
  0x95   :  { %v43_v5 = vmul.f32 %v42_v4, %v42_v4 }
  0x97   :  { %v44_v6 = vsel %vm36_vm0, %v43_v5, 0.0 }
  0x98   :  { %45 = vadd.xlane.f32.xlu0 %v44_v6 }
 0x125   :  { %v46_v14 = vpop.xlane.xlu0 %45 }
 0x126   :  { %v47_v15 = vmul.f32 0.03125, %v46_v14 }
 0x128   :  { %v48_v16 = vadd.f32 1e-05, %v47_v15 }
 0x12a   :  { %269 = vrsqrt.f32 %v48_v16 }
 0x134   :  { %v270_v17 = vpop.eup %269 }
 0x135   :  { %v50_v19 = vmul.f32 %v270_v17, %v42_v4  ;;  %v238_v4 = vld [vmem:[%s407_s8] ss:$0 sm:$0xff] }
 0x137   :  { %v57_v21 = vmul.f32 %v230_v18, %v50_v19 }
 0x139   :  { %v64_v22 = vadd.f32 %v231_v20, %v57_v21 }
 0x13b   :  { %v69_v23 = vpack.c.bf16 %v64_v22, %v64_v22 }
 0x13d   :  { %252 = vmatmul.mubr.msk.bf16.vlgmr.msra.gmra.mrb[0].mxu0 %vm79_vm2, %v69_v23 }
 0x210   :  { %v117_v37 = vpop.f32.mrb[0].mxu0 }
 0x211   :  { %v118_v38 = vadd.f32 %v232_v36, %v117_v37  ;;  %v253_v39 = vpop.f32.mrb[1].mxu0 }
 0x212   :  { %v120_v40 = vpop.f32.mrb[2].mxu0 }
 0x213   :  { %v234_v41 = vmul.f32 -1.442695, %v118_v38  ;;  %v254_v42 = vpop.f32.mrb[3].mxu0 }
 0x215   :  { %271 = vpow2.f32 %v234_v41 }
 0x21f   :  { %v272_v43 = vpop.eup %271 }
 0x220   :  { %v126_v44 = vadd.f32 1.0, %v272_v43 }
 0x222   :  { %273 = vrcp.f32 %v126_v44 }
 0x22c   :  { %v274_v45 = vpop.eup %273 }
 0x22d   :  { %v129_v46 = vmul.f32 %v274_v45, %v118_v38 }
 0x22f   :  { %v138_v47 = vpack.c.bf16 %v129_v46, %v129_v46 }
 0x231   :  { %264 = vmatmul.mubr.msk.bf16.vlgmr.msra.gmra.mrb[0].mxu1 %vm150_vm3, %v138_v47 }
 0x304   :  { %v188_v49 = vpop.f32.mrb[0].mxu1 }
 0x305   :  { %v189_v50 = vadd.f32 %v235_v48, %v188_v49  ;;  %v265_v51 = vpop.f32.mrb[1].mxu1 }
 0x306   :  { %v191_v52 = vpop.f32.mrb[2].mxu1 }
 0x307   :  { %v194_v53 = vmul.f32 0.5, %v189_v50  ;;  %v266_v54 = vpop.f32.mrb[3].mxu1 }
 0x309   :  { %v195_v55 = vadd.f32 %v194_v53, %v332_v0 }
 0x30b   :  { %v198_v56 = vsel %vm36_vm0, %v195_v55, 0.0 }
 0x30c   :  { %199 = vadd.xlane.f32.xlu1 %v198_v56 }
 0x399   :  { %v200_v57 = vpop.xlane.xlu1 %199 }
 0x39a   :  { %v201_v58 = vmul.f32 0.03125, %v200_v57 }
 0x39c   :  { %v202_v59 = vsub.f32 %v195_v55, %v201_v58 }
 0x39e   :  { %v203_v60 = vmul.f32 %v202_v59, %v202_v59 }
 0x3a0   :  { %v204_v61 = vsel %vm36_vm0, %v203_v60, 0.0 }
 0x3a1   :  { %205 = vadd.xlane.f32.xlu1 %v204_v61 }
 0x42e   :  { %v206_v62 = vpop.xlane.xlu1 %205 }
 0x42f   :  { %v207_v63 = vmul.f32 0.03125, %v206_v62 }
 0x431   :  { %v208_v1 = vadd.f32 1e-05, %v207_v63 }
 0x433   :  { %275 = vrsqrt.f32 %v208_v1 }
 0x43d   :  { %v276_v2 = vpop.eup %275 }
 0x43e   :  { %v210_v0 = vmul.f32 %v276_v2, %v202_v59 }
 0x440   :  { %v217_v5 = vmul.f32 %v237_v3, %v210_v0 }
 0x442   :  { %v224_v6 = vadd.f32 %v238_v4, %v217_v5 }
 0x444   :  { %225 = vst.msk [vmem:[%s408_s9] sm:$0x3f] %vm36_vm0, %v224_v6 }

// kernel: _lambda_.17
= control target key start
LH: loop header
LB: loop body
LE: loop exit
PB: predicated region body
PF: predicated region fallthrough
CT: control target
= control target key end

     0   :  { %s1328_s24 = smov 0   ;;  %s1493_s0 = inlined_call_operand.vmem [shape: f32[2,3,32], index: 0, kind: input, shape index: {}]   ;;  %s1494_s1 = inlined_call_operand.vmem [shape: f32[1,32], index: 1, kind: input, shape index: {}]   ;;  %s1495_s2 = inlined_call_operand.vmem [shape: f32[1,32], index: 2, kind: input, shape index: {}]   ;;  %s1496_s3 = inlined_call_operand.vmem [shape: f32[32,96], index: 3, kind: input, shape index: {}]   ;;  %s1497_s4 = inlined_call_operand.vmem [shape: f32[1,96], index: 4, kind: input, shape index: {}]   ;;  %s1498_s5 = inlined_call_operand.vmem [shape: f32[32,32], index: 5, kind: input, shape index: {}]   ;;  %s1499_s6 = inlined_call_operand.vmem [shape: f32[1,32], index: 6, kind: input, shape index: {}]   ;;  %s1500_s7 = inlined_call_operand.vmem [shape: f32[2,3,32], index: 7, kind: output, shape index: {}]  }
   0x1 LB: > { %s1091_s25 = sadd.s32 4294967295, %s1271_s24   ;;  %p1095_p0 = scmp.ge.s32.totalorder %s1271_s24, 1  ;;  %s1271_s24 = sphi %s1328_s24, %s17_s24  }
   0x2   : > { %p236_p1 = scmp.lt.s32.totalorder %s1271_s24, 3 }
   0x4   : > { %p237_p2 = pnand %p1095_p0, %p236_p1 }
   0x5   : > { %p266_p3 = scmp.lt.s32.totalorder (!%p237_p2), %s1091_s25, 1  ;;  %vm278_vm0 = vcmask (!%p237_p2), 256000   ;;  %v307_v7 = vld [vmem:[%s1496_s3] sm:$0xff] (!%p237_p2)  ;;  %v308_v8 = vld [vmem:[%s1496_s3 + $0x8] sm:$0xff] (!%p237_p2)  ;;  %v309_v9 = vld [vmem:[%s1496_s3 + $0x10] sm:$0xff] (!%p237_p2)  ;;  %v1273_v10 = vmov (!%p237_p2), 0.0   ;;  %v365_v36 = vlaneseq (!%p237_p2) }
   0x6   : > { %240 = sbr.rel (%p237_p2) target bundleno = 2474 (0x9aa), region = 48  ;;  %1144 = vmatprep.subr.bf16.mxu0 (!%p237_p2), %v1273_v10  ;;  %v312_v11 = vpack.c.bf16 (!%p237_p2), %v308_v8, %v307_v7  ;;  %v310_v12 = vld [vmem:[%s1496_s3 + $0x18] sm:$0xff] (!%p237_p2)  ;;  %vm1274_vm1 = vmmov (!%p237_p2), 0   ;;  %1152 = vmatprep.subr.bf16.mxu1 (!%p237_p2), %v1273_v10  ;;  %v1098_v18 = vld [vmem:[%s1494_s1] ss:$0 sm:$0xff] (!%p237_p2)  ;;  %vm321_vm2 = vcmask (!%p237_p2), 261120  }
   0x7   : > { %1148 = vmatprep.mubr.msk.bf16.mxu0 (!%p237_p2), %vm1274_vm1, %v1273_v10  ;;  %1154 = vmatprep.mubr.msk.bf16.mxu1 (!%p237_p2), %vm1274_vm1, %v1273_v10  ;;  %v313_v13 = vpack.c.bf16 (!%p237_p2), %v310_v12, %v309_v9  ;;  %v1099_v20 = vld [vmem:[%s1495_s2] ss:$0 sm:$0xff] (!%p237_p2)  ;;  %s1275_s21 = smov (!%p237_p2), 120   ;;  %s1276_s22 = smov (!%p237_p2), 96   ;;  %vm382_vm3 = vcmask (!%p237_p2), 64512   ;;  %v366_v37 = vshrl.u32 (!%p237_p2), %v365_v36, 7 }
   0x8   : > { %1145 = vmatpush3.bf16.msra.mxu0 (!%p237_p2), %v312_v11  ;;  %v1100_v24 = vld [vmem:[%s1497_s4] ss:$0 sm:$0xff] (!%p237_p2)  ;;  %s1277_s23 = smov (!%p237_p2), 88   ;;  %v368_v38 = vand.u32 (!%p237_p2), 127, %v365_v36  ;;  %v1278_v41 = vmov (!%p237_p2), -1e+30  }
   0x9   : > { %1146 = vmatprep.subr.bf16.mxu0 (!%p237_p2), %v1273_v10  ;;  %vm431_vm7 = vcmask (!%p237_p2), 18432   ;;  %s1279_s27 = smov (!%p237_p2), 64   ;;  %s1280_s28 = smov (!%p237_p2), 56   ;;  %vm449_vm8 = vcmask (!%p237_p2), 1040384   ;;  %vm450_vm9 = vcmask (!%p237_p2), 1041408   ;;  %v1283_v56 = vmov (!%p237_p2), 65535  }
   0xa   : > { %v370_v39 = vsub.s32 (!%p237_p2), %v366_v37, %v368_v38  ;;  %vm369_vm4 = vcmp.le.s32.totalorder (!%p237_p2), %v368_v38, %v366_v37  ;;  %s1282_s30 = smov (!%p237_p2), 112   ;;  %v451_v57 = vsel (!%p237_p2), %vm449_vm8, 4294967295, %v1283_v56  ;;  %vm445_vm10 = vcmask (!%p237_p2), 23552   ;;  %s1284_s8 = smov (!%p237_p2), 104  }
   0xb   : > { %v1407_v60 = vsel (!%p237_p2), %vm450_vm9, %v451_v57, 0  ;;  %s1285_s9 = smov (!%p237_p2), 48   ;;  %vm616_vm11 = vcmask (!%p237_p2), 1043456   ;;  %s1286_s14 = smov (!%p237_p2), 72  }
   0xc   : > { %1147 = vmatpush3.bf16.msra.mxu0 (!%p237_p2), %v313_v13  ;;  %vm371_vm5 = vcmp.le.s32.totalorder (!%p237_p2), %v370_v39, 4  ;;  %v374_v13 = vld [vmem:[%s1498_s5] sm:$0xff] (!%p237_p2)  ;;  %s1287_s15 = smov (!%p237_p2), 40  }
   0xd   : > { %s1502_s25 = smov (!%p266_p3, %s1091_s25), 1  ;;  %1158 = vmatprep.subr.bf16.mxu0 %v1273_v10  ;;  %vm372_vm6 = vmand %vm369_vm4, %vm371_vm5 }
   0xe   : > { %s1096_s26 = sshll.u32 %s1502_s25, 2  ;;  %v1397_v42 = vsel %vm372_vm6, 0.0, %v1278_v41 }
   0xf   : > { %s269_s29 = scalar_lea.vmem %s1493_s0, %s1096_s26 }
  0x10   : > { %v1344_v0 = vld [vmem:[%s269_s29] sm:$0x7]  ;;  %s1281_s29 = smov 80  }
  0x11   : > { %v279_v1 = vsel %vm278_vm0, %v1344_v0, 0.0 }
  0x12   : > { %280 = vadd.xlane.f32.xlu0 %v279_v1 }
  0x9f   : > { %v281_v2 = vpop.xlane.xlu0 %280 }
  0xa0   : > { %v283_v3 = vmul.f32 0.03125, %v281_v2 }
  0xa2   : > { %v284_v4 = vsub.f32 %v1344_v0, %v283_v3 }
  0xa4   : > { %v285_v5 = vmul.f32 %v284_v4, %v284_v4 }
  0xa6   : > { %v286_v6 = vsel %vm278_vm0, %v285_v5, 0.0 }
  0xa7   : > { %287 = vadd.xlane.f32.xlu0 %v286_v6 }
 0x134   : > { %v288_v14 = vpop.xlane.xlu0 %287 }
 0x135   : > { %v289_v15 = vmul.f32 0.03125, %v288_v14  ;;  %v498_v14 = vpack.c.bf16 %v374_v13, %v374_v13 }
 0x137   : > { %v290_v16 = vadd.f32 1e-05, %v289_v15  ;;  %v664_v15 = vsel %vm616_vm11, %v498_v14, 0 }
 0x139   : > { %1247 = vrsqrt.f32 %v290_v16  ;;  %v375_v16 = vld [vmem:[%s1498_s5 + $0x8] sm:$0xff] }
 0x143   : > { %v1248_v17 = vpop.eup %1247 }
 0x144   : > { %v292_v19 = vmul.f32 %v1248_v17, %v284_v4  ;;  %v612_v17 = vpack.c.bf16 %v375_v16, %v375_v16 }
 0x146   : > { %v299_v21 = vmul.f32 %v1098_v18, %v292_v19  ;;  %v618_v18 = vsel %vm616_vm11, %v612_v17, 0 }
 0x148   : > { %v306_v22 = vadd.f32 %v1099_v20, %v299_v21 }
 0x14a   : > { %v311_v23 = vpack.c.bf16 %v306_v22, %v306_v22 }
 0x14c   : > { %1149 = vmatmul.mubr.msk.bf16.vlgmr.msra.gmra.mrb[0].mxu0 %vm321_vm2, %v311_v23 }
 0x14d   : > { %1160 = vmatprep.mubr.msk.bf16.mxu0 %vm1274_vm1, %v1273_v10 }
 0x21f   : > { %v359_v25 = vpop.f32.mrb[0].mxu0 }
 0x220   : > { %v360_v26 = vadd.f32 %v1100_v24, %v359_v25  ;;  %v1150_v27 = vpop.f32.mrb[1].mxu0 }
 0x221   : > { %v362_v28 = vpop.f32.mrb[2].mxu0 }
 0x222   : > { %v1381_v29 = vpack.c.bf16 %v360_v26, %v360_v26  ;;  %v1151_v30 = vpop.f32.mrb[3].mxu0 }
 0x224   : > { %499 = vrot.lane.b32.xlu0 %v1381_v29, %s1275_s21  ;;  %380 = vrot.lane.b32.xlu1 %v1381_v29, %s1276_s22 }
 0x228   : > { %501 = vrot.lane.b32.xlu1 %v1381_v29, %s1277_s23 }
 0x296   : > { %v381_v31 = vpop.permute.xlu1 %380  ;;  %v500_v35 = vpop.permute.xlu0 %499 }
 0x297   : > { %v387_v32 = vsel %vm382_vm3, %v381_v31, 0 }
 0x298   : > { %1153 = vmatpush3.bf16.xpose.msra.mxu1 %v387_v32 }
 0x299   : > { %1164 = vmatprep.subr.bf16.mxu1 %v1273_v10 }
 0x29a   : > { %v502_v33 = vpop.permute.xlu1 %501 }
 0x29b   : > { %v507_v34 = vsel %vm382_vm3, %v502_v33, 0 }
 0x29f   : > { %1155 = vmatmul.mubr.msk.bf16.vlgmr.msra.gmra.mrb[0].mxu1 %vm382_vm3, %v1381_v29 }
 0x2a0   : > { %1165 = vmatpush3.bf16.xpose.msra.mxu1 %v507_v34  ;;  %1166 = vmatprep.mubr.msk.bf16.mxu1 %vm1274_vm1, %v1273_v10 }
 0x2a1   : > { %1176 = vmatprep.subr.bf16.mxu1 %v1273_v10 }
 0x2a7   : > { %1167 = vmatmul.mubr.msk.bf16.vlgmr.msra.gmra.mrb[4].mxu1 %vm382_vm3, %v500_v35 }
 0x2a8   : > { %1178 = vmatprep.mubr.msk.bf16.mxu1 %vm1274_vm1, %v1273_v10  ;;  %1177 = vmatpush3.bf16.msra.mxu1 %v618_v18 }
 0x2a9   : > { %1188 = vmatprep.subr.bf16.mxu1 %v1273_v10 }
 0x372   : > { %v423_v40 = vpop.f32.mrb[0].mxu1 }
 0x373   : > { %v429_v43 = vmul.f32 0.35355338, %v423_v40  ;;  %v1156_v44 = vpop.f32.mrb[1].mxu1 }
 0x374   : > { %v426_v45 = vpop.f32.mrb[2].mxu1 }
 0x375   : > { %v1157_v46 = vpop.f32.mrb[3].mxu1  ;;  %v430_v47 = vadd.f32 %v429_v43, %v1397_v42 }
 0x377   : > { %v432_v48 = vsel %vm431_vm7, %v430_v47, -inf }
 0x378   : > { %433 = vmax.xlane.f32.xlu1 %v432_v48 }
 0x37a   : > { %v543_v49 = vpop.f32.mrb[4].mxu1 }
 0x37b   : > { %v549_v50 = vmul.f32 0.35355338, %v543_v49  ;;  %v1168_v51 = vpop.f32.mrb[5].mxu1 }
 0x37c   : > { %v546_v52 = vpop.f32.mrb[6].mxu1 }
 0x37d   : > { %v1169_v53 = vpop.f32.mrb[7].mxu1  ;;  %v550_v54 = vadd.f32 %v549_v50, %v1397_v42 }
 0x37f   : > { %v551_v55 = vsel %vm431_vm7, %v550_v54, -inf }
 0x380   : > { %552 = vmax.xlane.f32.xlu0 %v551_v55 }
 0x389   : > { %443 = vrot.lane.b32.xlu1 %v1381_v29, %s1279_s27  ;;  %s273_s27 = scalar_lea.vmem %s1500_s7, %s1096_s26 }
 0x396   : > { %562 = vrot.lane.b32.xlu0 %v1381_v29, %s1280_s28 }
 0x39a   : > { %708 = vrot.lane.b32.xlu0 %v1381_v29, %s1281_s29 }
 0x39e   : > { %706 = vrot.lane.b32.xlu0 %v1381_v29, %s1282_s30 }
 0x405   : > { %v434_v58 = vpop.xlane.xlu1 %433 }
 0x406   : > { %v435_v59 = vsub.f32 %v430_v47, %v434_v58 }
 0x408   : > { %v436_v61 = vmul.f32 1.442695, %v435_v59 }
 0x409   : > { %v444_v62 = vpop.permute.xlu1 %443 }
 0x40a   : > { %1249 = vpow2.f32 %v436_v61  ;;  %v454_v63 = vand.u32 %v1407_v60, %v444_v62 }
 0x40c   : > { %1159 = vmatpush3.bf16.msra.mxu0 %v454_v63 }
 0x40d   : > { %v553_v1 = vpop.xlane.xlu0 %552  ;;  %1170 = vmatprep.subr.bf16.mxu0 %v1273_v10 }
 0x40e   : > { %v554_v2 = vsub.f32 %v550_v54, %v553_v1 }
 0x410   : > { %v555_v3 = vmul.f32 1.442695, %v554_v2 }
 0x411   : > { %v563_v4 = vpop.permute.xlu0 %562 }
 0x412   : > { %1251 = vpow2.f32 %v555_v3  ;;  %v568_v8 = vand.u32 %v563_v4, %v1407_v60 }
 0x414   : > { %v1250_v5 = vpop.eup %1249 }
 0x415   : > { %v438_v6 = vsel %vm431_vm7, %v1250_v5, 0.0  ;;  %v442_v7 = vpack.c.bf16 %v1250_v5, %v1250_v5  ;;  %v709_v19 = vpop.permute.xlu0 %708  ;;  %v376_v5 = vld [vmem:[%s1498_s5 + $0x10] sm:$0xff] }
 0x416   : > { %439 = vadd.xlane.f32.xlu0 %v438_v6  ;;  %v714_v40 = vsel %vm382_vm3, %v709_v19, 0  ;;  %v819_v6 = vpack.c.bf16 %v376_v5, %v376_v5 }
 0x417   : > { %1161 = vmatmul.mubr.msk.bf16.vlgmr.msra.gmra.mrb[4].mxu0 %vm445_vm10, %v442_v7 }
 0x418   : > { %1171 = vmatpush3.bf16.msra.mxu0 %v568_v8  ;;  %1172 = vmatprep.mubr.msk.bf16.mxu0 %vm1274_vm1, %v1273_v10  ;;  %v824_v7 = vsel %vm616_vm11, %v819_v6, 0 }
 0x419   : > { %1182 = vmatprep.subr.bf16.mxu0 %v1273_v10  ;;  %v707_v20 = vpop.permute.xlu0 %706 }
 0x41c   : > { %v1252_v9 = vpop.eup %1251 }
 0x41d   : > { %v557_v11 = vsel %vm431_vm7, %v1252_v9, 0.0  ;;  %v561_v12 = vpack.c.bf16 %v1252_v9, %v1252_v9 }
 0x41e   : > { %558 = vadd.xlane.f32.xlu1 %v557_v11 }
 0x41f   : > { %1173 = vmatmul.mubr.msk.bf16.vlgmr.msra.gmra.mrb[8].mxu0 %vm445_vm10, %v561_v12 }
 0x420   : > { %1184 = vmatprep.mubr.msk.bf16.mxu0 %vm1274_vm1, %v1273_v10  ;;  %1183 = vmatpush3.bf16.msra.mxu0 %v664_v15 }
 0x421   : > { %1194 = vmatprep.subr.bf16.mxu0 %v1273_v10 }
 0x42c   : > { %867 = vrot.lane.b32.xlu0 %v1381_v29, %s1284_s8 }
 0x42f   : > { %769 = vrot.lane.b32.xlu1 %v1381_v29, %s1285_s9 }
 0x4a3   : > { %v440_v21 = vpop.xlane.xlu0 %439 }
 0x4a4   : > { %1253 = vrcp.f32 %v440_v21 }
 0x4a7   : > { %v868_v4 = vpop.permute.xlu0 %867 }
 0x4ab   : > { %v559_v22 = vpop.xlane.xlu1 %558 }
 0x4ac   : > { %1255 = vrcp.f32 %v559_v22 }
 0x4ae   : > { %v1254_v23 = vpop.eup %1253 }
 0x4af   : > { %v770_v25 = vpop.permute.xlu1 %769 }
 0x4b0   : > { %v775_v32 = vand.u32 %v770_v25, %v1407_v60 }
 0x4b6   : > { %v1256_v33 = vpop.eup %1255 }
 0x4ea   : > { %v490_v24 = vpop.f32.mrb[4].mxu0 }
 0x4eb   : > { %v496_v26 = vmul.f32 %v1254_v23, %v490_v24  ;;  %v1162_v27 = vpop.f32.mrb[5].mxu0 }
 0x4ec   : > { %v493_v28 = vpop.f32.mrb[6].mxu0 }
 0x4ed   : > { %v497_v30 = vpack.c.bf16 %v496_v26, %v496_v26  ;;  %v1163_v31 = vpop.f32.mrb[7].mxu0 }
 0x4ef   : > { %1185 = vmatmul.mubr.msk.bf16.vlgmr.msra.gmra.mrb[12].mxu0 %vm382_vm3, %v497_v30 }
 0x4f0   : > { %1195 = vmatpush3.bf16.msra.mxu0 %v775_v32  ;;  %1196 = vmatprep.mubr.msk.bf16.mxu0 %vm1274_vm1, %v1273_v10 }
 0x4f1   : > { %1206 = vmatprep.subr.bf16.mxu0 %v1273_v10 }
 0x4f2   : > { %v604_v34 = vpop.f32.mrb[8].mxu0 }
 0x4f3   : > { %v610_v35 = vmul.f32 %v1256_v33, %v604_v34  ;;  %v1174_v36 = vpop.f32.mrb[9].mxu0 }
 0x4f4   : > { %v607_v37 = vpop.f32.mrb[10].mxu0 }
 0x4f5   : > { %v611_v38 = vpack.c.bf16 %v610_v35, %v610_v35  ;;  %v1175_v39 = vpop.f32.mrb[11].mxu0 }
 0x4f7   : > { %1179 = vmatmul.mubr.msk.bf16.vlgmr.msra.gmra.mrb[8].mxu1 %vm382_vm3, %v611_v38 }
 0x4f8   : > { %1189 = vmatpush3.bf16.xpose.msra.mxu1 %v714_v40  ;;  %1190 = vmatprep.mubr.msk.bf16.mxu1 %vm1274_vm1, %v1273_v10 }
 0x4f9   : > { %1200 = vmatprep.subr.bf16.mxu1 %v1273_v10 }
 0x4ff   : > { %1191 = vmatmul.mubr.msk.bf16.vlgmr.msra.gmra.mrb[12].mxu1 %vm382_vm3, %v707_v20 }
 0x500   : > { %1202 = vmatprep.mubr.msk.bf16.mxu1 %vm1274_vm1, %v1273_v10  ;;  %1201 = vmatpush3.bf16.msra.mxu1 %v824_v7 }
 0x501   : > { %1212 = vmatprep.subr.bf16.mxu1 %v1273_v10 }
 0x5c2   : > { %v700_v41 = vpop.f32.mrb[12].mxu0 }
 0x5c3   : > { %v1186_v43 = vpop.f32.mrb[13].mxu0 }
 0x5c4   : > { %v703_v44 = vpop.f32.mrb[14].mxu0 }
 0x5c5   : > { %v1187_v45 = vpop.f32.mrb[15].mxu0 }
 0x5ca   : > { %v654_v46 = vpop.f32.mrb[8].mxu1 }
 0x5cb   : > { %v1446_v47 = vadd.f32 %v700_v41, %v654_v46  ;;  %v1180_v48 = vpop.f32.mrb[9].mxu1 }
 0x5cc   : > { %v657_v49 = vpop.f32.mrb[10].mxu1 }
 0x5cd   : > { %v1181_v50 = vpop.f32.mrb[11].mxu1 }
 0x5d2   : > { %v750_v51 = vpop.f32.mrb[12].mxu1 }
 0x5d3   : > { %v756_v52 = vmul.f32 0.35355338, %v750_v51  ;;  %v1192_v53 = vpop.f32.mrb[13].mxu1 }
 0x5d4   : > { %v753_v54 = vpop.f32.mrb[14].mxu1 }
 0x5d5   : > { %v1193_v55 = vpop.f32.mrb[15].mxu1  ;;  %v757_v56 = vadd.f32 %v756_v52, %v1397_v42 }
 0x5d7   : > { %v758_v57 = vsel %vm431_vm7, %v757_v56, -inf }
 0x5d8   : > { %759 = vmax.xlane.f32.xlu1 %v758_v57 }
 0x5e9   : > { %869 = vrot.lane.b32.xlu1 %v1381_v29, %s1286_s14 }
 0x665   : > { %v760_v58 = vpop.xlane.xlu1 %759 }
 0x666   : > { %v761_v59 = vsub.f32 %v757_v56, %v760_v58 }
 0x668   : > { %v762_v61 = vmul.f32 1.442695, %v761_v59 }
 0x669   : > { %v870_v63 = vpop.permute.xlu1 %869 }
 0x66a   : > { %1257 = vpow2.f32 %v762_v61  ;;  %v875_v3 = vsel %vm382_vm3, %v870_v63, 0 }
 0x674   : > { %v1258_v62 = vpop.eup %1257 }
 0x675   : > { %v764_v1 = vsel %vm431_vm7, %v1258_v62, 0.0  ;;  %v768_v2 = vpack.c.bf16 %v1258_v62, %v1258_v62 }
 0x676   : > { %765 = vadd.xlane.f32.xlu1 %v764_v1 }
 0x677   : > { %1197 = vmatmul.mubr.msk.bf16.vlgmr.msra.gmra.mrb[16].mxu0 %vm445_vm10, %v768_v2 }
 0x678   : > { %1207 = vmatpush3.bf16.xpose.msra.mxu0 %v875_v3  ;;  %1208 = vmatprep.mubr.msk.bf16.mxu0 %vm1274_vm1, %v1273_v10 }
 0x679   : > { %1218 = vmatprep.subr.bf16.mxu0 %v1273_v10 }
 0x67f   : > { %1209 = vmatmul.mubr.msk.bf16.vlgmr.msra.gmra.mrb[20].mxu0 %vm382_vm3, %v868_v4 }
 0x680   : > { %1220 = vmatprep.mubr.msk.bf16.mxu0 %vm1274_vm1, %v1273_v10 }
 0x687   : > { %930 = vrot.lane.b32.xlu1 %v1381_v29, %s1287_s15 }
 0x703   : > { %v766_v8 = vpop.xlane.xlu1 %765 }
 0x704   : > { %1259 = vrcp.f32 %v766_v8 }
 0x707   : > { %v931_v12 = vpop.permute.xlu1 %930 }
 0x708   : > { %v936_v17 = vand.u32 %v931_v12, %v1407_v60 }
 0x70e   : > { %v1260_v9 = vpop.eup %1259 }
 0x74a   : > { %v811_v11 = vpop.f32.mrb[16].mxu0 }
 0x74b   : > { %v817_v13 = vmul.f32 %v1260_v9, %v811_v11  ;;  %v1198_v14 = vpop.f32.mrb[17].mxu0 }
 0x74c   : > { %v814_v15 = vpop.f32.mrb[18].mxu0 }
 0x74d   : > { %v818_v16 = vpack.c.bf16 %v817_v13, %v817_v13  ;;  %v1199_v29 = vpop.f32.mrb[19].mxu0 }
 0x74f   : > { %1203 = vmatmul.mubr.msk.bf16.vlgmr.msra.gmra.mrb[16].mxu1 %vm382_vm3, %v818_v16 }
 0x750   : > { %1213 = vmatpush3.bf16.msra.mxu1 %v936_v17  ;;  %1214 = vmatprep.mubr.msk.bf16.mxu1 %vm1274_vm1, %v1273_v10  ;;  %v377_v10 = vld [vmem:[%s1498_s5 + $0x18] sm:$0xff] }
 0x751   : > { %v980_v31 = vpack.c.bf16 %v377_v10, %v377_v10 }
 0x752   : > { %v911_v18 = vpop.f32.mrb[20].mxu0 }
 0x753   : > { %v917_v19 = vmul.f32 0.35355338, %v911_v18  ;;  %v1210_v20 = vpop.f32.mrb[21].mxu0 }
 0x754   : > { %v914_v21 = vpop.f32.mrb[22].mxu0 }
 0x755   : > { %v1211_v22 = vpop.f32.mrb[23].mxu0  ;;  %v918_v23 = vadd.f32 %v917_v19, %v1397_v42  ;;  %v985_v42 = vsel %vm616_vm11, %v980_v31, 0 }
 0x756   : > { %1219 = vmatpush3.bf16.msra.mxu0 %v985_v42 }
 0x757   : > { %v919_v24 = vsel %vm431_vm7, %v918_v23, -inf }
 0x758   : > { %920 = vmax.xlane.f32.xlu0 %v919_v24 }
 0x7e5   : > { %v921_v25 = vpop.xlane.xlu0 %920 }
 0x7e6   : > { %v922_v26 = vsub.f32 %v918_v23, %v921_v25 }
 0x7e8   : > { %v923_v27 = vmul.f32 1.442695, %v922_v26 }
 0x7ea   : > { %1261 = vpow2.f32 %v923_v27 }
 0x7f4   : > { %v1262_v60 = vpop.eup %1261 }
 0x7f5   : > { %v925_v28 = vsel %vm431_vm7, %v1262_v60, 0.0  ;;  %v929_v30 = vpack.c.bf16 %v1262_v60, %v1262_v60 }
 0x7f6   : > { %926 = vadd.xlane.f32.xlu0 %v925_v28 }
 0x7f7   : > { %1215 = vmatmul.mubr.msk.bf16.vlgmr.msra.gmra.mrb[20].mxu1 %vm445_vm10, %v929_v30 }
 0x822   : > { %v860_v32 = vpop.f32.mrb[16].mxu1 }
 0x823   : > { %v866_v33 = vadd.f32 %v860_v32, %v1446_v47  ;;  %v1204_v34 = vpop.f32.mrb[17].mxu1  ;;  %v1114_v47 = vld [vmem:[%s1499_s6] ss:$0 sm:$0xff] }
 0x824   : > { %v863_v35 = vpop.f32.mrb[18].mxu1 }
 0x825   : > { %v1205_v36 = vpop.f32.mrb[19].mxu1 }
 0x883   : > { %v927_v37 = vpop.xlane.xlu0 %926 }
 0x884   : > { %1263 = vrcp.f32 %v927_v37 }
 0x88e   : > { %v1264_v38 = vpop.eup %1263 }
 0x8ca   : > { %v972_v39 = vpop.f32.mrb[20].mxu1 }
 0x8cb   : > { %v978_v40 = vmul.f32 %v1264_v38, %v972_v39  ;;  %v1216_v41 = vpop.f32.mrb[21].mxu1 }
 0x8cc   : > { %v975_v43 = vpop.f32.mrb[22].mxu1 }
 0x8cd   : > { %v979_v44 = vpack.c.bf16 %v978_v40, %v978_v40  ;;  %v1217_v45 = vpop.f32.mrb[23].mxu1 }
 0x8cf   : > { %1221 = vmatmul.mubr.msk.bf16.vlgmr.msra.gmra.mrb[24].mxu0 %vm382_vm3, %v979_v44 }
 0x9a2   : > { %v1021_v46 = vpop.f32.mrb[24].mxu0 }
 0x9a3   : > { %v1027_v48 = vadd.f32 %v1021_v46, %v866_v33  ;;  %v1222_v49 = vpop.f32.mrb[25].mxu0 }
 0x9a4   : > { %v1024_v50 = vpop.f32.mrb[26].mxu0 }
 0x9a5   : > { %v1028_v51 = vadd.f32 %v1027_v48, %v1344_v0  ;;  %v1223_v52 = vpop.f32.mrb[27].mxu0 }
 0x9a7   : > { %v1036_v53 = vadd.f32 %v1114_v47, %v1028_v51 }
 0x9a9   : > { %1037 = vst.msk [vmem:[%s273_s27] sm:$0x7] %vm278_vm0, %v1036_v53 }
 0x9aa PF: > { %s17_s24 = sadd.s32 1, %s1271_s24  }
 0x9ab   : > { %p14_p4 = scmp.ge.s32.totalorder %s17_s24, 4  }
 0x9ad   :  { %16 = sbr.rel (!%p14_p4) target bundleno = 1 (0x1), region = 78 }

// kernel: _lambda_.24
= control target key start
LH: loop header
LB: loop body
LE: loop exit
PB: predicated region body
PF: predicated region fallthrough
CT: control target
= control target key end

     0   :  { %v337_v7 = vmov 0.0   ;;  %v339_v8 = vmov 0.0   ;;  %s341_s28 = smov 0   ;;  %s376_s0 = inlined_call_operand.vmem [shape: f32[7,2,16], index: 0, kind: input, shape index: {}]   ;;  %s377_s1 = inlined_call_operand.vmem [shape: f32[16,128], index: 1, kind: input, shape index: {}]   ;;  %s378_s2 = inlined_call_operand.vmem [shape: f32[32,128], index: 2, kind: input, shape index: {}]   ;;  %s379_s3 = inlined_call_operand.vmem [shape: f32[1,128], index: 3, kind: input, shape index: {}]   ;;  %s380_s4 = inlined_call_operand.vmem [shape: f32[7,2,32], index: 4, kind: output, shape index: {}]  }
   0x1   :  { %v305_v0 = vld [vmem:[%s377_s1] sm:$0xff]  ;;  %v310_v1 = vld [vmem:[%s377_s1 + $0x8] sm:$0xff]  ;;  %v325_v4 = vld [vmem:[%s378_s2 + $0x10] sm:$0xff] }
   0x2   :  { %v315_v2 = vld [vmem:[%s378_s2] sm:$0xff]  ;;  %v320_v3 = vld [vmem:[%s378_s2 + $0x8] sm:$0xff]  ;;  %v330_v5 = vld [vmem:[%s378_s2 + $0x18] sm:$0xff] }
   0x3   :  { %v335_v6 = vld [vmem:[%s379_s3] ss:$0 sm:$0xff] }
   0x4 LB: > { %v39_v9 = vpack.c.bf16 %v320_v3, %v315_v2  ;;  %v37_v10 = vpack.c.bf16 %v310_v1, %v305_v0  ;;  %v273_v11 = vmov 0.0   ;;  %v38_v12 = vpack.c.bf16 %v267_v8, %v267_v8  ;;  %s189_s2 = sshll.u32 %s271_s28, 1  ;;  %s275_s5 = smov 32   ;;  %s271_s28 = sphi %s341_s28, %s30_s28   ;;  %v267_v8 = vphi %v339_v8, %v162_v8   ;;  %v263_v7 = vphi %v337_v7, %v156_v7  }
   0x5   : > { %199 = vmatprep.subr.bf16.mxu0 %v273_v11  ;;  %207 = vmatprep.subr.bf16.mxu1 %v273_v11  ;;  %v40_v13 = vpack.c.bf16 %v330_v5, %v325_v4  ;;  %vm274_vm0 = vmmov 0   ;;  %s34_s30 = scalar_lea.vmem %s376_s0, %s189_s2  ;;  %vm88_vm1 = vcmask 130048   ;;  %vm44_vm2 = vcmask 261120   ;;  %s276_s6 = smov 64  }
   0x6   : > { %200 = vmatpush3.bf16.msra.mxu0 %v39_v9  ;;  %208 = vmatpush3.bf16.msra.mxu1 %v37_v10  ;;  %v35_v14 = vld [vmem:[%s34_s30] sm:$0x3]  ;;  %s167_s9 = scalar_lea.vmem %s380_s4, %s189_s2  ;;  %vm168_vm3 = vcmask 254976   ;;  %s30_s28 = sadd.s32 1, %s271_s28  }
   0x7   : > { %201 = vmatprep.subr.bf16.mxu0 %v273_v11  ;;  %209 = vmatprep.mubr.msk.bf16.mxu1 %vm274_vm0, %v273_v11  ;;  %v36_v15 = vpack.c.bf16 %v35_v14, %v35_v14  ;;  %p27_p0 = scmp.ge.s32.totalorder %s30_s28, 7  }
   0x8   : > { %42 = vrot.lane.b32.xlu0 %v38_v12, %s275_s5  ;;  %203 = vmatprep.mubr.msk.bf16.mxu0 %vm274_vm0, %v273_v11 }
   0x9   : > { %210 = vmatmul.mubr.msk.bf16.vlgmr.msra.gmra.mrb[0].mxu1 %vm88_vm1, %v36_v15 }
   0xa   : > { %202 = vmatpush3.bf16.msra.mxu0 %v40_v13 }
  0x7a   : > { %v43_v16 = vpop.permute.xlu0 %42 }
  0x7b   : > { %204 = vmatmul.mubr.msk.bf16.vlgmr.msra.gmra.mrb[0].mxu0 %vm44_vm2, %v43_v16 }
  0xdc   : > { %v126_v17 = vpop.f32.mrb[0].mxu1 }
  0xdd   : > { %v211_v18 = vpop.f32.mrb[1].mxu1 }
  0xde   : > { %v129_v19 = vpop.f32.mrb[2].mxu1 }
  0xdf   : > { %v212_v20 = vpop.f32.mrb[3].mxu1 }
 0x14e   : > { %v82_v21 = vpop.f32.mrb[0].mxu0 }
 0x14f   : > { %v127_v22 = vadd.f32 %v126_v17, %v82_v21  ;;  %v205_v23 = vpop.f32.mrb[1].mxu0 }
 0x150   : > { %v85_v24 = vpop.f32.mrb[2].mxu0 }
 0x151   : > { %v138_v25 = vadd.f32 %v335_v6, %v127_v22  ;;  %v206_v26 = vpop.f32.mrb[3].mxu0 }
 0x153   : > { %241 = vtanh.f32 %v138_v25  ;;  %v193_v28 = vmul.f32 -1.442695, %v138_v25 }
 0x155   : > { %243 = vpow2.f32 %v193_v28 }
 0x15d   : > { %v242_v27 = vpop.eup %241 }
 0x15e   : > { %148 = vrot.lane.b32.xlu0 %v242_v27, %s276_s6 }
 0x15f   : > { %v244_v29 = vpop.eup %243 }
 0x160   : > { %v142_v30 = vadd.f32 1.0, %v244_v29 }
 0x162   : > { %245 = vrcp.f32 %v142_v30 }
 0x16c   : > { %v246_v31 = vpop.eup %245 }
 0x16d   : > { %v146_v34 = vmul.f32 %v263_v7, %v246_v31 }
 0x1d0   : > { %v149_v32 = vpop.permute.xlu0 %148 }
 0x1d1   : > { %v151_v33 = vmul.f32 %v246_v31, %v149_v32 }
 0x1d3   : > { %153 = vrot.lane.b32.xlu1 %v151_v33, %s275_s5 }
 0x245   : > { %v154_v35 = vpop.permute.xlu1 %153 }
 0x246   : > { %v156_v7 = vadd.f32 %v154_v35, %v146_v34  }
 0x248   : > { %247 = vtanh.f32 %v156_v7 }
 0x252   : > { %v248_v36 = vpop.eup %247 }
 0x253   : > { %159 = vrot.lane.b32.xlu1 %v248_v36, %s276_s6 }
 0x2c5   : > { %v160_v37 = vpop.permute.xlu1 %159 }
 0x2c6   : > { %v162_v8 = vmul.f32 %v246_v31, %v160_v37  }
 0x2c8   : > { %164 = vrot.lane.b32.xlu0 %v162_v8, %s275_s5 }
 0x335   :  { %29 = sbr.rel (!%p27_p0) target bundleno = 4 (0x4), region = 45 }
 0x33a   : > { %v165_v38 = vpop.permute.xlu0 %164 }
 0x33b   : > { %169 = vst.msk [vmem:[%s167_s9] sm:$0x3] %vm168_vm3, %v165_v38 }

// kernel: _lambda_.25
= control target key start
LH: loop header
LB: loop body
LE: loop exit
PB: predicated region body
PF: predicated region fallthrough
CT: control target
= control target key end

     0   :  { %s968_s17 = smov 0   ;;  %s1080_s0 = inlined_call_operand.vmem [shape: f32[2,3,32], index: 0, kind: input, shape index: {}]   ;;  %s1081_s1 = inlined_call_operand.vmem [shape: f32[2,7,32], index: 1, kind: input, shape index: {}]   ;;  %s1082_s2 = inlined_call_operand.vmem [shape: f32[32,32], index: 2, kind: input, shape index: {}]   ;;  %s1083_s3 = inlined_call_operand.vmem [shape: f32[1,32], index: 3, kind: input, shape index: {}]   ;;  %s1084_s4 = inlined_call_operand.vmem [shape: f32[32,32], index: 4, kind: input, shape index: {}]   ;;  %s1085_s5 = inlined_call_operand.vmem [shape: f32[1,32], index: 5, kind: input, shape index: {}]   ;;  %s1086_s6 = inlined_call_operand.vmem [shape: f32[32,128], index: 6, kind: input, shape index: {}]   ;;  %s1087_s7 = inlined_call_operand.vmem [shape: f32[1,128], index: 7, kind: input, shape index: {}]   ;;  %s1088_s8 = inlined_call_operand.vmem [shape: f32[32,128], index: 8, kind: input, shape index: {}]   ;;  %s1089_s9 = inlined_call_operand.vmem [shape: f32[1,128], index: 9, kind: input, shape index: {}]   ;;  %s1090_s10 = inlined_call_operand.vmem [shape: f32[2,3,7,128], index: 10, kind: output, shape index: {0}]   ;;  %s1091_s11 = inlined_call_operand.vmem [shape: f32[2,3,128], index: 11, kind: output, shape index: {1}]  }
   0x1 LB: > { %s792_s18 = sadd.s32 4294967295, %s898_s17   ;;  %p796_p0 = scmp.ge.s32.totalorder %s898_s17, 1  ;;  %s898_s17 = sphi %s968_s17, %s22_s17  }
   0x2   : > { %p348_p1 = scmp.lt.s32.totalorder %s898_s17, 3 }
   0x4   : > { %p349_p2 = pnand %p796_p0, %p348_p1 }
   0x5   : > { %v414_v0 = vld [vmem:[%s1082_s2] sm:$0xff] (!%p349_p2)  ;;  %v415_v1 = vld [vmem:[%s1082_s2 + $0x8] sm:$0xff] (!%p349_p2)  ;;  %v416_v2 = vld [vmem:[%s1082_s2 + $0x10] sm:$0xff] (!%p349_p2)  ;;  %p395_p3 = scmp.lt.s32.totalorder (!%p349_p2), %s792_s18, 1  ;;  %v904_v3 = vmov (!%p349_p2), 0.0   ;;  %vm905_vm0 = vmmov (!%p349_p2), 0  }
   0x6   : > { %352 = sbr.rel (%p349_p2) target bundleno = 1106 (0x452), region = 60  ;;  %825 = vmatprep.subr.bf16.mxu0 (!%p349_p2), %v904_v3  ;;  %v419_v4 = vpack.c.bf16 (!%p349_p2), %v415_v1, %v414_v0  ;;  %v417_v5 = vld [vmem:[%s1082_s2 + $0x18] sm:$0xff] (!%p349_p2)  ;;  %829 = vmatprep.mubr.msk.bf16.mxu0 (!%p349_p2), %vm905_vm0, %v904_v3  ;;  %v532_v7 = vld [vmem:[%s1088_s8] sm:$0xff] (!%p349_p2)  ;;  %v533_v8 = vld [vmem:[%s1088_s8 + $0x8] sm:$0xff] (!%p349_p2)  ;;  %vm428_vm1 = vcmask (!%p349_p2), 261120   ;;  %vm472_vm2 = vcmask (!%p349_p2), 256000  }
   0x7   : > { %833 = vmatprep.subr.bf16.mxu1 (!%p349_p2), %v904_v3  ;;  %837 = vmatprep.mubr.msk.bf16.mxu1 (!%p349_p2), %vm905_vm0, %v904_v3  ;;  %v420_v6 = vpack.c.bf16 (!%p349_p2), %v417_v5, %v416_v2  ;;  %v536_v11 = vpack.c.bf16 (!%p349_p2), %v533_v8, %v532_v7  ;;  %v534_v12 = vld [vmem:[%s1088_s8 + $0x10] sm:$0xff] (!%p349_p2)  ;;  %v535_v13 = vld [vmem:[%s1088_s8 + $0x18] sm:$0xff] (!%p349_p2)  ;;  %v475_v15 = vld [vmem:[%s1084_s4] sm:$0xff] (!%p349_p2)  ;;  %vm585_vm3 = vcmask (!%p349_p2), 1042432  }
   0x8   : > { %826 = vmatpush3.bf16.msra.mxu0 (!%p349_p2), %v419_v4  ;;  %v537_v14 = vpack.c.bf16 (!%p349_p2), %v535_v13, %v534_v12  ;;  %v476_v16 = vld [vmem:[%s1084_s4 + $0x8] sm:$0xff] (!%p349_p2)  ;;  %v477_v17 = vld [vmem:[%s1084_s4 + $0x10] sm:$0xff] (!%p349_p2)  ;;  %v478_v19 = vld [vmem:[%s1084_s4 + $0x18] sm:$0xff] (!%p349_p2) }
   0x9   : > { %827 = vmatprep.subr.bf16.mxu0 (!%p349_p2), %v904_v3  ;;  %v480_v18 = vpack.c.bf16 (!%p349_p2), %v476_v16, %v475_v15  ;;  %v481_v20 = vpack.c.bf16 (!%p349_p2), %v478_v19, %v477_v17  ;;  %v801_v23 = vld [vmem:[%s1083_s3] ss:$0 sm:$0xff] (!%p349_p2)  ;;  %v600_v48 = vld [vmem:[%s1086_s6 + $0x8] sm:$0xff] (!%p349_p2)  ;;  %v601_v49 = vld [vmem:[%s1086_s6 + $0x10] sm:$0xff] (!%p349_p2) }
   0xa   : > { %v805_v29 = vld [vmem:[%s1089_s9] ss:$0 sm:$0xff] (!%p349_p2)  ;;  %v602_v50 = vld [vmem:[%s1086_s6 + $0x18] sm:$0xff] (!%p349_p2) }
   0xb   : > { %834 = vmatpush3.bf16.msra.mxu1 (!%p349_p2), %v480_v18  ;;  %v803_v44 = vld [vmem:[%s1085_s5] ss:$0 sm:$0xff] (!%p349_p2) }
   0xc   : > { %828 = vmatpush3.bf16.msra.mxu0 (!%p349_p2), %v420_v6  ;;  %835 = vmatprep.subr.bf16.mxu1 (!%p349_p2), %v904_v3  ;;  %v599_v47 = vld [vmem:[%s1086_s6] sm:$0xff] (!%p349_p2) }
   0xd   : > { %s1093_s18 = smov (!%p395_p3, %s792_s18), 1  ;;  %841 = vmatprep.subr.bf16.mxu0 %v904_v3  ;;  %v808_v51 = vld [vmem:[%s1087_s7] ss:$0 sm:$0xff] }
   0xe   : > { %s797_s27 = sshll.u32 %s1093_s18, 2  ;;  %s857_s28 = smul.u32 24, %s1093_s18 }
   0xf   : > { %s398_s16 = scalar_lea.vmem %s1080_s0, %s797_s27  ;;  %s798_s14 = sshll.u32 %s1093_s18, 3  ;;  %836 = vmatpush3.bf16.msra.mxu1 %v481_v20 }
  0x10   : > { %s1008_s21 = scalar_lea.vmem %s1090_s10, %s857_s28  ;;  %v413_v9 = vld [vmem:[%s398_s16] sm:$0x7]  ;;  %s402_s22 = scalar_lea.vmem %s1081_s1, %s798_s14 }
  0x11   : > { %v418_v10 = vpack.c.bf16 %v413_v9, %v413_v9  ;;  %v474_v21 = vld [vmem:[%s402_s22] sm:$0x7f]  ;;  %s411_s26 = scalar_lea.vmem %s1091_s11, %s797_s27  ;;  %s1065_s28 = smov 0  }
  0x12   : > { %v479_v22 = vpack.c.bf16 %v474_v21, %v474_v21 }
  0x13   : > { %830 = vmatmul.mubr.msk.bf16.vlgmr.msra.gmra.mrb[0].mxu0 %vm428_vm1, %v418_v10 }
  0x14   : > { %842 = vmatpush3.bf16.msra.mxu0 %v536_v11  ;;  %845 = vmatprep.mubr.msk.bf16.mxu0 %vm905_vm0, %v904_v3 }
  0x15   : > { %843 = vmatprep.subr.bf16.mxu0 %v904_v3  ;;  %838 = vmatmul.mubr.msk.bf16.vlgmr.msra.gmra.mrb[0].mxu1 %vm428_vm1, %v479_v22 }
  0x18   : > { %844 = vmatpush3.bf16.msra.mxu0 %v537_v14 }
  0x1b   : > { %846 = vmatmul.mubr.msk.bf16.vlgmr.msra.gmra.mrb[4].mxu0 %vm428_vm1, %v418_v10 }
  0xe6   : > { %v466_v24 = vpop.f32.mrb[0].mxu0 }
  0xe7   : > { %v467_v25 = vadd.f32 %v801_v23, %v466_v24  ;;  %v831_v26 = vpop.f32.mrb[1].mxu0 }
  0xe8   : > { %v469_v27 = vpop.f32.mrb[2].mxu0  ;;  %v526_v41 = vpop.f32.mrb[0].mxu1 }
  0xe9   : > { %473 = vst.msk [vmem:[#allocation2] sm:$0x7] %vm472_vm2, %v467_v25  ;;  %v832_v28 = vpop.f32.mrb[3].mxu0  ;;  %v839_v42 = vpop.f32.mrb[1].mxu1  ;;  %v527_v46 = vadd.f32 %v803_v44, %v526_v41 }
  0xea   : > { %v529_v43 = vpop.f32.mrb[2].mxu1 }
  0xeb   : > { %v840_v45 = vpop.f32.mrb[3].mxu1 }
  0xee   : > { %v579_v30 = vpop.f32.mrb[4].mxu0 }
  0xef   : > { %v580_v31 = vadd.f32 %v805_v29, %v579_v30  ;;  %v847_v32 = vpop.f32.mrb[5].mxu0 }
  0xf0   : > { %v582_v33 = vpop.f32.mrb[6].mxu0 }
  0xf1   : > { %v848_v34 = vpop.f32.mrb[7].mxu0  ;;  %v586_v35 = vsel %vm585_vm3, %v580_v31, -inf }
  0xf2   : > { %587 = vmax.xlane.f32.xlu0 %v586_v35 }
 0x17f   : > { %v588_v36 = vpop.xlane.xlu0 %587 }
 0x180   : > { %v589_v37 = vsub.f32 %v580_v31, %v588_v36 }
 0x182   : > { %v590_v38 = vmul.f32 1.442695, %v589_v37 }
 0x184   : > { %878 = vpow2.f32 %v590_v38 }
 0x18e   : > { %v879_v39 = vpop.eup %878 }
 0x18f   : > { %v592_v40 = vsel %vm585_vm3, %v879_v39, 0.0 }
 0x190   : > { %593 = vadd.xlane.f32.xlu0 %v592_v40 }
 0x21d   : > { %v594_v52 = vpop.xlane.xlu0 %593 }
 0x21e   : > { %880 = vlog2.f32 %v594_v52 }
 0x228   : > { %v881_v53 = vpop.eup %880 }
 0x229   : > { %v596_v54 = vmul.f32 0.6931472, %v881_v53 }
 0x22b   : > { %v597_v55 = vsub.f32 %v589_v37, %v596_v54 }
 0x22d   : > { %598 = vst [vmem:[%s411_s26] sm:$0x7] %v597_v55 }
 0x22e LB: >> { %v619_v56 = vpack.c.bf16 %v600_v48, %v599_v47  ;;  %v906_v57 = vmov 0.0   ;;  %vm907_vm4 = vmmov 0   ;;  %v620_v58 = vpack.c.bf16 %v602_v50, %v601_v49  ;;  %s610_s18 = scalar_lea.vmem [#allocation2], %s902_s28  ;;  %s810_s27 = sshll.u32 %s902_s28, 3  ;;  %s902_s28 = sphi %s1065_s28, %s609_s28  }
 0x22f   : >> { %849 = vmatprep.subr.bf16.mxu0 %v906_v57  ;;  %853 = vmatprep.mubr.msk.bf16.mxu0 %vm907_vm4, %v906_v57  ;;  %v807_v59 = vld [vmem:[%s610_s18] ss:$0 sm:$0xff]  ;;  %vm670_vm5 = vcmask 1046528   ;;  %s684_s29 = scalar_lea.vmem %s1008_s21, %s810_s27  ;;  %s609_s28 = sadd.s32 1, %s902_s28  }
 0x230   : >> { %850 = vmatpush3.bf16.msra.mxu0 %v619_v56  ;;  %v616_v60 = vadd.f32 %v807_v59, %v527_v46  ;;  %p606_p4 = scmp.ge.s32.totalorder %s609_s28, 3  }
 0x231   : >> { %851 = vmatprep.subr.bf16.mxu0 %v906_v57 }
 0x232   : >> { %882 = vtanh.f32 %v616_v60 }
 0x234   : >> { %852 = vmatpush3.bf16.msra.mxu0 %v620_v58 }
 0x23c   : >> { %v883_v61 = vpop.eup %882 }
 0x23d   : >> { %v618_v62 = vpack.c.bf16 %v883_v61, %v883_v61 }
 0x23f   : >> { %854 = vmatmul.mubr.msk.bf16.vlgmr.msra.gmra.mrb[0].mxu0 %vm428_vm1, %v618_v62 }
 0x312   : >> { %v664_v63 = vpop.f32.mrb[0].mxu0 }
 0x313   : >> { %v665_v0 = vadd.f32 %v808_v51, %v664_v63  ;;  %v855_v1 = vpop.f32.mrb[1].mxu0 }
 0x314   : >> { %v667_v2 = vpop.f32.mrb[2].mxu0 }
 0x315   : >> { %v856_v3 = vpop.f32.mrb[3].mxu0  ;;  %v671_v4 = vsel %vm670_vm5, %v665_v0, -inf }
 0x316   : >> { %672 = vmax.xlane.f32.xlu0 %v671_v4 }
 0x3a3   : >> { %v673_v5 = vpop.xlane.xlu0 %672 }
 0x3a4   : >> { %v674_v6 = vsub.f32 %v665_v0, %v673_v5 }
 0x3a6   : >> { %v675_v7 = vmul.f32 1.442695, %v674_v6 }
 0x3a8   : >> { %884 = vpow2.f32 %v675_v7 }
 0x3b2   : >> { %v885_v8 = vpop.eup %884 }
 0x3b3   : >> { %v677_v9 = vsel %vm670_vm5, %v885_v8, 0.0 }
 0x3b4   : >> { %678 = vadd.xlane.f32.xlu0 %v677_v9 }
 0x441   : >> { %v679_v10 = vpop.xlane.xlu0 %678 }
 0x442   : >> { %886 = vlog2.f32 %v679_v10 }
 0x44b   : > { %608 = sbr.rel (!%p606_p4) target bundleno = 558 (0x22e), region = 114 }
 0x44c   : >> { %v887_v11 = vpop.eup %886 }
 0x44d   : >> { %v681_v12 = vmul.f32 0.6931472, %v887_v11 }
 0x44f   : >> { %v682_v13 = vsub.f32 %v674_v6, %v681_v12 }
 0x451   : >> { %685 = vst [vmem:[%s684_s29] sm:$0x7f] %v682_v13 }
 0x452 PF: > { %s22_s17 = sadd.s32 1, %s898_s17  }
 0x453   : > { %p19_p5 = scmp.ge.s32.totalorder %s22_s17, 4  }
 0x455   :  { %21 = sbr.rel (!%p19_p5) target bundleno = 1 (0x1), region = 125 }

</bundles_post_ra>
